<compile_context>
chip_gen: v7x
topology: tpu7x:2x2x1
jax: 0.10.0
libtpu: 0.0.40
codegen_flags: <defaults>
</compile_context>

<pallas_src>
import functools

import numpy as np
import jax
import jax.numpy as jnp
from jax.experimental import pallas as pl
from jax.experimental.pallas import tpu as pltpu


_K1, _K2 = 8, 4          # conv kernel sizes from the PyTorch module
_LANES = 256             # lane-padded width of every matmul N / activation


# ----------------------------------------------------------------------------
# Static layout of the flat bf16 weight slab: name -> (row offset, K rows)
# ----------------------------------------------------------------------------
def _slab_layout(mat_size, pos_dim):
    oh1 = mat_size - _K1 + 1
    oh2 = oh1 - _K2 + 1
    blocks = [(f"c1_k{k}", mat_size) for k in range(_K1)]
    blocks += [(f"c2_k{k}", _LANES) for k in range(_K2)]
    blocks += [(f"fc_r{r}", _LANES) for r in range(oh2)]
    blocks += [("l1a", pos_dim), ("l1b", pos_dim),
               ("l2a", _LANES), ("l2b", _LANES),
               ("ja", _LANES), ("jb", _LANES), ("head", _LANES)]
    layout, off = {}, 0
    for name, k in blocks:
        layout[name] = (off, k)
        off += -(-k // 16) * 16        # round rows up to the bf16 (16,128) tile
    return layout, off


# ----------------------------------------------------------------------------
# Fused kernel: conv1 + conv2 + fc_cnn + positions MLP + join + policy|value
# ----------------------------------------------------------------------------
def _fused_kernel(x_ref, pos_ref, w_ref, b_ref, out_ref, h1_ref, h2_ref,
                  *, bp, oh1, oh2, layout):
    f32, bf16 = jnp.float32, jnp.bfloat16

    def mm(act, name):                       # bf16 MXU operands, f32 accumulation
        off, k = layout[name]
        return jnp.dot(act, w_ref[off:off + k, :], preferred_element_type=f32)

    def bias(row):
        return b_ref[row:row + 1, :]

    # ---- Conv2d(1,16,8x8) + Tanh.  rows=(oh1, b_pad), lanes=(ow1, c1) padded to 256.
    acc = mm(x_ref[0:oh1 * bp, :], "c1_k0") + bias(0)
    for kh in range(1, _K1):
        acc = acc + mm(x_ref[kh * bp:(kh + oh1) * bp, :], f"c1_k{kh}")
    h1_ref[...] = jnp.tanh(acc).astype(bf16)

    # ---- Conv2d(16,32,4x4) + Tanh.  rows=(oh2, b_pad), lanes=(ow2, c2) padded to 256.
    acc = mm(h1_ref[0:oh2 * bp, :], "c2_k0") + bias(1)
    for kh in range(1, _K2):
        acc = acc + mm(h1_ref[kh * bp:(kh + oh2) * bp, :], f"c2_k{kh}")
    h2_ref[...] = jnp.tanh(acc).astype(bf16)

    # ---- Flatten + Linear(flatten, 256) + Tanh, accumulated over conv2 output rows.
    acc = mm(h2_ref[0:bp, :], "fc_r0") + bias(2)
    for r in range(1, oh2):
        acc = acc + mm(h2_ref[r * bp:(r + 1) * bp, :], f"fc_r{r}")
    cnn_out = jnp.tanh(acc).astype(bf16)

    # ---- positions MLP: Linear(pos,512)+Tanh (512 split into two 256 halves),
    #      then Linear(512,256)+Tanh.
    l1a = jnp.tanh(mm(pos_ref[...], "l1a") + bias(3)).astype(bf16)
    l1b = jnp.tanh(mm(pos_ref[...], "l1b") + bias(4)).astype(bf16)
    lin_out = jnp.tanh(mm(l1a, "l2a") + mm(l1b, "l2b") + bias(5)).astype(bf16)

    # ---- join: tanh(cat(cnn_out, lin_out) @ Wj^T + bj) without the concat.
    joined = jnp.tanh(mm(cnn_out, "ja") + mm(lin_out, "jb") + bias(6)).astype(bf16)

    # ---- merged lane-padded policy|value head (no activation).
    out_ref[...] = mm(joined, "head") + bias(7)


# ----------------------------------------------------------------------------
# Init-time weight packing (folds im2col / flatten / concat / lane padding into weights)
# ----------------------------------------------------------------------------
def init_torch_params(key, pos_dim, mat_size, num_outputs):
    """PyTorch-layout parameters with nn.Conv2d/nn.Linear default init."""
    oh1 = mat_size - _K1 + 1
    oh2 = oh1 - _K2 + 1
    flatten = 32 * oh2 * oh2

    def unif(k, shape, fan_in):
        lim = 1.0 / float(np.sqrt(fan_in))
        return jax.random.uniform(k, shape, jnp.float32, -lim, lim)

    ks = jax.random.split(key, 16)
    return {
        "w1": unif(ks[0], (16, 1, 8, 8), 64),   "b1": unif(ks[1], (16,), 64),
        "w2": unif(ks[2], (32, 16, 4, 4), 256), "b2": unif(ks[3], (32,), 256),
        "wfc": unif(ks[4], (256, flatten), flatten),
        "bfc": unif(ks[5], (256,), flatten),
        "wl1": unif(ks[6], (512, pos_dim), pos_dim),
        "bl1": unif(ks[7], (512,), pos_dim),
        "wl2": unif(ks[8], (256, 512), 512),    "bl2": unif(ks[9], (256,), 512),
        "wj": unif(ks[10], (256, 512), 512),    "bj": unif(ks[11], (256,), 512),
        "wp": unif(ks[12], (num_outputs, 256), 256),
        "bp": unif(ks[13], (num_outputs,), 256),
        "wv": unif(ks[14], (1, 256), 256),      "bv": unif(ks[15], (1,), 256),
    }


def pack_params(tp, mat_size, pos_dim, num_outputs):
    assert num_outputs + 1 <= _LANES
    oh1 = mat_size - _K1 + 1
    oh2 = oh1 - _K2 + 1
    layout, total_rows = _slab_layout(mat_size, pos_dim)
    slab = np.zeros((total_rows, _LANES), np.float32)   # zero => padded lanes stay 0

    def put(name, mat):
        off, _ = layout[name]
        mat = np.asarray(mat, np.float32)
        slab[off:off + mat.shape[0], :mat.shape[1]] = mat

    def band(n_in, n_out, shift):
        s = np.zeros((n_in, n_out), np.float32)
        s[np.arange(n_out) + shift, np.arange(n_out)] = 1.0
        return s

    # Conv1 banded taps: (mat_size, ow1*16), zero lane-padded to 256.
    w1 = np.asarray(tp["w1"], np.float32)                # (16, 1, 8, 8) OIHW
    for kh in range(_K1):
        m = np.zeros((mat_size, oh1 * 16), np.float32)
        for kw in range(_K1):
            m += np.kron(band(mat_size, oh1, kw), w1[:, 0, kh, kw][None, :])
        put(f"c1_k{kh}", m)

    # Conv2 banded taps: (ow1*16, ow2*32), rows AND lanes zero-padded to 256.
    w2 = np.asarray(tp["w2"], np.float32)                # (32, 16, 4, 4) OIHW
    for kh in range(_K2):
        m = np.zeros((oh1 * 16, oh2 * 32), np.float32)
        for kw in range(_K2):
            m += np.kron(band(oh1, oh2, kw), w2[:, :, kh, kw].T)
        put(f"c2_k{kh}", m)

    # fc_cnn: PyTorch flattens NCHW (c, h, w); regroup rows as (ow2, c2), pad rows to 256.
    wfc = np.asarray(tp["wfc"], np.float32)              # (256, 32*oh2*oh2)
    wt = wfc.T.reshape(32, oh2, oh2, 256).transpose(1, 2, 0, 3).reshape(oh2, oh2 * 32, 256)
    for r in range(oh2):
        put(f"fc_r{r}", wt[r])

    wl1 = np.asarray(tp["wl1"], np.float32).T            # (pos_dim, 512)
    put("l1a", wl1[:, :256]); put("l1b", wl1[:, 256:])
    wl2 = np.asarray(tp["wl2"], np.float32).T            # (512, 256)
    put("l2a", wl2[:256]);    put("l2b", wl2[256:])
    wj = np.asarray(tp["wj"], np.float32)                # (256, 512)
    put("ja", wj[:, :256].T); put("jb", wj[:, 256:].T)

    head = np.zeros((_LANES, _LANES), np.float32)        # merged policy | value head
    head[:, :num_outputs] = np.asarray(tp["wp"], np.float32).T
    head[:, num_outputs] = np.asarray(tp["wv"], np.float32)[0]
    put("head", head)

    biases = np.zeros((8, _LANES), np.float32)
    biases[0, :oh1 * 16] = np.tile(np.asarray(tp["b1"], np.float32), oh1)
    biases[1, :oh2 * 32] = np.tile(np.asarray(tp["b2"], np.float32), oh2)
    biases[2] = np.asarray(tp["bfc"], np.float32)
    bl1 = np.asarray(tp["bl1"], np.float32)
    biases[3], biases[4] = bl1[:256], bl1[256:]
    biases[5] = np.asarray(tp["bl2"], np.float32)
    biases[6] = np.asarray(tp["bj"], np.float32)
    biases[7, :num_outputs] = np.asarray(tp["bp"], np.float32)
    biases[7, num_outputs] = np.asarray(tp["bv"], np.float32)[0]

    return {"w_slab": jnp.asarray(slab, jnp.bfloat16),   # one bf16 weight DMA
            "b_slab": jnp.asarray(biases, jnp.float32)}  # one f32 bias DMA


# ----------------------------------------------------------------------------
# Forward pass (mirrors CNNModel.forward / value_function)
# ----------------------------------------------------------------------------
def forward(params, input_positions, input_matrix, *, num_outputs):
    B, H, W = input_matrix.shape
    assert H == W, "square observation matrix expected"
    pos_dim = input_positions.shape[1]
    oh1 = H - _K1 + 1
    oh2 = oh1 - _K2 + 1
    bp = max(16, -(-B // 16) * 16)                       # bf16-tile aligned batch pad
    layout, total_rows = _slab_layout(H, pos_dim)
    assert params["w_slab"].shape == (total_rows, _LANES)

    bf16 = jnp.bfloat16
    # Tiny wrapper-side relayout: (B,H,W) -> rows=(h, b_pad), cols=w, bf16, zero-padded batch.
    x_pad = jnp.zeros((bp, H, W), bf16).at[:B].set(input_matrix.astype(bf16))
    x_lay = jnp.transpose(x_pad, (1, 0, 2)).reshape(H * bp, W)
    pos_pad = jnp.zeros((bp, pos_dim), bf16).at[:B].set(input_positions.astype(bf16))

    kernel = functools.partial(_fused_kernel, bp=bp, oh1=oh1, oh2=oh2, layout=layout)
    out = pl.pallas_call(
        kernel,
        out_shape=jax.ShapeDtypeStruct((bp, _LANES), jnp.float32),
        in_specs=[pl.BlockSpec(memory_space=pltpu.MemorySpace.VMEM)] * 4,
        out_specs=pl.BlockSpec(memory_space=pltpu.MemorySpace.VMEM),
        scratch_shapes=[
            pltpu.VMEM((oh1 * bp, _LANES), bf16),        # h1 (conv1 output)
            pltpu.VMEM((oh2 * bp, _LANES), bf16),        # h2 (conv2 output)
        ],
    )(x_lay, pos_pad, params["w_slab"], params["b_slab"])

    policy = out[:B, :num_outputs]
    value = out[:B, num_outputs]                         # == value_function().flatten()
    return policy, value


# ----------------------------------------------------------------------------
# Pure-JAX f32 reference of the PyTorch module (for correctness check only)
# ----------------------------------------------------------------------------
def reference_forward(tp, input_positions, input_matrix):
    x = input_matrix.astype(jnp.float32)[:, None]        # NCHW, C=1

    def conv2d(x, w, b):
        Bn, C, H, W = x.shape
        O, _, kh, kw = w.shape
        oh, ow = H - kh + 1, W - kw + 1
        cols = [x[:, :, i:i + oh, j:j + ow] for i in range(kh) for j in range(kw)]
        p = jnp.stack(cols, axis=2).reshape(Bn, C * kh * kw, oh, ow)
        wm = w.reshape(O, C * kh * kw)
        return jnp.einsum("ok,bkhw->bohw", wm, p) + b[None, :, None, None]

    h1 = jnp.tanh(conv2d(x, tp["w1"], tp["b1"]))
    h2 = jnp.tanh(conv2d(h1, tp["w2"], tp["b2"]))
    flat = h2.reshape(h2.shape[0], -1)                   # NCHW flatten
    cnn_out = jnp.tanh(flat @ tp["wfc"].T + tp["bfc"])
    l1 = jnp.tanh(input_positions @ tp["wl1"].T + tp["bl1"])
    lin_out = jnp.tanh(l1 @ tp["wl2"].T + tp["bl2"])
    joined = jnp.tanh(jnp.concatenate([cnn_out, lin_out], 1) @ tp["wj"].T + tp["bj"])
    policy = joined @ tp["wp"].T + tp["bp"]
    value = joined @ tp["wv"].T + tp["bv"]
    return policy, value.reshape(-1)


if __name__ == "__main__":
    B = 2
    POS_DIM = 16          # obs_space[0].shape[0]
    MAT_SIZE = 16         # obs_space[1].shape[0] (square observation matrix)
    NUM_OUTPUTS = 4

    key = jax.random.PRNGKey(0)
    kp, kx0, kx1 = jax.random.split(key, 3)
    torch_params = init_torch_params(kp, POS_DIM, MAT_SIZE, NUM_OUTPUTS)
    params = pack_params(torch_params, MAT_SIZE, POS_DIM, NUM_OUTPUTS)

    input_positions = jax.random.normal(kx0, (B, POS_DIM), jnp.float32)
    input_matrix = jax.random.normal(kx1, (B, MAT_SIZE, MAT_SIZE), jnp.float32)

    fwd = jax.jit(functools.partial(forward, num_outputs=NUM_OUTPUTS))
    policy_out, value_out = fwd(params, input_positions, input_matrix)
    jax.block_until_ready((policy_out, value_out))

    assert policy_out.shape == (B, NUM_OUTPUTS)
    assert value_out.shape == (B,)

    # Numerical check vs. a pure-JAX f32 reference of the PyTorch module
    # (kernel uses bf16 MXU operands / bf16 activations -> loose tolerance).
    ref_policy, ref_value = reference_forward(torch_params, input_positions, input_matrix)
    np.testing.assert_allclose(np.asarray(policy_out), np.asarray(ref_policy),
                               rtol=0.1, atol=0.05)
    np.testing.assert_allclose(np.asarray(value_out), np.asarray(ref_value),
                               rtol=0.1, atol=0.05)

    print("KERNEL_OK")
</pallas_src>

<mosaic_0001>
module attributes {stable_mosaic.version = 11 : i64} {
  func.func @_fused_kernel(%arg0: memref<256x16xbf16, #tpu.memory_space<vmem>>, %arg1: memref<16x16xbf16, #tpu.memory_space<vmem>>, %arg2: memref<4000x256xbf16, #tpu.memory_space<vmem>>, %arg3: memref<8x256xf32, #tpu.memory_space<vmem>>, %arg4: memref<16x256xf32, #tpu.memory_space<vmem>>, %arg5: memref<144x256xbf16, #tpu.memory_space<vmem>>, %arg6: memref<96x256xbf16, #tpu.memory_space<vmem>>) attributes {dimension_semantics = [], scalar_prefetch = 0 : i64, scratch_operands = 2 : i64, tpu.core_type = #tpu.core_type<tc>} {
    %c0 = arith.constant 0 : index
    %c0_0 = arith.constant 0 : index
    %0 = vector.load %arg0[%c0, %c0_0] : memref<256x16xbf16, #tpu.memory_space<vmem>>, vector<144x16xbf16>
    %c0_1 = arith.constant 0 : index
    %c0_2 = arith.constant 0 : index
    %1 = vector.load %arg2[%c0_1, %c0_2] : memref<4000x256xbf16, #tpu.memory_space<vmem>>, vector<16x256xbf16>
    %cst = arith.constant dense<0.000000e+00> : vector<144x256xf32>
    %2 = tpu.matmul %0, %1, %cst {dimension_numbers = #tpu.dot_dimension_numbers<[1], [0], [0], [1], [0, 0, 1, 1], [], []>} : vector<144x16xbf16>, vector<16x256xbf16>, vector<144x256xf32> -> vector<144x256xf32>
    %c0_3 = arith.constant 0 : index
    %c0_4 = arith.constant 0 : index
    %3 = vector.load %arg3[%c0_3, %c0_4] : memref<8x256xf32, #tpu.memory_space<vmem>>, vector<1x256xf32>
    %4 = vector.broadcast %3 : vector<1x256xf32> to vector<144x256xf32>
    %5 = arith.addf %2, %4 : vector<144x256xf32>
    %c16 = arith.constant 16 : index
    %c0_5 = arith.constant 0 : index
    %6 = vector.load %arg0[%c16, %c0_5] : memref<256x16xbf16, #tpu.memory_space<vmem>>, vector<144x16xbf16>
    %c16_6 = arith.constant 16 : index
    %c0_7 = arith.constant 0 : index
    %7 = vector.load %arg2[%c16_6, %c0_7] : memref<4000x256xbf16, #tpu.memory_space<vmem>>, vector<16x256xbf16>
    %cst_8 = arith.constant dense<0.000000e+00> : vector<144x256xf32>
    %8 = tpu.matmul %6, %7, %cst_8 {dimension_numbers = #tpu.dot_dimension_numbers<[1], [0], [0], [1], [0, 0, 1, 1], [], []>} : vector<144x16xbf16>, vector<16x256xbf16>, vector<144x256xf32> -> vector<144x256xf32>
    %9 = arith.addf %5, %8 : vector<144x256xf32>
    %c32 = arith.constant 32 : index
    %c0_9 = arith.constant 0 : index
    %10 = vector.load %arg0[%c32, %c0_9] : memref<256x16xbf16, #tpu.memory_space<vmem>>, vector<144x16xbf16>
    %c32_10 = arith.constant 32 : index
    %c0_11 = arith.constant 0 : index
    %11 = vector.load %arg2[%c32_10, %c0_11] : memref<4000x256xbf16, #tpu.memory_space<vmem>>, vector<16x256xbf16>
    %cst_12 = arith.constant dense<0.000000e+00> : vector<144x256xf32>
    %12 = tpu.matmul %10, %11, %cst_12 {dimension_numbers = #tpu.dot_dimension_numbers<[1], [0], [0], [1], [0, 0, 1, 1], [], []>} : vector<144x16xbf16>, vector<16x256xbf16>, vector<144x256xf32> -> vector<144x256xf32>
    %13 = arith.addf %9, %12 : vector<144x256xf32>
    %c48 = arith.constant 48 : index
    %c0_13 = arith.constant 0 : index
    %14 = vector.load %arg0[%c48, %c0_13] : memref<256x16xbf16, #tpu.memory_space<vmem>>, vector<144x16xbf16>
    %c48_14 = arith.constant 48 : index
    %c0_15 = arith.constant 0 : index
    %15 = vector.load %arg2[%c48_14, %c0_15] : memref<4000x256xbf16, #tpu.memory_space<vmem>>, vector<16x256xbf16>
    %cst_16 = arith.constant dense<0.000000e+00> : vector<144x256xf32>
    %16 = tpu.matmul %14, %15, %cst_16 {dimension_numbers = #tpu.dot_dimension_numbers<[1], [0], [0], [1], [0, 0, 1, 1], [], []>} : vector<144x16xbf16>, vector<16x256xbf16>, vector<144x256xf32> -> vector<144x256xf32>
    %17 = arith.addf %13, %16 : vector<144x256xf32>
    %c64 = arith.constant 64 : index
    %c0_17 = arith.constant 0 : index
    %18 = vector.load %arg0[%c64, %c0_17] : memref<256x16xbf16, #tpu.memory_space<vmem>>, vector<144x16xbf16>
    %c64_18 = arith.constant 64 : index
    %c0_19 = arith.constant 0 : index
    %19 = vector.load %arg2[%c64_18, %c0_19] : memref<4000x256xbf16, #tpu.memory_space<vmem>>, vector<16x256xbf16>
    %cst_20 = arith.constant dense<0.000000e+00> : vector<144x256xf32>
    %20 = tpu.matmul %18, %19, %cst_20 {dimension_numbers = #tpu.dot_dimension_numbers<[1], [0], [0], [1], [0, 0, 1, 1], [], []>} : vector<144x16xbf16>, vector<16x256xbf16>, vector<144x256xf32> -> vector<144x256xf32>
    %21 = arith.addf %17, %20 : vector<144x256xf32>
    %c80 = arith.constant 80 : index
    %c0_21 = arith.constant 0 : index
    %22 = vector.load %arg0[%c80, %c0_21] : memref<256x16xbf16, #tpu.memory_space<vmem>>, vector<144x16xbf16>
    %c80_22 = arith.constant 80 : index
    %c0_23 = arith.constant 0 : index
    %23 = vector.load %arg2[%c80_22, %c0_23] : memref<4000x256xbf16, #tpu.memory_space<vmem>>, vector<16x256xbf16>
    %cst_24 = arith.constant dense<0.000000e+00> : vector<144x256xf32>
    %24 = tpu.matmul %22, %23, %cst_24 {dimension_numbers = #tpu.dot_dimension_numbers<[1], [0], [0], [1], [0, 0, 1, 1], [], []>} : vector<144x16xbf16>, vector<16x256xbf16>, vector<144x256xf32> -> vector<144x256xf32>
    %25 = arith.addf %21, %24 : vector<144x256xf32>
    %c96 = arith.constant 96 : index
    %c0_25 = arith.constant 0 : index
    %26 = vector.load %arg0[%c96, %c0_25] : memref<256x16xbf16, #tpu.memory_space<vmem>>, vector<144x16xbf16>
    %c96_26 = arith.constant 96 : index
    %c0_27 = arith.constant 0 : index
    %27 = vector.load %arg2[%c96_26, %c0_27] : memref<4000x256xbf16, #tpu.memory_space<vmem>>, vector<16x256xbf16>
    %cst_28 = arith.constant dense<0.000000e+00> : vector<144x256xf32>
    %28 = tpu.matmul %26, %27, %cst_28 {dimension_numbers = #tpu.dot_dimension_numbers<[1], [0], [0], [1], [0, 0, 1, 1], [], []>} : vector<144x16xbf16>, vector<16x256xbf16>, vector<144x256xf32> -> vector<144x256xf32>
    %29 = arith.addf %25, %28 : vector<144x256xf32>
    %c112 = arith.constant 112 : index
    %c0_29 = arith.constant 0 : index
    %30 = vector.load %arg0[%c112, %c0_29] : memref<256x16xbf16, #tpu.memory_space<vmem>>, vector<144x16xbf16>
    %c112_30 = arith.constant 112 : index
    %c0_31 = arith.constant 0 : index
    %31 = vector.load %arg2[%c112_30, %c0_31] : memref<4000x256xbf16, #tpu.memory_space<vmem>>, vector<16x256xbf16>
    %cst_32 = arith.constant dense<0.000000e+00> : vector<144x256xf32>
    %32 = tpu.matmul %30, %31, %cst_32 {dimension_numbers = #tpu.dot_dimension_numbers<[1], [0], [0], [1], [0, 0, 1, 1], [], []>} : vector<144x16xbf16>, vector<16x256xbf16>, vector<144x256xf32> -> vector<144x256xf32>
    %33 = arith.addf %29, %32 : vector<144x256xf32>
    %34 = math.tanh %33 : vector<144x256xf32>
    %35 = arith.truncf %34 : vector<144x256xf32> to vector<144x256xbf16>
    %c0_33 = arith.constant 0 : index
    %c0_34 = arith.constant 0 : index
    %36 = vector.load %arg5[%c0_33, %c0_34] : memref<144x256xbf16, #tpu.memory_space<vmem>>, vector<144x256xbf16>
    tpu.vector_store %arg5[%c0_33, %c0_34], %35 {strides = array<i32>} : memref<144x256xbf16, #tpu.memory_space<vmem>>, vector<144x256xbf16>,
    %c0_35 = arith.constant 0 : index
    %c0_36 = arith.constant 0 : index
    %37 = vector.load %arg5[%c0_35, %c0_36] : memref<144x256xbf16, #tpu.memory_space<vmem>>, vector<96x256xbf16>
    %c128 = arith.constant 128 : index
    %c0_37 = arith.constant 0 : index
    %38 = vector.load %arg2[%c128, %c0_37] : memref<4000x256xbf16, #tpu.memory_space<vmem>>, vector<256x256xbf16>
    %cst_38 = arith.constant dense<0.000000e+00> : vector<96x256xf32>
    %39 = tpu.matmul %37, %38, %cst_38 {dimension_numbers = #tpu.dot_dimension_numbers<[1], [0], [0], [1], [0, 0, 1, 1], [], []>} : vector<96x256xbf16>, vector<256x256xbf16>, vector<96x256xf32> -> vector<96x256xf32>
    %c1 = arith.constant 1 : index
    %c0_39 = arith.constant 0 : index
    %40 = vector.load %arg3[%c1, %c0_39] : memref<8x256xf32, #tpu.memory_space<vmem>>, vector<1x256xf32>
    %41 = vector.broadcast %40 : vector<1x256xf32> to vector<96x256xf32>
    %42 = arith.addf %39, %41 : vector<96x256xf32>
    %c16_40 = arith.constant 16 : index
    %c0_41 = arith.constant 0 : index
    %43 = vector.load %arg5[%c16_40, %c0_41] : memref<144x256xbf16, #tpu.memory_space<vmem>>, vector<96x256xbf16>
    %c384 = arith.constant 384 : index
    %c0_42 = arith.constant 0 : index
    %44 = vector.load %arg2[%c384, %c0_42] : memref<4000x256xbf16, #tpu.memory_space<vmem>>, vector<256x256xbf16>
    %cst_43 = arith.constant dense<0.000000e+00> : vector<96x256xf32>
    %45 = tpu.matmul %43, %44, %cst_43 {dimension_numbers = #tpu.dot_dimension_numbers<[1], [0], [0], [1], [0, 0, 1, 1], [], []>} : vector<96x256xbf16>, vector<256x256xbf16>, vector<96x256xf32> -> vector<96x256xf32>
    %46 = arith.addf %42, %45 : vector<96x256xf32>
    %c32_44 = arith.constant 32 : index
    %c0_45 = arith.constant 0 : index
    %47 = vector.load %arg5[%c32_44, %c0_45] : memref<144x256xbf16, #tpu.memory_space<vmem>>, vector<96x256xbf16>
    %c640 = arith.constant 640 : index
    %c0_46 = arith.constant 0 : index
    %48 = vector.load %arg2[%c640, %c0_46] : memref<4000x256xbf16, #tpu.memory_space<vmem>>, vector<256x256xbf16>
    %cst_47 = arith.constant dense<0.000000e+00> : vector<96x256xf32>
    %49 = tpu.matmul %47, %48, %cst_47 {dimension_numbers = #tpu.dot_dimension_numbers<[1], [0], [0], [1], [0, 0, 1, 1], [], []>} : vector<96x256xbf16>, vector<256x256xbf16>, vector<96x256xf32> -> vector<96x256xf32>
    %50 = arith.addf %46, %49 : vector<96x256xf32>
    %c48_48 = arith.constant 48 : index
    %c0_49 = arith.constant 0 : index
    %51 = vector.load %arg5[%c48_48, %c0_49] : memref<144x256xbf16, #tpu.memory_space<vmem>>, vector<96x256xbf16>
    %c896 = arith.constant 896 : index
    %c0_50 = arith.constant 0 : index
    %52 = vector.load %arg2[%c896, %c0_50] : memref<4000x256xbf16, #tpu.memory_space<vmem>>, vector<256x256xbf16>
    %cst_51 = arith.constant dense<0.000000e+00> : vector<96x256xf32>
    %53 = tpu.matmul %51, %52, %cst_51 {dimension_numbers = #tpu.dot_dimension_numbers<[1], [0], [0], [1], [0, 0, 1, 1], [], []>} : vector<96x256xbf16>, vector<256x256xbf16>, vector<96x256xf32> -> vector<96x256xf32>
    %54 = arith.addf %50, %53 : vector<96x256xf32>
    %55 = math.tanh %54 : vector<96x256xf32>
    %56 = arith.truncf %55 : vector<96x256xf32> to vector<96x256xbf16>
    %c0_52 = arith.constant 0 : index
    %c0_53 = arith.constant 0 : index
    %57 = vector.load %arg6[%c0_52, %c0_53] : memref<96x256xbf16, #tpu.memory_space<vmem>>, vector<96x256xbf16>
    tpu.vector_store %arg6[%c0_52, %c0_53], %56 {strides = array<i32>} : memref<96x256xbf16, #tpu.memory_space<vmem>>, vector<96x256xbf16>,
    %c0_54 = arith.constant 0 : index
    %c0_55 = arith.constant 0 : index
    %58 = vector.load %arg6[%c0_54, %c0_55] : memref<96x256xbf16, #tpu.memory_space<vmem>>, vector<16x256xbf16>
    %c1152 = arith.constant 1152 : index
    %c0_56 = arith.constant 0 : index
    %59 = vector.load %arg2[%c1152, %c0_56] : memref<4000x256xbf16, #tpu.memory_space<vmem>>, vector<256x256xbf16>
    %cst_57 = arith.constant dense<0.000000e+00> : vector<16x256xf32>
    %60 = tpu.matmul %58, %59, %cst_57 {dimension_numbers = #tpu.dot_dimension_numbers<[1], [0], [0], [1], [0, 0, 1, 1], [], []>} : vector<16x256xbf16>, vector<256x256xbf16>, vector<16x256xf32> -> vector<16x256xf32>
    %c2 = arith.constant 2 : index
    %c0_58 = arith.constant 0 : index
    %61 = vector.load %arg3[%c2, %c0_58] : memref<8x256xf32, #tpu.memory_space<vmem>>, vector<1x256xf32>
    %62 = vector.broadcast %61 : vector<1x256xf32> to vector<16x256xf32>
    %63 = arith.addf %60, %62 : vector<16x256xf32>
    %c16_59 = arith.constant 16 : index
    %c0_60 = arith.constant 0 : index
    %64 = vector.load %arg6[%c16_59, %c0_60] : memref<96x256xbf16, #tpu.memory_space<vmem>>, vector<16x256xbf16>
    %c1408 = arith.constant 1408 : index
    %c0_61 = arith.constant 0 : index
    %65 = vector.load %arg2[%c1408, %c0_61] : memref<4000x256xbf16, #tpu.memory_space<vmem>>, vector<256x256xbf16>
    %cst_62 = arith.constant dense<0.000000e+00> : vector<16x256xf32>
    %66 = tpu.matmul %64, %65, %cst_62 {dimension_numbers = #tpu.dot_dimension_numbers<[1], [0], [0], [1], [0, 0, 1, 1], [], []>} : vector<16x256xbf16>, vector<256x256xbf16>, vector<16x256xf32> -> vector<16x256xf32>
    %67 = arith.addf %63, %66 : vector<16x256xf32>
    %c32_63 = arith.constant 32 : index
    %c0_64 = arith.constant 0 : index
    %68 = vector.load %arg6[%c32_63, %c0_64] : memref<96x256xbf16, #tpu.memory_space<vmem>>, vector<16x256xbf16>
    %c1664 = arith.constant 1664 : index
    %c0_65 = arith.constant 0 : index
    %69 = vector.load %arg2[%c1664, %c0_65] : memref<4000x256xbf16, #tpu.memory_space<vmem>>, vector<256x256xbf16>
    %cst_66 = arith.constant dense<0.000000e+00> : vector<16x256xf32>
    %70 = tpu.matmul %68, %69, %cst_66 {dimension_numbers = #tpu.dot_dimension_numbers<[1], [0], [0], [1], [0, 0, 1, 1], [], []>} : vector<16x256xbf16>, vector<256x256xbf16>, vector<16x256xf32> -> vector<16x256xf32>
    %71 = arith.addf %67, %70 : vector<16x256xf32>
    %c48_67 = arith.constant 48 : index
    %c0_68 = arith.constant 0 : index
    %72 = vector.load %arg6[%c48_67, %c0_68] : memref<96x256xbf16, #tpu.memory_space<vmem>>, vector<16x256xbf16>
    %c1920 = arith.constant 1920 : index
    %c0_69 = arith.constant 0 : index
    %73 = vector.load %arg2[%c1920, %c0_69] : memref<4000x256xbf16, #tpu.memory_space<vmem>>, vector<256x256xbf16>
    %cst_70 = arith.constant dense<0.000000e+00> : vector<16x256xf32>
    %74 = tpu.matmul %72, %73, %cst_70 {dimension_numbers = #tpu.dot_dimension_numbers<[1], [0], [0], [1], [0, 0, 1, 1], [], []>} : vector<16x256xbf16>, vector<256x256xbf16>, vector<16x256xf32> -> vector<16x256xf32>
    %75 = arith.addf %71, %74 : vector<16x256xf32>
    %c64_71 = arith.constant 64 : index
    %c0_72 = arith.constant 0 : index
    %76 = vector.load %arg6[%c64_71, %c0_72] : memref<96x256xbf16, #tpu.memory_space<vmem>>, vector<16x256xbf16>
    %c2176 = arith.constant 2176 : index
    %c0_73 = arith.constant 0 : index
    %77 = vector.load %arg2[%c2176, %c0_73] : memref<4000x256xbf16, #tpu.memory_space<vmem>>, vector<256x256xbf16>
    %cst_74 = arith.constant dense<0.000000e+00> : vector<16x256xf32>
    %78 = tpu.matmul %76, %77, %cst_74 {dimension_numbers = #tpu.dot_dimension_numbers<[1], [0], [0], [1], [0, 0, 1, 1], [], []>} : vector<16x256xbf16>, vector<256x256xbf16>, vector<16x256xf32> -> vector<16x256xf32>
    %79 = arith.addf %75, %78 : vector<16x256xf32>
    %c80_75 = arith.constant 80 : index
    %c0_76 = arith.constant 0 : index
    %80 = vector.load %arg6[%c80_75, %c0_76] : memref<96x256xbf16, #tpu.memory_space<vmem>>, vector<16x256xbf16>
    %c2432 = arith.constant 2432 : index
    %c0_77 = arith.constant 0 : index
    %81 = vector.load %arg2[%c2432, %c0_77] : memref<4000x256xbf16, #tpu.memory_space<vmem>>, vector<256x256xbf16>
    %cst_78 = arith.constant dense<0.000000e+00> : vector<16x256xf32>
    %82 = tpu.matmul %80, %81, %cst_78 {dimension_numbers = #tpu.dot_dimension_numbers<[1], [0], [0], [1], [0, 0, 1, 1], [], []>} : vector<16x256xbf16>, vector<256x256xbf16>, vector<16x256xf32> -> vector<16x256xf32>
    %83 = arith.addf %79, %82 : vector<16x256xf32>
    %84 = math.tanh %83 : vector<16x256xf32>
    %85 = arith.truncf %84 : vector<16x256xf32> to vector<16x256xbf16>
    %c0_79 = arith.constant 0 : index
    %c0_80 = arith.constant 0 : index
    %86 = vector.load %arg1[%c0_79, %c0_80] : memref<16x16xbf16, #tpu.memory_space<vmem>>, vector<16x16xbf16>
    %c2688 = arith.constant 2688 : index
    %c0_81 = arith.constant 0 : index
    %87 = vector.load %arg2[%c2688, %c0_81] : memref<4000x256xbf16, #tpu.memory_space<vmem>>, vector<16x256xbf16>
    %cst_82 = arith.constant dense<0.000000e+00> : vector<16x256xf32>
    %88 = tpu.matmul %86, %87, %cst_82 {dimension_numbers = #tpu.dot_dimension_numbers<[1], [0], [0], [1], [0, 0, 1, 1], [], []>} : vector<16x16xbf16>, vector<16x256xbf16>, vector<16x256xf32> -> vector<16x256xf32>
    %c3 = arith.constant 3 : index
    %c0_83 = arith.constant 0 : index
    %89 = vector.load %arg3[%c3, %c0_83] : memref<8x256xf32, #tpu.memory_space<vmem>>, vector<1x256xf32>
    %90 = vector.broadcast %89 : vector<1x256xf32> to vector<16x256xf32>
    %91 = arith.addf %88, %90 : vector<16x256xf32>
    %92 = math.tanh %91 : vector<16x256xf32>
    %93 = arith.truncf %92 : vector<16x256xf32> to vector<16x256xbf16>
    %c0_84 = arith.constant 0 : index
    %c0_85 = arith.constant 0 : index
    %94 = vector.load %arg1[%c0_84, %c0_85] : memref<16x16xbf16, #tpu.memory_space<vmem>>, vector<16x16xbf16>
    %c2704 = arith.constant 2704 : index
    %c0_86 = arith.constant 0 : index
    %95 = vector.load %arg2[%c2704, %c0_86] : memref<4000x256xbf16, #tpu.memory_space<vmem>>, vector<16x256xbf16>
    %cst_87 = arith.constant dense<0.000000e+00> : vector<16x256xf32>
    %96 = tpu.matmul %94, %95, %cst_87 {dimension_numbers = #tpu.dot_dimension_numbers<[1], [0], [0], [1], [0, 0, 1, 1], [], []>} : vector<16x16xbf16>, vector<16x256xbf16>, vector<16x256xf32> -> vector<16x256xf32>
    %c4 = arith.constant 4 : index
    %c0_88 = arith.constant 0 : index
    %97 = vector.load %arg3[%c4, %c0_88] : memref<8x256xf32, #tpu.memory_space<vmem>>, vector<1x256xf32>
    %98 = vector.broadcast %97 : vector<1x256xf32> to vector<16x256xf32>
    %99 = arith.addf %96, %98 : vector<16x256xf32>
    %100 = math.tanh %99 : vector<16x256xf32>
    %101 = arith.truncf %100 : vector<16x256xf32> to vector<16x256xbf16>
    %c2720 = arith.constant 2720 : index
    %c0_89 = arith.constant 0 : index
    %102 = vector.load %arg2[%c2720, %c0_89] : memref<4000x256xbf16, #tpu.memory_space<vmem>>, vector<256x256xbf16>
    %cst_90 = arith.constant dense<0.000000e+00> : vector<16x256xf32>
    %103 = tpu.matmul %93, %102, %cst_90 {dimension_numbers = #tpu.dot_dimension_numbers<[1], [0], [0], [1], [0, 0, 1, 1], [], []>} : vector<16x256xbf16>, vector<256x256xbf16>, vector<16x256xf32> -> vector<16x256xf32>
    %c2976 = arith.constant 2976 : index
    %c0_91 = arith.constant 0 : index
    %104 = vector.load %arg2[%c2976, %c0_91] : memref<4000x256xbf16, #tpu.memory_space<vmem>>, vector<256x256xbf16>
    %cst_92 = arith.constant dense<0.000000e+00> : vector<16x256xf32>
    %105 = tpu.matmul %101, %104, %cst_92 {dimension_numbers = #tpu.dot_dimension_numbers<[1], [0], [0], [1], [0, 0, 1, 1], [], []>} : vector<16x256xbf16>, vector<256x256xbf16>, vector<16x256xf32> -> vector<16x256xf32>
    %106 = arith.addf %103, %105 : vector<16x256xf32>
    %c5 = arith.constant 5 : index
    %c0_93 = arith.constant 0 : index
    %107 = vector.load %arg3[%c5, %c0_93] : memref<8x256xf32, #tpu.memory_space<vmem>>, vector<1x256xf32>
    %108 = vector.broadcast %107 : vector<1x256xf32> to vector<16x256xf32>
    %109 = arith.addf %106, %108 : vector<16x256xf32>
    %110 = math.tanh %109 : vector<16x256xf32>
    %111 = arith.truncf %110 : vector<16x256xf32> to vector<16x256xbf16>
    %c3232 = arith.constant 3232 : index
    %c0_94 = arith.constant 0 : index
    %112 = vector.load %arg2[%c3232, %c0_94] : memref<4000x256xbf16, #tpu.memory_space<vmem>>, vector<256x256xbf16>
    %cst_95 = arith.constant dense<0.000000e+00> : vector<16x256xf32>
    %113 = tpu.matmul %85, %112, %cst_95 {dimension_numbers = #tpu.dot_dimension_numbers<[1], [0], [0], [1], [0, 0, 1, 1], [], []>} : vector<16x256xbf16>, vector<256x256xbf16>, vector<16x256xf32> -> vector<16x256xf32>
    %c3488 = arith.constant 3488 : index
    %c0_96 = arith.constant 0 : index
    %114 = vector.load %arg2[%c3488, %c0_96] : memref<4000x256xbf16, #tpu.memory_space<vmem>>, vector<256x256xbf16>
    %cst_97 = arith.constant dense<0.000000e+00> : vector<16x256xf32>
    %115 = tpu.matmul %111, %114, %cst_97 {dimension_numbers = #tpu.dot_dimension_numbers<[1], [0], [0], [1], [0, 0, 1, 1], [], []>} : vector<16x256xbf16>, vector<256x256xbf16>, vector<16x256xf32> -> vector<16x256xf32>
    %116 = arith.addf %113, %115 : vector<16x256xf32>
    %c6 = arith.constant 6 : index
    %c0_98 = arith.constant 0 : index
    %117 = vector.load %arg3[%c6, %c0_98] : memref<8x256xf32, #tpu.memory_space<vmem>>, vector<1x256xf32>
    %118 = vector.broadcast %117 : vector<1x256xf32> to vector<16x256xf32>
    %119 = arith.addf %116, %118 : vector<16x256xf32>
    %120 = math.tanh %119 : vector<16x256xf32>
    %121 = arith.truncf %120 : vector<16x256xf32> to vector<16x256xbf16>
    %c3744 = arith.constant 3744 : index
    %c0_99 = arith.constant 0 : index
    %122 = vector.load %arg2[%c3744, %c0_99] : memref<4000x256xbf16, #tpu.memory_space<vmem>>, vector<256x256xbf16>
    %cst_100 = arith.constant dense<0.000000e+00> : vector<16x256xf32>
    %123 = tpu.matmul %121, %122, %cst_100 {dimension_numbers = #tpu.dot_dimension_numbers<[1], [0], [0], [1], [0, 0, 1, 1], [], []>} : vector<16x256xbf16>, vector<256x256xbf16>, vector<16x256xf32> -> vector<16x256xf32>
    %c7 = arith.constant 7 : index
    %c0_101 = arith.constant 0 : index
    %124 = vector.load %arg3[%c7, %c0_101] : memref<8x256xf32, #tpu.memory_space<vmem>>, vector<1x256xf32>
    %125 = vector.broadcast %124 : vector<1x256xf32> to vector<16x256xf32>
    %126 = arith.addf %123, %125 : vector<16x256xf32>
    %c0_102 = arith.constant 0 : index
    %c0_103 = arith.constant 0 : index
    %127 = vector.load %arg4[%c0_102, %c0_103] : memref<16x256xf32, #tpu.memory_space<vmem>>, vector<16x256xf32>
    tpu.vector_store %arg4[%c0_102, %c0_103], %126 {strides = array<i32>} : memref<16x256xf32, #tpu.memory_space<vmem>>, vector<16x256xf32>,
    return
  }
}

</mosaic_0001>

<bundles_post_ra>
// kernel: forward.1
= control target key start
LH: loop header
LB: loop body
LE: loop exit
PB: predicated region body
PF: predicated region fallthrough
CT: control target
= control target key end

     0   :  { %9 = vsyncpa [#allocation5], 0  ;;  %s9264_s0 = inlined_call_operand.vmem [shape: bf16[256,16], index: 0, kind: input, shape index: {}]   ;;  %s9265_s1 = inlined_call_operand.vmem [shape: bf16[16,16], index: 1, kind: input, shape index: {}]   ;;  %s9266_s2 = inlined_call_operand.hbm [shape: bf16[4000,256], index: 2, kind: input, shape index: {}]   ;;  %s9267_s3 = inlined_call_operand.hbm [shape: f32[8,256], index: 3, kind: input, shape index: {}]   ;;  %s9268_s4 = inlined_call_operand.vmem [shape: f32[16,256], index: 4, kind: output, shape index: {}]  }
   0x1   :  { %10 = vsyncpa [#allocation7], 0  ;;  %s8466_s15 = smov [#allocation4]   ;;  %s8418_s19 = scalar_lea.hbm %s9266_s2, 64000 }
   0x2   :  { %s20_s16 = sshll.u32 %s8466_s15, 4  ;;  %p8419_p0 = scmp.ne.s32.totalorder %s9266_s2, %s8418_s19  ;;  %s21_s16 = int_to_ptr.vmem [resolvable:$true] %s20_s16 }
   0x3   :  { %p8422_p1 = scmp.lt.u32.totalorder %s8418_s19, %s9266_s2 }
   0x5   :  { %p8424_p2 = pnand %p8422_p1, %p8419_p0 }
   0x7   :  { %8427 = shalt.err (!%p8424_p2)
}
   0x8   :  { %s8428_s24 = scalar_lea.vmem %s21_s16, 64000  ;;  %p8433_p4 = scmp.lt.s32.totalorder %s21_s16, %s21_s16 }
   0x9   :  { %p8429_p3 = scmp.ne.s32.totalorder %s21_s16, %s8428_s24  ;;  %p8434_p5 = scmp.lt.s32.totalorder %s8428_s24, %s8428_s24 }
   0xb   :  { %p8435_p6 = por %p8434_p5, %p8433_p4 }
   0xd   :  { %p8436_p7 = pnand %p8435_p6, %p8429_p3 }
   0xf   :  { %8439 = shalt.err (!%p8436_p7)
}
  0x10   :  { %s8467_s25 = smov 128   ;;  %s8468_s26 = smov 8  }
  0x11   :  { %26 = dma.hbm_to_vmem [thread:$0]  %s9266_s2, 64000, %s21_s16, [#allocation5], %s8467_s25, %s8467_s25, %s8468_s26  }
  0x12   :  { %s8469_s29 = smov [#allocation6]   ;;  %s8440_s7 = scalar_lea.hbm %s9267_s3, 256 }
  0x13   :  { %s33_s30 = sshll.u32 %s8469_s29, 4  ;;  %p8441_p8 = scmp.ne.s32.totalorder %s9267_s3, %s8440_s7  ;;  %s34_s30 = int_to_ptr.vmem [resolvable:$true] %s33_s30 }
  0x14   :  { %p8444_p9 = scmp.lt.u32.totalorder %s8440_s7, %s9267_s3 }
  0x16   :  { %p8446_p10 = pnand %p8444_p9, %p8441_p8 }
  0x18   :  { %8449 = shalt.err (!%p8446_p10)
}
  0x19   :  { %s8450_s12 = scalar_lea.vmem %s34_s30, 256  ;;  %p8455_p12 = scmp.lt.s32.totalorder %s34_s30, %s34_s30 }
  0x1a   :  { %p8451_p11 = scmp.ne.s32.totalorder %s34_s30, %s8450_s12  ;;  %p8456_p13 = scmp.lt.s32.totalorder %s8450_s12, %s8450_s12 }
  0x1c   :  { %p8457_p0 = por %p8456_p13, %p8455_p12 }
  0x1e   :  { %p8458_p1 = pnand %p8457_p0, %p8451_p11 }
  0x20   :  { %8461 = shalt.err (!%p8458_p1)
}
  0x21   :  { %36 = dma.hbm_to_vmem [thread:$0]  %s9267_s3, 256, %s34_s30, [#allocation7]  }
  0x22   :  { %8462 = dma.done.wait [#allocation5], 64000  }
  0x23   :  { %8463 = vsyncadd [#allocation5], 4294903296 }
  0x24   :  { %8464 = dma.done.wait [#allocation7], 256  }
  0x25   :  { %8465 = vsyncadd [#allocation7], 4294967040  ;;  %v8470_v0 = vmov 0   ;;  %v7435_v1 = vld [vmem:[#allocation4 + $0x4] ss:$8 sps:$4 sm:$0xff]   ;;  %vm131_vm0 = vcmask 130048  }
  0x26   :  { %191 = vmatprep.mubr.bf16.mxu0 %v8470_v0  ;;  %201 = vmatprep.mubr.bf16.mxu1 %v8470_v0  ;;  %v7437_v2 = vld [vmem:[#allocation4] ss:$8 sps:$4 sm:$0xff]   ;;  %v7439_v4 = vld [vmem:[#allocation4 + $0x10] ss:$8 sps:$4 sm:$0xff]   ;;  %v7441_v5 = vld [vmem:[#allocation4 + $0x14] ss:$8 sps:$4 sm:$0xff]  }
  0x27   :  { %159 = vmatprep.subr.bf16.mxu0 %v7435_v1  ;;  %v7438_v3 = vld [vmem:[%s9264_s0] sm:$0xff]   ;;  %7012 = vmatprep.subr.bf16.mxu1 %v7435_v1  ;;  %v7442_v7 = vld [vmem:[%s9264_s0 + $0x8] sm:$0xff]   ;;  %v7457_v9 = vld [vmem:[#allocation4 + $0x34] ss:$8 sps:$4 sm:$0xff]  }
  0x28   :  { %160 = vmatpush1.bf16.msra.mxu0 %v7437_v2  ;;  %7013 = vmatpush1.bf16.msra.mxu1 %v7437_v2  ;;  %v7445_v6 = vld [vmem:[#allocation4 + $0x24] ss:$8 sps:$4 sm:$0xff]   ;;  %v7443_v8 = vld [vmem:[#allocation4 + $0x20] ss:$8 sps:$4 sm:$0xff]   ;;  %v7446_v10 = vld [vmem:[%s9264_s0 + $0x10] sm:$0xff]  }
  0x29   :  { %384 = vmatprep.subr.bf16.mxu0 %v7441_v5  ;;  %v7447_v11 = vld [vmem:[%s9264_s0 + $0x18] sm:$0xff]   ;;  %v7448_v12 = vld [vmem:[%s9264_s0 + $0x20] sm:$0xff]   ;;  %v7449_v13 = vld [vmem:[%s9264_s0 + $0x28] sm:$0xff]  }
  0x2a   :  { %v7450_v14 = vld [vmem:[%s9264_s0 + $0x30] sm:$0xff]   ;;  %v7451_v15 = vld [vmem:[%s9264_s0 + $0x38] sm:$0xff]   ;;  %v7452_v16 = vld [vmem:[%s9264_s0 + $0x40] sm:$0xff]  }
  0x2b   :  { %6376 = vmatmul.mubr.msk.bf16.vlgmr.msra.gmra.mrb[0].mxu0 %vm131_vm0, %v7438_v3  ;;  %v7453_v17 = vld [vmem:[%s9264_s0 + $0x48] sm:$0xff]   ;;  %v7454_v18 = vld [vmem:[%s9264_s0 + $0x10] sm:$0xff]   ;;  %v7458_v21 = vld [vmem:[%s9264_s0 + $0x18] sm:$0xff]  }
  0x2c   :  { %385 = vmatpush1.bf16.msra.mxu0 %v7439_v4  ;;  %416 = vmatprep.mubr.bf16.mxu0 %v8470_v0  ;;  %v7455_v19 = vld [vmem:[#allocation4 + $0x30] ss:$8 sps:$4 sm:$0xff]   ;;  %v7469_v20 = vld [vmem:[#allocation4 + $0x44] ss:$8 sps:$4 sm:$0xff]   ;;  %v7467_v30 = vld [vmem:[#allocation4 + $0x40] ss:$8 sps:$4 sm:$0xff]  }
  0x2d   :  { %645 = vmatprep.subr.bf16.mxu0 %v7445_v6  ;;  %v7459_v22 = vld [vmem:[%s9264_s0 + $0x20] sm:$0xff]   ;;  %v7460_v23 = vld [vmem:[%s9264_s0 + $0x28] sm:$0xff]   ;;  %v7461_v24 = vld [vmem:[%s9264_s0 + $0x30] sm:$0xff]  }
  0x2e   :  { %v7462_v25 = vld [vmem:[%s9264_s0 + $0x38] sm:$0xff]   ;;  %v7463_v26 = vld [vmem:[%s9264_s0 + $0x40] sm:$0xff]   ;;  %v7464_v27 = vld [vmem:[%s9264_s0 + $0x48] sm:$0xff]  }
  0x2f   :  { %v7465_v28 = vld [vmem:[%s9264_s0 + $0x50] sm:$0xff]   ;;  %v7466_v29 = vld [vmem:[%s9264_s0 + $0x18] sm:$0xff]   ;;  %v7470_v32 = vld [vmem:[%s9264_s0 + $0x20] sm:$0xff]  }
  0x30   :  { %v7481_v31 = vld [vmem:[#allocation4 + $0x54] ss:$8 sps:$4 sm:$0xff]   ;;  %v7471_v33 = vld [vmem:[%s9264_s0 + $0x28] sm:$0xff]   ;;  %v7474_v36 = vld [vmem:[%s9264_s0 + $0x40] sm:$0xff]  }
  0x31   :  { %v7472_v34 = vld [vmem:[%s9264_s0 + $0x30] sm:$0xff]   ;;  %v7473_v35 = vld [vmem:[%s9264_s0 + $0x38] sm:$0xff]   ;;  %v7475_v37 = vld [vmem:[%s9264_s0 + $0x48] sm:$0xff]  }
  0x32   :  { %v7476_v38 = vld [vmem:[%s9264_s0 + $0x50] sm:$0xff]   ;;  %v7477_v39 = vld [vmem:[%s9264_s0 + $0x58] sm:$0xff]   ;;  %v7478_v40 = vld [vmem:[%s9264_s0 + $0x20] sm:$0xff]  }
  0x33   :  { %v7479_v41 = vld [vmem:[#allocation4 + $0x50] ss:$8 sps:$4 sm:$0xff]   ;;  %v7493_v42 = vld [vmem:[#allocation4 + $0x64] ss:$8 sps:$4 sm:$0xff]   ;;  %v7491_v52 = vld [vmem:[#allocation4 + $0x60] ss:$8 sps:$4 sm:$0xff]  }
  0x34   :  { %v7482_v43 = vld [vmem:[%s9264_s0 + $0x28] sm:$0xff]   ;;  %v7483_v44 = vld [vmem:[%s9264_s0 + $0x30] sm:$0xff]   ;;  %v7484_v45 = vld [vmem:[%s9264_s0 + $0x38] sm:$0xff]  }
  0x35   :  { %v7485_v46 = vld [vmem:[%s9264_s0 + $0x40] sm:$0xff]   ;;  %v7486_v47 = vld [vmem:[%s9264_s0 + $0x48] sm:$0xff]   ;;  %v7487_v48 = vld [vmem:[%s9264_s0 + $0x50] sm:$0xff]  }
  0x36   :  { %v7488_v49 = vld [vmem:[%s9264_s0 + $0x58] sm:$0xff]   ;;  %v7489_v50 = vld [vmem:[%s9264_s0 + $0x60] sm:$0xff]   ;;  %v7490_v51 = vld [vmem:[%s9264_s0 + $0x28] sm:$0xff]  }
  0x37   :  { %6396 = vmatmul.mubr.msk.bf16.vlgmr.msra.gmra.mrb[0].mxu0 %vm131_vm0, %v7442_v7  ;;  %v7505_v53 = vld [vmem:[#allocation4 + $0x74] ss:$8 sps:$4 sm:$0xff]   ;;  %v7515_v56 = vld [vmem:[%s9264_s0 + $0x8] sm:$0xff]   ;;  %v7496_v57 = vld [vmem:[%s9264_s0 + $0x40] sm:$0xff]  }
  0x38   :  { %646 = vmatpush1.bf16.msra.mxu0 %v7443_v8  ;;  %426 = vmatprep.mubr.bf16.mxu0 %v8470_v0  ;;  %v7494_v54 = vld [vmem:[%s9264_s0 + $0x30] sm:$0xff]   ;;  %v7495_v55 = vld [vmem:[%s9264_s0 + $0x38] sm:$0xff]   ;;  %v7497_v59 = vld [vmem:[%s9264_s0 + $0x48] sm:$0xff]  }
  0x39   :  { %906 = vmatprep.subr.bf16.mxu0 %v7457_v9  ;;  %6377 = vmatmul.mubr.msk.bf16.vlgmr.msra.gmra.mrb[0].mxu1 %vm131_vm0, %v7515_v56  ;;  %v7517_v58 = vld [vmem:[%s9264_s0 + $0x10] sm:$0xff]   ;;  %v7519_v60 = vld [vmem:[%s9264_s0 + $0x18] sm:$0xff]   ;;  %v7521_v62 = vld [vmem:[%s9264_s0 + $0x20] sm:$0xff]  }
  0x3a   :  { %211 = vmatprep.mubr.bf16.mxu1 %v8470_v0  ;;  %v7498_v61 = vld [vmem:[%s9264_s0 + $0x50] sm:$0xff]   ;;  %v7499_v63 = vld [vmem:[%s9264_s0 + $0x58] sm:$0xff]   ;;  %v7523_v1 = vld [vmem:[%s9264_s0 + $0x28] sm:$0xff]  }
  0x3b   :  { %v7500_v2 = vld [vmem:[%s9264_s0 + $0x60] sm:$0xff]   ;;  %v7525_v3 = vld [vmem:[%s9264_s0 + $0x30] sm:$0xff]   ;;  %v7501_v4 = vld [vmem:[%s9264_s0 + $0x68] sm:$0xff]  }
  0x3c   :  { %v7527_v5 = vld [vmem:[%s9264_s0 + $0x38] sm:$0xff]   ;;  %v7502_v6 = vld [vmem:[%s9264_s0 + $0x30] sm:$0xff]   ;;  %v7529_v8 = vld [vmem:[%s9264_s0 + $0x40] sm:$0xff]  }
  0x3d   :  { %v7503_v7 = vld [vmem:[#allocation4 + $0x70] ss:$8 sps:$4 sm:$0xff]  }
  0x3e   :  { %v7506_v9 = vld [vmem:[%s9264_s0 + $0x38] sm:$0xff]  }
  0x3f   :  { %6397 = vmatmul.mubr.msk.bf16.gmra.mrb[4].mxu0 %vm131_vm0, %v7446_v10  ;;  %v7531_v10 = vld [vmem:[#allocation4 + $0x80] ss:$8 sps:$4 sm:$0xff]  }
  0x40   :  { %436 = vmatprep.mubr.bf16.mxu0 %v8470_v0 }
  0x41   :  { %6378 = vmatmul.mubr.msk.bf16.gmra.mrb[4].mxu1 %vm131_vm0, %v7517_v58  ;;  %v7575_v58 = vld [vmem:[#allocation4 + $0x164] ss:$8 sps:$4 sm:$0xff]  }
  0x42   :  { %221 = vmatprep.mubr.bf16.mxu1 %v8470_v0 }
  0x47   :  { %6398 = vmatmul.mubr.msk.bf16.gmra.mrb[8].mxu0 %vm131_vm0, %v7447_v11  ;;  %v7533_v11 = vld [vmem:[#allocation4 + $0x84] ss:$8 sps:$4 sm:$0xff]  }
  0x48   :  { %446 = vmatprep.mubr.bf16.mxu0 %v8470_v0  ;;  %2398 = vmatprep.subr.bf16.mxu1 %v7533_v11 }
  0x49   :  { %6379 = vmatmul.mubr.msk.bf16.gmra.mrb[8].mxu1 %vm131_vm0, %v7519_v60  ;;  %v7578_v60 = vld [vmem:[#allocation4 + $0x174] ss:$8 sps:$4 sm:$0xff]  }
  0x4a   :  { %231 = vmatprep.mubr.bf16.mxu1 %v8470_v0  ;;  %2399 = vmatpush1.bf16.msra.mxu1 %v7531_v10 }
  0x4f   :  { %6399 = vmatmul.mubr.msk.bf16.gmra.mrb[12].mxu0 %vm131_vm0, %v7448_v12  ;;  %v7536_v12 = vld [vmem:[#allocation4 + $0x94] ss:$8 sps:$4 sm:$0xff]  }
  0x50   :  { %456 = vmatprep.mubr.bf16.mxu0 %v8470_v0  ;;  %2400 = vmatprep.subr.bf16.mxu1 %v7536_v12 }
  0x51   :  { %6380 = vmatmul.mubr.msk.bf16.gmra.mrb[12].mxu1 %vm131_vm0, %v7521_v62  ;;  %v7576_v62 = vld [vmem:[#allocation4 + $0x170] ss:$8 sps:$4 sm:$0xff]  }
  0x52   :  { %241 = vmatprep.mubr.bf16.mxu1 %v8470_v0 }
  0x57   :  { %6400 = vmatmul.mubr.msk.bf16.gmra.mrb[16].mxu0 %vm131_vm0, %v7449_v13  ;;  %v7534_v13 = vld [vmem:[#allocation4 + $0x90] ss:$8 sps:$4 sm:$0xff]  }
  0x58   :  { %466 = vmatprep.mubr.bf16.mxu0 %v8470_v0  ;;  %2401 = vmatpush1.bf16.msra.mxu1 %v7534_v13 }
  0x59   :  { %6381 = vmatmul.mubr.msk.bf16.gmra.mrb[16].mxu1 %vm131_vm0, %v7523_v1 }
  0x5a   :  { %251 = vmatprep.mubr.bf16.mxu1 %v8470_v0 }
  0x5f   :  { %6401 = vmatmul.mubr.msk.bf16.gmra.mrb[20].mxu0 %vm131_vm0, %v7450_v14  ;;  %v7507_v14 = vld [vmem:[%s9264_s0 + $0x40] sm:$0xff]  }
  0x60   :  { %476 = vmatprep.mubr.bf16.mxu0 %v8470_v0 }
  0x61   :  { %6382 = vmatmul.mubr.msk.bf16.gmra.mrb[20].mxu1 %vm131_vm0, %v7525_v3  ;;  %v7581_v3 = vld [vmem:[#allocation4 + $0x184] ss:$8 sps:$4 sm:$0xff]  }
  0x62   :  { %261 = vmatprep.mubr.bf16.mxu1 %v8470_v0 }
  0x67   :  { %6402 = vmatmul.mubr.msk.bf16.gmra.mrb[24].mxu0 %vm131_vm0, %v7451_v15  ;;  %v7539_v15 = vld [vmem:[#allocation4 + $0xa4] ss:$8 sps:$4 sm:$0xff]  }
  0x68   :  { %486 = vmatprep.mubr.bf16.mxu0 %v8470_v0  ;;  %2402 = vmatprep.subr.bf16.mxu1 %v7539_v15 }
  0x69   :  { %6383 = vmatmul.mubr.msk.bf16.gmra.mrb[24].mxu1 %vm131_vm0, %v7527_v5 }
  0x6a   :  { %271 = vmatprep.mubr.bf16.mxu1 %v8470_v0 }
  0x6f   :  { %6403 = vmatmul.mubr.msk.bf16.gmra.mrb[28].mxu0 %vm131_vm0, %v7452_v16  ;;  %v7537_v16 = vld [vmem:[#allocation4 + $0xa0] ss:$8 sps:$4 sm:$0xff]  }
  0x70   :  { %496 = vmatprep.mubr.bf16.mxu0 %v8470_v0  ;;  %2403 = vmatpush1.bf16.msra.mxu1 %v7537_v16 }
  0x71   :  { %6384 = vmatmul.mubr.msk.bf16.gmra.mrb[28].mxu1 %vm131_vm0, %v7529_v8 }
  0x77   :  { %6404 = vmatmul.mubr.msk.bf16.gmra.mrb[32].mxu0 %vm131_vm0, %v7453_v17  ;;  %v7542_v17 = vld [vmem:[#allocation4 + $0xb4] ss:$8 sps:$4 sm:$0xff]  }
  0x78   :  { %677 = vmatprep.mubr.bf16.mxu0 %v8470_v0  ;;  %2404 = vmatprep.subr.bf16.mxu1 %v7542_v17 }
  0x7f   :  { %6416 = vmatmul.mubr.msk.bf16.vlgmr.msra.gmra.mrb[0].mxu0 %vm131_vm0, %v7454_v18  ;;  %v7540_v18 = vld [vmem:[#allocation4 + $0xb0] ss:$8 sps:$4 sm:$0xff]  }
  0x80   :  { %907 = vmatpush1.bf16.msra.mxu0 %v7455_v19  ;;  %687 = vmatprep.mubr.bf16.mxu0 %v8470_v0  ;;  %v7508_v19 = vld [vmem:[%s9264_s0 + $0x48] sm:$0xff]  }
  0x81   :  { %1167 = vmatprep.subr.bf16.mxu0 %v7469_v20  ;;  %v7545_v20 = vld [vmem:[#allocation4 + $0xc4] ss:$8 sps:$4 sm:$0xff]   ;;  %2405 = vmatpush1.bf16.msra.mxu1 %v7540_v18 }
  0x82   :  { %2406 = vmatprep.subr.bf16.mxu1 %v7545_v20 }
  0x87   :  { %6417 = vmatmul.mubr.msk.bf16.gmra.mrb[4].mxu0 %vm131_vm0, %v7458_v21  ;;  %v7543_v21 = vld [vmem:[#allocation4 + $0xc0] ss:$8 sps:$4 sm:$0xff]  }
  0x88   :  { %697 = vmatprep.mubr.bf16.mxu0 %v8470_v0  ;;  %2407 = vmatpush1.bf16.msra.mxu1 %v7543_v21 }
  0x8f   :  { %6418 = vmatmul.mubr.msk.bf16.gmra.mrb[8].mxu0 %vm131_vm0, %v7459_v22  ;;  %v7548_v22 = vld [vmem:[#allocation4 + $0xd4] ss:$8 sps:$4 sm:$0xff]  }
  0x90   :  { %707 = vmatprep.mubr.bf16.mxu0 %v8470_v0  ;;  %2408 = vmatprep.subr.bf16.mxu1 %v7548_v22 }
  0x97   :  { %6419 = vmatmul.mubr.msk.bf16.gmra.mrb[12].mxu0 %vm131_vm0, %v7460_v23  ;;  %v7546_v23 = vld [vmem:[#allocation4 + $0xd0] ss:$8 sps:$4 sm:$0xff]  }
  0x98   :  { %717 = vmatprep.mubr.bf16.mxu0 %v8470_v0  ;;  %2409 = vmatpush1.bf16.msra.mxu1 %v7546_v23 }
  0x9f   :  { %6420 = vmatmul.mubr.msk.bf16.gmra.mrb[16].mxu0 %vm131_vm0, %v7461_v24  ;;  %v7509_v24 = vld [vmem:[%s9264_s0 + $0x50] sm:$0xff]  }
  0xa0   :  { %727 = vmatprep.mubr.bf16.mxu0 %v8470_v0 }
  0xa7   :  { %6421 = vmatmul.mubr.msk.bf16.gmra.mrb[20].mxu0 %vm131_vm0, %v7462_v25  ;;  %v7551_v25 = vld [vmem:[#allocation4 + $0xe4] ss:$8 sps:$4 sm:$0xff]  }
  0xa8   :  { %737 = vmatprep.mubr.bf16.mxu0 %v8470_v0  ;;  %2410 = vmatprep.subr.bf16.mxu1 %v7551_v25 }
  0xaf   :  { %6422 = vmatmul.mubr.msk.bf16.gmra.mrb[24].mxu0 %vm131_vm0, %v7463_v26  ;;  %v7549_v26 = vld [vmem:[#allocation4 + $0xe0] ss:$8 sps:$4 sm:$0xff]  }
  0xb0   :  { %747 = vmatprep.mubr.bf16.mxu0 %v8470_v0  ;;  %2411 = vmatpush1.bf16.msra.mxu1 %v7549_v26 }
  0xb7   :  { %6423 = vmatmul.mubr.msk.bf16.gmra.mrb[28].mxu0 %vm131_vm0, %v7464_v27  ;;  %v7554_v27 = vld [vmem:[#allocation4 + $0xf4] ss:$8 sps:$4 sm:$0xff]  }
  0xb8   :  { %757 = vmatprep.mubr.bf16.mxu0 %v8470_v0  ;;  %2412 = vmatprep.subr.bf16.mxu1 %v7554_v27 }
  0xbf   :  { %6424 = vmatmul.mubr.msk.bf16.gmra.mrb[32].mxu0 %vm131_vm0, %v7465_v28  ;;  %v7552_v28 = vld [vmem:[#allocation4 + $0xf0] ss:$8 sps:$4 sm:$0xff]  }
  0xc0   :  { %938 = vmatprep.mubr.bf16.mxu0 %v8470_v0  ;;  %2413 = vmatpush1.bf16.msra.mxu1 %v7552_v28  ;;  %v66_v28 = vlaneseq }
  0xc7   :  { %6436 = vmatmul.mubr.msk.bf16.vlgmr.msra.gmra.mrb[0].mxu0 %vm131_vm0, %v7466_v29  ;;  %v7510_v29 = vld [vmem:[%s9264_s0 + $0x58] sm:$0xff]  }
  0xc8   :  { %1168 = vmatpush1.bf16.msra.mxu0 %v7467_v30  ;;  %948 = vmatprep.mubr.bf16.mxu0 %v8470_v0  ;;  %v7557_v30 = vld [vmem:[#allocation4 + $0x104] ss:$8 sps:$4 sm:$0xff]  }
  0xc9   :  { %1428 = vmatprep.subr.bf16.mxu0 %v7481_v31  ;;  %v7555_v31 = vld [vmem:[#allocation4 + $0x100] ss:$8 sps:$4 sm:$0xff]   ;;  %2414 = vmatprep.subr.bf16.mxu1 %v7557_v30 }
  0xca   :  { %2415 = vmatpush1.bf16.msra.mxu1 %v7555_v31  ;;  %v64_v31 = vld [vmem:[#allocation6] ss:$8 sm:$0x3] }
  0xcf   :  { %6437 = vmatmul.mubr.msk.bf16.gmra.mrb[4].mxu0 %vm131_vm0, %v7470_v32  ;;  %v7560_v32 = vld [vmem:[#allocation4 + $0x114] ss:$8 sps:$4 sm:$0xff]  }
  0xd0   :  { %958 = vmatprep.mubr.bf16.mxu0 %v8470_v0  ;;  %2416 = vmatprep.subr.bf16.mxu1 %v7560_v32 }
  0xd7   :  { %6438 = vmatmul.mubr.msk.bf16.gmra.mrb[8].mxu0 %vm131_vm0, %v7471_v33  ;;  %v7558_v33 = vld [vmem:[#allocation4 + $0x110] ss:$8 sps:$4 sm:$0xff]  }
  0xd8   :  { %968 = vmatprep.mubr.bf16.mxu0 %v8470_v0  ;;  %2417 = vmatpush1.bf16.msra.mxu1 %v7558_v33 }
  0xdf   :  { %6439 = vmatmul.mubr.msk.bf16.gmra.mrb[12].mxu0 %vm131_vm0, %v7472_v34  ;;  %v7511_v34 = vld [vmem:[%s9264_s0 + $0x60] sm:$0xff]  }
  0xe0   :  { %978 = vmatprep.mubr.bf16.mxu0 %v8470_v0 }
  0xe7   :  { %6440 = vmatmul.mubr.msk.bf16.gmra.mrb[16].mxu0 %vm131_vm0, %v7473_v35  ;;  %v7563_v35 = vld [vmem:[#allocation4 + $0x124] ss:$8 sps:$4 sm:$0xff]  }
  0xe8   :  { %988 = vmatprep.mubr.bf16.mxu0 %v8470_v0  ;;  %2418 = vmatprep.subr.bf16.mxu1 %v7563_v35 }
  0xef   :  { %6441 = vmatmul.mubr.msk.bf16.gmra.mrb[20].mxu0 %vm131_vm0, %v7474_v36  ;;  %v7561_v36 = vld [vmem:[#allocation4 + $0x120] ss:$8 sps:$4 sm:$0xff]  }
  0xf0   :  { %998 = vmatprep.mubr.bf16.mxu0 %v8470_v0  ;;  %2419 = vmatpush1.bf16.msra.mxu1 %v7561_v36 }
  0xf7   :  { %6442 = vmatmul.mubr.msk.bf16.gmra.mrb[24].mxu0 %vm131_vm0, %v7475_v37  ;;  %v7566_v37 = vld [vmem:[#allocation4 + $0x134] ss:$8 sps:$4 sm:$0xff]  }
  0xf8   :  { %1008 = vmatprep.mubr.bf16.mxu0 %v8470_v0  ;;  %2420 = vmatprep.subr.bf16.mxu1 %v7566_v37 }
  0xff   :  { %6443 = vmatmul.mubr.msk.bf16.gmra.mrb[28].mxu0 %vm131_vm0, %v7476_v38  ;;  %v7564_v38 = vld [vmem:[#allocation4 + $0x130] ss:$8 sps:$4 sm:$0xff]  }
 0x100   :  { %1018 = vmatprep.mubr.bf16.mxu0 %v8470_v0  ;;  %2421 = vmatpush1.bf16.msra.mxu1 %v7564_v38 }
 0x107   :  { %6444 = vmatmul.mubr.msk.bf16.gmra.mrb[32].mxu0 %vm131_vm0, %v7477_v39  ;;  %v7512_v39 = vld [vmem:[%s9264_s0 + $0x68] sm:$0xff]  }
 0x108   :  { %1199 = vmatprep.mubr.bf16.mxu0 %v8470_v0 }
 0x10f   :  { %6456 = vmatmul.mubr.msk.bf16.vlgmr.msra.gmra.mrb[0].mxu0 %vm131_vm0, %v7478_v40  ;;  %v7513_v40 = vld [vmem:[%s9264_s0 + $0x70] sm:$0xff]  }
 0x110   :  { %1429 = vmatpush1.bf16.msra.mxu0 %v7479_v41  ;;  %1209 = vmatprep.mubr.bf16.mxu0 %v8470_v0  ;;  %v7514_v41 = vld [vmem:[%s9264_s0 + $0x38] sm:$0xff]  }
 0x111   :  { %1689 = vmatprep.subr.bf16.mxu0 %v7493_v42  ;;  %v7516_v42 = vld [vmem:[%s9264_s0 + $0x40] sm:$0xff]  }
 0x117   :  { %6457 = vmatmul.mubr.msk.bf16.gmra.mrb[4].mxu0 %vm131_vm0, %v7482_v43  ;;  %v7518_v43 = vld [vmem:[%s9264_s0 + $0x48] sm:$0xff]  }
 0x118   :  { %1219 = vmatprep.mubr.bf16.mxu0 %v8470_v0 }
 0x11f   :  { %6458 = vmatmul.mubr.msk.bf16.gmra.mrb[8].mxu0 %vm131_vm0, %v7483_v44  ;;  %v7520_v44 = vld [vmem:[%s9264_s0 + $0x50] sm:$0xff]  }
 0x120   :  { %1229 = vmatprep.mubr.bf16.mxu0 %v8470_v0 }
 0x127   :  { %6459 = vmatmul.mubr.msk.bf16.gmra.mrb[12].mxu0 %vm131_vm0, %v7484_v45  ;;  %v7522_v45 = vld [vmem:[%s9264_s0 + $0x58] sm:$0xff]  }
 0x128   :  { %1239 = vmatprep.mubr.bf16.mxu0 %v8470_v0 }
 0x12f   :  { %6460 = vmatmul.mubr.msk.bf16.gmra.mrb[16].mxu0 %vm131_vm0, %v7485_v46  ;;  %v7524_v46 = vld [vmem:[%s9264_s0 + $0x60] sm:$0xff]  }
 0x130   :  { %1249 = vmatprep.mubr.bf16.mxu0 %v8470_v0 }
 0x137   :  { %6461 = vmatmul.mubr.msk.bf16.gmra.mrb[20].mxu0 %vm131_vm0, %v7486_v47  ;;  %v7526_v47 = vld [vmem:[%s9264_s0 + $0x68] sm:$0xff]  }
 0x138   :  { %1259 = vmatprep.mubr.bf16.mxu0 %v8470_v0 }
 0x13f   :  { %6462 = vmatmul.mubr.msk.bf16.gmra.mrb[24].mxu0 %vm131_vm0, %v7487_v48  ;;  %v7528_v48 = vld [vmem:[%s9264_s0 + $0x70] sm:$0xff]  }
 0x140   :  { %1269 = vmatprep.mubr.bf16.mxu0 %v8470_v0 }
 0x147   :  { %6463 = vmatmul.mubr.msk.bf16.gmra.mrb[28].mxu0 %vm131_vm0, %v7488_v49  ;;  %v7530_v49 = vld [vmem:[%s9264_s0 + $0x78] sm:$0xff]  }
 0x148   :  { %1279 = vmatprep.mubr.bf16.mxu0 %v8470_v0 }
 0x14f   :  { %6464 = vmatmul.mubr.msk.bf16.gmra.mrb[32].mxu0 %vm131_vm0, %v7489_v50  ;;  %v7569_v50 = vld [vmem:[#allocation4 + $0x144] ss:$8 sps:$4 sm:$0xff]  }
 0x150   :  { %1460 = vmatprep.mubr.bf16.mxu0 %v8470_v0  ;;  %2422 = vmatprep.subr.bf16.mxu1 %v7569_v50 }
 0x157   :  { %6476 = vmatmul.mubr.msk.bf16.vlgmr.msra.gmra.mrb[0].mxu0 %vm131_vm0, %v7490_v51  ;;  %v7567_v51 = vld [vmem:[#allocation4 + $0x140] ss:$8 sps:$4 sm:$0xff]  }
 0x158   :  { %1690 = vmatpush1.bf16.msra.mxu0 %v7491_v52  ;;  %1470 = vmatprep.mubr.bf16.mxu0 %v8470_v0  ;;  %v7572_v52 = vld [vmem:[#allocation4 + $0x154] ss:$8 sps:$4 sm:$0xff]  }
 0x159   :  { %1950 = vmatprep.subr.bf16.mxu0 %v7505_v53  ;;  %2423 = vmatpush1.bf16.msra.mxu1 %v7567_v51  ;;  %v8880_v53 = vpop.f32.mrb[0].mxu1 }
 0x15a   :  { %2424 = vmatprep.subr.bf16.mxu1 %v7572_v52 }
 0x15f   :  { %6477 = vmatmul.mubr.msk.bf16.gmra.mrb[4].mxu0 %vm131_vm0, %v7494_v54  ;;  %v7570_v54 = vld [vmem:[#allocation4 + $0x150] ss:$8 sps:$4 sm:$0xff]  }
 0x160   :  { %1480 = vmatprep.mubr.bf16.mxu0 %v8470_v0  ;;  %2425 = vmatpush1.bf16.msra.mxu1 %v7570_v54 }
 0x161   :  { %2426 = vmatprep.subr.bf16.mxu1 %v7575_v58 }
 0x167   :  { %6478 = vmatmul.mubr.msk.bf16.gmra.mrb[8].mxu0 %vm131_vm0, %v7495_v55  ;;  %v8882_v55 = vpop.f32.mrb[1].mxu1 }
 0x168   :  { %1490 = vmatprep.mubr.bf16.mxu0 %v8470_v0  ;;  %v207_v56 = vpop.f32.mrb[2].mxu1 }
 0x16f   :  { %6479 = vmatmul.mubr.msk.bf16.gmra.mrb[12].mxu0 %vm131_vm0, %v7496_v57  ;;  %v209_v57 = vpop.f32.mrb[3].mxu1 }
 0x170   :  { %1500 = vmatprep.mubr.bf16.mxu0 %v8470_v0 }
 0x177   :  { %6480 = vmatmul.mubr.msk.bf16.gmra.mrb[16].mxu0 %vm131_vm0, %v7497_v59  ;;  %v7573_v59 = vld [vmem:[#allocation4 + $0x160] ss:$8 sps:$4 sm:$0xff]  }
 0x178   :  { %1510 = vmatprep.mubr.bf16.mxu0 %v8470_v0  ;;  %2427 = vmatpush1.bf16.msra.mxu1 %v7573_v59 }
 0x179   :  { %2428 = vmatprep.subr.bf16.mxu1 %v7578_v60 }
 0x17c   :  { %2429 = vmatpush1.bf16.msra.mxu1 %v7576_v62 }
 0x17d   :  { %2695 = vmatprep.subr.bf16.mxu1 %v7581_v3 }
 0x17f   :  { %6481 = vmatmul.mubr.msk.bf16.gmra.mrb[20].mxu0 %vm131_vm0, %v7498_v61  ;;  %v8884_v61 = vpop.f32.mrb[4].mxu1 }
 0x180   :  { %1520 = vmatprep.mubr.bf16.mxu0 %v8470_v0 }
 0x187   :  { %6482 = vmatmul.mubr.msk.bf16.gmra.mrb[24].mxu0 %vm131_vm0, %v7499_v63  ;;  %v8886_v63 = vpop.f32.mrb[5].mxu1 }
 0x188   :  { %1530 = vmatprep.mubr.bf16.mxu0 %v8470_v0  ;;  %v8888_v1 = vpop.f32.mrb[6].mxu1 }
 0x18f   :  { %6483 = vmatmul.mubr.msk.bf16.gmra.mrb[28].mxu0 %vm131_vm0, %v7500_v2  ;;  %v8890_v2 = vpop.f32.mrb[7].mxu1 }
 0x190   :  { %1540 = vmatprep.mubr.bf16.mxu0 %v8470_v0 }
 0x197   :  { %6484 = vmatmul.mubr.msk.bf16.gmra.mrb[32].mxu0 %vm131_vm0, %v7501_v4  ;;  %v8892_v4 = vpop.f32.mrb[8].mxu1 }
 0x198   :  { %1721 = vmatprep.mubr.bf16.mxu0 %v8470_v0  ;;  %v8894_v5 = vpop.f32.mrb[9].mxu1 }
 0x19f   :  { %6496 = vmatmul.mubr.msk.bf16.vlgmr.msra.gmra.mrb[0].mxu0 %vm131_vm0, %v7502_v6  ;;  %v8896_v6 = vpop.f32.mrb[10].mxu1 }
 0x1a0   :  { %1951 = vmatpush1.bf16.msra.mxu0 %v7503_v7  ;;  %1731 = vmatprep.mubr.bf16.mxu0 %v8470_v0  ;;  %v8898_v7 = vpop.f32.mrb[11].mxu1 }
 0x1a1   :  { %v8900_v8 = vpop.f32.mrb[12].mxu1 }
 0x1a7   :  { %6497 = vmatmul.mubr.msk.bf16.gmra.mrb[4].mxu0 %vm131_vm0, %v7506_v9  ;;  %v8902_v9 = vpop.f32.mrb[13].mxu1 }
 0x1a8   :  { %1741 = vmatprep.mubr.bf16.mxu0 %v8470_v0  ;;  %v8904_v10 = vpop.f32.mrb[14].mxu1 }
 0x1a9   :  { %v8906_v11 = vpop.f32.mrb[15].mxu1 }
 0x1aa   :  { %v8908_v12 = vpop.f32.mrb[16].mxu1 }
 0x1ab   :  { %v8910_v13 = vpop.f32.mrb[17].mxu1 }
 0x1af   :  { %6498 = vmatmul.mubr.msk.bf16.gmra.mrb[8].mxu0 %vm131_vm0, %v7507_v14  ;;  %v8912_v14 = vpop.f32.mrb[18].mxu1 }
 0x1b0   :  { %1751 = vmatprep.mubr.bf16.mxu0 %v8470_v0  ;;  %v8914_v15 = vpop.f32.mrb[19].mxu1 }
 0x1b1   :  { %v8916_v16 = vpop.f32.mrb[20].mxu1 }
 0x1b2   :  { %v8918_v17 = vpop.f32.mrb[21].mxu1 }
 0x1b3   :  { %v8920_v18 = vpop.f32.mrb[22].mxu1 }
 0x1b7   :  { %6499 = vmatmul.mubr.msk.bf16.gmra.mrb[12].mxu0 %vm131_vm0, %v7508_v19  ;;  %v8922_v19 = vpop.f32.mrb[23].mxu1 }
 0x1b8   :  { %1761 = vmatprep.mubr.bf16.mxu0 %v8470_v0  ;;  %v8924_v20 = vpop.f32.mrb[24].mxu1 }
 0x1b9   :  { %v8926_v21 = vpop.f32.mrb[25].mxu1 }
 0x1ba   :  { %v8928_v22 = vpop.f32.mrb[26].mxu1 }
 0x1bb   :  { %v8930_v23 = vpop.f32.mrb[27].mxu1 }
 0x1bf   :  { %6500 = vmatmul.mubr.msk.bf16.gmra.mrb[16].mxu0 %vm131_vm0, %v7509_v24  ;;  %v8932_v24 = vpop.f32.mrb[28].mxu1 }
 0x1c0   :  { %1771 = vmatprep.mubr.bf16.mxu0 %v8470_v0  ;;  %v8934_v25 = vpop.f32.mrb[29].mxu1 }
 0x1c1   :  { %v8936_v26 = vpop.f32.mrb[30].mxu1 }
 0x1c2   :  { %v8938_v27 = vpop.f32.mrb[31].mxu1 }
 0x1c7   :  { %6501 = vmatmul.mubr.msk.bf16.gmra.mrb[20].mxu0 %vm131_vm0, %v7510_v29  ;;  %v67_v29 = vshrl.u32 %v66_v28, 7 }
 0x1c8   :  { %1781 = vmatprep.mubr.bf16.mxu0 %v8470_v0 }
 0x1c9   :  { %v8940_v30 = vsub.s32 0, %v67_v29  ;;  %v8942_v32 = vsub.s32 1, %v67_v29 }
 0x1cb   :  { %v8945_v33 = vrot.slane %v64_v31, %v8940_v30 }
 0x1cd   :  { %v218_v60 = vadd.f32 %v8888_v1, %v8945_v33 }
 0x1cf   :  { %6502 = vmatmul.mubr.msk.bf16.gmra.mrb[24].mxu0 %vm131_vm0, %v7511_v34  ;;  %v8948_v34 = vrot.slane %v64_v31, %v8942_v32 }
 0x1d0   :  { %1791 = vmatprep.mubr.bf16.mxu0 %v8470_v0 }
 0x1d1   :  { %v220_v28 = vadd.f32 %v8890_v2, %v8948_v34  ;;  %v224_v2 = vadd.f32 %v8892_v4, %v8945_v33 }
 0x1d7   :  { %6503 = vmatmul.mubr.msk.bf16.gmra.mrb[28].mxu0 %vm131_vm0, %v7512_v39 }
 0x1d8   :  { %1801 = vmatprep.mubr.bf16.mxu0 %v8470_v0 }
 0x1df   :  { %6504 = vmatmul.mubr.msk.bf16.gmra.mrb[32].mxu0 %vm131_vm0, %v7513_v40 }
 0x1e0   :  { %1982 = vmatprep.mubr.bf16.mxu0 %v8470_v0 }
 0x1e7   :  { %6516 = vmatmul.mubr.msk.bf16.vlgmr.msra.gmra.mrb[0].mxu0 %vm131_vm0, %v7514_v41 }
 0x1e8   :  { %1992 = vmatprep.mubr.bf16.mxu0 %v8470_v0 }
 0x1ef   :  { %6517 = vmatmul.mubr.msk.bf16.gmra.mrb[4].mxu0 %vm131_vm0, %v7516_v42 }
 0x1f0   :  { %2002 = vmatprep.mubr.bf16.mxu0 %v8470_v0 }
 0x1f7   :  { %6518 = vmatmul.mubr.msk.bf16.gmra.mrb[8].mxu0 %vm131_vm0, %v7518_v43  ;;  %v204_v43 = vadd.f32 %v8880_v53, %v8945_v33  ;;  %v214_v53 = vadd.f32 %v8884_v61, %v8945_v33 }
 0x1f8   :  { %2012 = vmatprep.mubr.bf16.mxu0 %v8470_v0 }
 0x1ff   :  { %6519 = vmatmul.mubr.msk.bf16.gmra.mrb[12].mxu0 %vm131_vm0, %v7520_v44  ;;  %v206_v44 = vadd.f32 %v8882_v55, %v8948_v34 }
 0x200   :  { %2022 = vmatprep.mubr.bf16.mxu0 %v8470_v0 }
 0x207   :  { %6520 = vmatmul.mubr.msk.bf16.gmra.mrb[16].mxu0 %vm131_vm0, %v7522_v45  ;;  %v208_v45 = vadd.f32 %v207_v56, %v8945_v33  ;;  %v216_v56 = vadd.f32 %v8886_v63, %v8948_v34 }
 0x208   :  { %2032 = vmatprep.mubr.bf16.mxu0 %v8470_v0 }
 0x20f   :  { %6521 = vmatmul.mubr.msk.bf16.gmra.mrb[20].mxu0 %vm131_vm0, %v7524_v46 }
 0x210   :  { %2042 = vmatprep.mubr.bf16.mxu0 %v8470_v0 }
 0x217   :  { %6522 = vmatmul.mubr.msk.bf16.gmra.mrb[24].mxu0 %vm131_vm0, %v7526_v47  ;;  %v210_v47 = vadd.f32 %v209_v57, %v8948_v34 }
 0x218   :  { %2052 = vmatprep.mubr.bf16.mxu0 %v8470_v0 }
 0x21f   :  { %6523 = vmatmul.mubr.msk.bf16.gmra.mrb[28].mxu0 %vm131_vm0, %v7528_v48 }
 0x220   :  { %2062 = vmatprep.mubr.bf16.mxu0 %v8470_v0 }
 0x227   :  { %6524 = vmatmul.mubr.msk.bf16.gmra.mrb[32].mxu0 %vm131_vm0, %v7530_v49 }
 0x2ba   :  { %v1984_v35 = vpop.f32.mrb[0].mxu0 }
 0x2bb   :  { %v7014_v36 = vadd.f32 %v1984_v35, %v8945_v33  ;;  %v1986_v37 = vpop.f32.mrb[1].mxu0 }
 0x2bc   :  { %v7015_v38 = vadd.f32 %v1986_v37, %v8948_v34  ;;  %v1988_v39 = vpop.f32.mrb[2].mxu0  ;;  %v7579_v37 = vld [vmem:[#allocation4 + $0x180] ss:$8 sps:$4 sm:$0xff]  }
 0x2bd   :  { %8258 = vtanh.f32 %v7014_v36  ;;  %v7016_v40 = vadd.f32 %v1988_v39, %v8945_v33  ;;  %v1990_v41 = vpop.f32.mrb[3].mxu0  ;;  %v7584_v39 = vld [vmem:[#allocation4 + $0x194] ss:$8 sps:$4 sm:$0xff]  }
 0x2be   :  { %8260 = vtanh.f32 %v7015_v38  ;;  %v7017_v42 = vadd.f32 %v1990_v41, %v8948_v34 }
 0x2bf   :  { %8262 = vtanh.f32 %v7016_v40 }
 0x2c0   :  { %8264 = vtanh.f32 %v7017_v42  ;;  %v7582_v42 = vld [vmem:[#allocation4 + $0x190] ss:$8 sps:$4 sm:$0xff]  }
 0x2c2   :  { %v1994_v46 = vpop.f32.mrb[4].mxu0 }
 0x2c3   :  { %v7019_v48 = vadd.f32 %v1994_v46, %v204_v43  ;;  %v1996_v49 = vpop.f32.mrb[5].mxu0 }
 0x2c4   :  { %v7021_v50 = vadd.f32 %v1996_v49, %v206_v44  ;;  %v1998_v51 = vpop.f32.mrb[6].mxu0  ;;  %v226_v44 = vadd.f32 %v8894_v5, %v8948_v34 }
 0x2c5   :  { %8266 = vtanh.f32 %v7019_v48  ;;  %v7023_v52 = vadd.f32 %v1998_v51, %v208_v45  ;;  %v2000_v54 = vpop.f32.mrb[7].mxu0  ;;  %v7587_v45 = vld [vmem:[#allocation4 + $0x1a4] ss:$8 sps:$4 sm:$0xff]  }
 0x2c6   :  { %8268 = vtanh.f32 %v7021_v50  ;;  %v7025_v58 = vadd.f32 %v2000_v54, %v210_v47  ;;  %v228_v47 = vadd.f32 %v8896_v6, %v8945_v33  ;;  %v230_v50 = vadd.f32 %v8898_v7, %v8948_v34 }
 0x2c7   :  { %v8259_v59 = vpop.eup %8258  ;;  %8270 = vtanh.f32 %v7023_v52 }
 0x2c8   :  { %v8261_v55 = vpop.eup %8260  ;;  %8272 = vtanh.f32 %v7025_v58  ;;  %v7585_v58 = vld [vmem:[#allocation4 + $0x1a0] ss:$8 sps:$4 sm:$0xff]  }
 0x2c9   :  { %v8263_v57 = vpop.eup %8262 }
 0x2ca   :  { %v8265_v62 = vpop.eup %8264  ;;  %v2004_v3 = vpop.f32.mrb[8].mxu0  ;;  %v2145_v29 = vpack.c.bf16 %v8263_v57, %v8259_v59  ;;  %v234_v57 = vadd.f32 %v8900_v8, %v8945_v33 }
 0x2cb   :  { %v7027_v31 = vadd.f32 %v2004_v3, %v214_v53  ;;  %v2006_v35 = vpop.f32.mrb[9].mxu0  ;;  %v2146_v36 = vpack.c.bf16 %v8265_v62, %v8261_v55  ;;  %v7590_v53 = vld [vmem:[#allocation4 + $0x1b4] ss:$8 sps:$4 sm:$0xff]   ;;  %v236_v3 = vadd.f32 %v8902_v9, %v8948_v34 }
 0x2cc   :  { %v7029_v61 = vadd.f32 %v2006_v35, %v216_v56  ;;  %v2008_v38 = vpop.f32.mrb[10].mxu0 }
 0x2cd   :  { %8274 = vtanh.f32 %v7027_v31  ;;  %v7031_v40 = vadd.f32 %v2008_v38, %v218_v60  ;;  %v2010_v63 = vpop.f32.mrb[11].mxu0  ;;  %2430 = vmatprep.mubr.bf16.mxu1 %v2146_v36  ;;  %v7588_v60 = vld [vmem:[#allocation4 + $0x1b0] ss:$8 sps:$4 sm:$0xff]   ;;  %v238_v31 = vadd.f32 %v8904_v10, %v8945_v33 }
 0x2ce   :  { %8276 = vtanh.f32 %v7029_v61  ;;  %v7033_v41 = vadd.f32 %v2010_v63, %v220_v28  ;;  %2431 = vmatmul.mubr.bf16.vlgmr.msra.gmra.mrb[32].mxu1 %v2145_v29  ;;  %v7593_v28 = vld [vmem:[#allocation4 + $0x1c4] ss:$8 sps:$4 sm:$0xff]  }
 0x2cf   :  { %v8267_v1 = vpop.eup %8266  ;;  %8278 = vtanh.f32 %v7031_v40  ;;  %2696 = vmatpush1.bf16.msra.mxu1 %v7579_v37  ;;  %v240_v37 = vadd.f32 %v8906_v11, %v8948_v34  ;;  %v7591_v40 = vld [vmem:[#allocation4 + $0x1c0] ss:$8 sps:$4 sm:$0xff]  }
 0x2d0   :  { %v8269_v43 = vpop.eup %8268  ;;  %8280 = vtanh.f32 %v7033_v41  ;;  %2697 = vmatprep.subr.bf16.mxu1 %v7584_v39  ;;  %v7596_v41 = vld [vmem:[#allocation4 + $0x1d4] ss:$8 sps:$4 sm:$0xff]  }
 0x2d1   :  { %v8271_v46 = vpop.eup %8270 }
 0x2d2   :  { %v8273_v48 = vpop.eup %8272  ;;  %v2014_v49 = vpop.f32.mrb[12].mxu0  ;;  %v8976_v51 = vpack.c.bf16 %v8271_v46, %v8267_v1  ;;  %v7599_v46 = vld [vmem:[#allocation4 + $0x1e4] ss:$8 sps:$4 sm:$0xff]  }
 0x2d3   :  { %v7035_v4 = vadd.f32 %v2014_v49, %v224_v2  ;;  %2698 = vmatpush1.bf16.msra.mxu1 %v7582_v42  ;;  %v2016_v52 = vpop.f32.mrb[13].mxu0  ;;  %v8978_v54 = vpack.c.bf16 %v8273_v48, %v8269_v43  ;;  %v244_v42 = vadd.f32 %v8908_v12, %v8945_v33  ;;  %v7594_v43 = vld [vmem:[#allocation4 + $0x1d0] ss:$8 sps:$4 sm:$0xff]   ;;  %v248_v48 = vadd.f32 %v8912_v14, %v8945_v33 }
 0x2d4   :  { %v7037_v5 = vadd.f32 %v2016_v52, %v226_v44  ;;  %v2018_v59 = vpop.f32.mrb[14].mxu0  ;;  %2699 = vmatprep.subr.bf16.mxu1 %v7587_v45  ;;  %v246_v45 = vadd.f32 %v8910_v13, %v8948_v34 }
 0x2d5   :  { %8282 = vtanh.f32 %v7035_v4  ;;  %v7039_v55 = vadd.f32 %v2018_v59, %v228_v47  ;;  %v2020_v6 = vpop.f32.mrb[15].mxu0  ;;  %2440 = vmatprep.mubr.bf16.mxu1 %v8978_v54  ;;  %v250_v4 = vadd.f32 %v8914_v15, %v8948_v34  ;;  %v7597_v59 = vld [vmem:[#allocation4 + $0x1e0] ss:$8 sps:$4 sm:$0xff]  }
 0x2d6   :  { %8284 = vtanh.f32 %v7037_v5  ;;  %v7041_v56 = vadd.f32 %v2020_v6, %v230_v50  ;;  %2441 = vmatmul.mubr.bf16.gmra.mrb[36].mxu1 %v8976_v51 }
 0x2d7   :  { %v8275_v7 = vpop.eup %8274  ;;  %8286 = vtanh.f32 %v7039_v55  ;;  %2700 = vmatpush1.bf16.msra.mxu1 %v7585_v58  ;;  %v7602_v55 = vld [vmem:[#allocation4 + $0x1f4] ss:$8 sps:$4 sm:$0xff]  }
 0x2d8   :  { %v8277_v62 = vpop.eup %8276  ;;  %8288 = vtanh.f32 %v7041_v56  ;;  %2701 = vmatprep.subr.bf16.mxu1 %v7590_v53 }
 0x2d9   :  { %v8279_v29 = vpop.eup %8278 }
 0x2da   :  { %v8281_v35 = vpop.eup %8280  ;;  %v2024_v36 = vpop.f32.mrb[16].mxu0  ;;  %v8990_v61 = vpack.c.bf16 %v8279_v29, %v8275_v7  ;;  %v254_v7 = vadd.f32 %v8916_v16, %v8945_v33  ;;  %v258_v29 = vadd.f32 %v8920_v18, %v8945_v33 }
 0x2db   :  { %v7043_v8 = vadd.f32 %v2024_v36, %v234_v57  ;;  %2702 = vmatpush1.bf16.msra.mxu1 %v7588_v60  ;;  %v2026_v38 = vpop.f32.mrb[17].mxu0  ;;  %v8992_v39 = vpack.c.bf16 %v8281_v35, %v8277_v62  ;;  %v7600_v57 = vld [vmem:[#allocation4 + $0x1f0] ss:$8 sps:$4 sm:$0xff]   ;;  %v256_v62 = vadd.f32 %v8918_v17, %v8948_v34  ;;  %v260_v36 = vadd.f32 %v8922_v19, %v8948_v34 }
 0x2dc   :  { %v7045_v9 = vadd.f32 %v2026_v38, %v236_v3  ;;  %v2028_v63 = vpop.f32.mrb[18].mxu0  ;;  %2703 = vmatprep.subr.bf16.mxu1 %v7593_v28  ;;  %v7605_v3 = vld [vmem:[#allocation4 + $0x204] ss:$8 sps:$4 sm:$0xff]  }
 0x2dd   :  { %8290 = vtanh.f32 %v7043_v8  ;;  %v7047_v1 = vadd.f32 %v2028_v63, %v238_v31  ;;  %v2030_v10 = vpop.f32.mrb[19].mxu0  ;;  %2450 = vmatprep.mubr.bf16.mxu1 %v8992_v39  ;;  %v7608_v63 = vld [vmem:[#allocation4 + $0x214] ss:$8 sps:$4 sm:$0xff]  }
 0x2de   :  { %8292 = vtanh.f32 %v7045_v9  ;;  %v7049_v2 = vadd.f32 %v2030_v10, %v240_v37  ;;  %2451 = vmatmul.mubr.bf16.gmra.mrb[40].mxu1 %v8990_v61  ;;  %v264_v10 = vadd.f32 %v8924_v20, %v8945_v33 }
 0x2df   :  { %v8283_v11 = vpop.eup %8282  ;;  %8294 = vtanh.f32 %v7047_v1  ;;  %2704 = vmatpush1.bf16.msra.mxu1 %v7591_v40  ;;  %v7603_v40 = vld [vmem:[#allocation4 + $0x200] ss:$8 sps:$4 sm:$0xff]  }
 0x2e0   :  { %v8285_v44 = vpop.eup %8284  ;;  %8296 = vtanh.f32 %v7049_v2  ;;  %2705 = vmatprep.subr.bf16.mxu1 %v7596_v41  ;;  %v7606_v2 = vld [vmem:[#allocation4 + $0x210] ss:$8 sps:$4 sm:$0xff]  }
 0x2e1   :  { %v8287_v47 = vpop.eup %8286 }
 0x2e2   :  { %v8289_v49 = vpop.eup %8288  ;;  %v2034_v50 = vpop.f32.mrb[20].mxu0  ;;  %v9004_v52 = vpack.c.bf16 %v8287_v47, %v8283_v11 }
 0x2e3   :  { %v7051_v12 = vadd.f32 %v2034_v50, %v244_v42  ;;  %2706 = vmatpush1.bf16.msra.mxu1 %v7594_v43  ;;  %v2036_v58 = vpop.f32.mrb[21].mxu0  ;;  %v9006_v5 = vpack.c.bf16 %v8289_v49, %v8285_v44  ;;  %v266_v42 = vadd.f32 %v8926_v21, %v8948_v34  ;;  %v7611_v43 = vld [vmem:[#allocation4 + $0x224] ss:$8 sps:$4 sm:$0xff]  }
 0x2e4   :  { %v7053_v13 = vadd.f32 %v2036_v58, %v246_v45  ;;  %v2038_v53 = vpop.f32.mrb[22].mxu0  ;;  %2707 = vmatprep.subr.bf16.mxu1 %v7599_v46  ;;  %v268_v45 = vadd.f32 %v8928_v22, %v8945_v33 }
 0x2e5   :  { %8298 = vtanh.f32 %v7051_v12  ;;  %v7055_v6 = vadd.f32 %v2038_v53, %v248_v48  ;;  %v2040_v14 = vpop.f32.mrb[23].mxu0  ;;  %2460 = vmatprep.mubr.bf16.mxu1 %v9006_v5  ;;  %v270_v48 = vadd.f32 %v8930_v23, %v8948_v34  ;;  %v7609_v12 = vld [vmem:[#allocation4 + $0x220] ss:$8 sps:$4 sm:$0xff]  }
 0x2e6   :  { %8300 = vtanh.f32 %v7053_v13  ;;  %v7057_v56 = vadd.f32 %v2040_v14, %v250_v4  ;;  %2461 = vmatmul.mubr.bf16.gmra.mrb[44].mxu1 %v9004_v52 }
 0x2e7   :  { %v8291_v15 = vpop.eup %8290  ;;  %8302 = vtanh.f32 %v7055_v6  ;;  %2708 = vmatpush1.bf16.msra.mxu1 %v7597_v59  ;;  %v7614_v59 = vld [vmem:[#allocation4 + $0x234] ss:$8 sps:$4 sm:$0xff]   ;;  %v7612_v6 = vld [vmem:[#allocation4 + $0x230] ss:$8 sps:$4 sm:$0xff]  }
 0x2e8   :  { %v8293_v60 = vpop.eup %8292  ;;  %8304 = vtanh.f32 %v7057_v56  ;;  %2709 = vmatprep.subr.bf16.mxu1 %v7602_v55  ;;  %v274_v55 = vadd.f32 %v8932_v24, %v8945_v33  ;;  %v276_v56 = vadd.f32 %v8934_v25, %v8948_v34 }
 0x2e9   :  { %v8295_v28 = vpop.eup %8294 }
 0x2ea   :  { %v8297_v31 = vpop.eup %8296  ;;  %v2044_v35 = vpop.f32.mrb[24].mxu0  ;;  %v9018_v37 = vpack.c.bf16 %v8295_v28, %v8291_v15  ;;  %v7617_v15 = vld [vmem:[#allocation4 + $0x244] ss:$8 sps:$4 sm:$0xff]  }
 0x2eb   :  { %v7059_v16 = vadd.f32 %v2044_v35, %v254_v7  ;;  %2710 = vmatpush1.bf16.msra.mxu1 %v7600_v57  ;;  %v2046_v8 = vpop.f32.mrb[25].mxu0  ;;  %v9020_v38 = vpack.c.bf16 %v8297_v31, %v8293_v60  ;;  %v278_v57 = vadd.f32 %v8936_v26, %v8945_v33 }
 0x2ec   :  { %v7061_v17 = vadd.f32 %v2046_v8, %v256_v62  ;;  %v2048_v9 = vpop.f32.mrb[26].mxu0  ;;  %2711 = vmatprep.subr.bf16.mxu1 %v7605_v3 }
 0x2ed   :  { %8306 = vtanh.f32 %v7059_v16  ;;  %v7063_v41 = vadd.f32 %v2048_v9, %v258_v29  ;;  %v2050_v18 = vpop.f32.mrb[27].mxu0  ;;  %2470 = vmatprep.mubr.bf16.mxu1 %v9020_v38  ;;  %v7615_v29 = vld [vmem:[#allocation4 + $0x240] ss:$8 sps:$4 sm:$0xff]  }
 0x2ee   :  { %8308 = vtanh.f32 %v7061_v17  ;;  %v7065_v1 = vadd.f32 %v2050_v18, %v260_v36  ;;  %2471 = vmatmul.mubr.bf16.gmra.mrb[48].mxu1 %v9018_v37  ;;  %v7620_v36 = vld [vmem:[#allocation4 + $0x254] ss:$8 sps:$4 sm:$0xff]  }
 0x2ef   :  { %v8299_v19 = vpop.eup %8298  ;;  %8310 = vtanh.f32 %v7063_v41  ;;  %2712 = vmatpush1.bf16.msra.mxu1 %v7603_v40  ;;  %v7623_v40 = vld [vmem:[#allocation4 + $0x264] ss:$8 sps:$4 sm:$0xff]   ;;  %v7621_v41 = vld [vmem:[#allocation4 + $0x260] ss:$8 sps:$4 sm:$0xff]  }
 0x2f0   :  { %v8301_v11 = vpop.eup %8300  ;;  %8312 = vtanh.f32 %v7065_v1  ;;  %2713 = vmatprep.subr.bf16.mxu1 %v7608_v63  ;;  %v7626_v1 = vld [vmem:[#allocation4 + $0x274] ss:$8 sps:$4 sm:$0xff]  }
 0x2f1   :  { %v8303_v44 = vpop.eup %8302 }
 0x2f2   :  { %v8305_v46 = vpop.eup %8304  ;;  %v2054_v47 = vpop.f32.mrb[28].mxu0  ;;  %v9032_v49 = vpack.c.bf16 %v8303_v44, %v8299_v19 }
 0x2f3   :  { %v7067_v20 = vadd.f32 %v2054_v47, %v264_v10  ;;  %2714 = vmatpush1.bf16.msra.mxu1 %v7606_v2  ;;  %v2056_v50 = vpop.f32.mrb[29].mxu0  ;;  %v9034_v4 = vpack.c.bf16 %v8305_v46, %v8301_v11  ;;  %v7624_v10 = vld [vmem:[#allocation4 + $0x270] ss:$8 sps:$4 sm:$0xff]   ;;  %v7629_v11 = vld [vmem:[#allocation4 + $0x284] ss:$8 sps:$4 sm:$0xff]  }
 0x2f4   :  { %v7069_v21 = vadd.f32 %v2056_v50, %v266_v42  ;;  %v2058_v58 = vpop.f32.mrb[30].mxu0  ;;  %2715 = vmatprep.subr.bf16.mxu1 %v7611_v43  ;;  %v7632_v47 = vld [vmem:[#allocation4 + $0x294] ss:$8 sps:$4 sm:$0xff]   ;;  %v7633_v50 = vld [vmem:[#allocation4 + $0x2a0] ss:$8 sps:$4 sm:$0xff]  }
 0x2f5   :  { %8314 = vtanh.f32 %v7067_v20  ;;  %v7071_v13 = vadd.f32 %v2058_v58, %v268_v45  ;;  %v2060_v22 = vpop.f32.mrb[31].mxu0  ;;  %2480 = vmatprep.mubr.bf16.mxu1 %v9034_v4  ;;  %v7627_v45 = vld [vmem:[#allocation4 + $0x280] ss:$8 sps:$4 sm:$0xff]   ;;  %v7635_v20 = vld [vmem:[#allocation4 + $0x2a4] ss:$8 sps:$4 sm:$0xff]  }
 0x2f6   :  { %8316 = vtanh.f32 %v7069_v21  ;;  %v7073_v53 = vadd.f32 %v2060_v22, %v270_v48  ;;  %2481 = vmatmul.mubr.bf16.gmra.mrb[52].mxu1 %v9032_v49  ;;  %v7630_v48 = vld [vmem:[#allocation4 + $0x290] ss:$8 sps:$4 sm:$0xff]   ;;  %v7641_v58 = vld [vmem:[#allocation4 + $0x2c4] ss:$8 sps:$4 sm:$0xff]  }
 0x2f7   :  { %v8307_v23 = vpop.eup %8306  ;;  %8318 = vtanh.f32 %v7071_v13  ;;  %2716 = vmatpush1.bf16.msra.mxu1 %v7609_v12  ;;  %2727 = vmatprep.mubr.bf16.mxu1 %v8978_v54  ;;  %v280_v54 = vadd.f32 %v8938_v27, %v8948_v34  ;;  %v7618_v27 = vld [vmem:[#allocation4 + $0x250] ss:$8 sps:$4 sm:$0xff]   ;;  %v7638_v12 = vld [vmem:[#allocation4 + $0x2b4] ss:$8 sps:$4 sm:$0xff]   ;;  %v7647_v22 = vld [vmem:[#allocation4 + $0x2e4] ss:$8 sps:$4 sm:$0xff]  }
 0x2f8   :  { %v8309_v14 = vpop.eup %8308  ;;  %8320 = vtanh.f32 %v7073_v53  ;;  %2717 = vmatprep.subr.bf16.mxu1 %v7614_v59  ;;  %v7636_v21 = vld [vmem:[#allocation4 + $0x2b0] ss:$8 sps:$4 sm:$0xff]   ;;  %v7644_v59 = vld [vmem:[#allocation4 + $0x2d4] ss:$8 sps:$4 sm:$0xff]   ;;  %v7645_v53 = vld [vmem:[#allocation4 + $0x2e0] ss:$8 sps:$4 sm:$0xff]  }
 0x2f9   :  { %v8311_v7 = vpop.eup %8310  ;;  %v7642_v13 = vld [vmem:[#allocation4 + $0x2d0] ss:$8 sps:$4 sm:$0xff]  }
 0x2fa   :  { %v8313_v60 = vpop.eup %8312  ;;  %v2064_v62 = vpop.f32.mrb[32].mxu0  ;;  %v9047_v3 = vpack.c.bf16 %v8311_v7, %v8307_v23  ;;  %v7650_v23 = vld [vmem:[#allocation4 + $0x2f4] ss:$8 sps:$4 sm:$0xff]   ;;  %v7659_v7 = vld [vmem:[#allocation4 + $0x324] ss:$8 sps:$4 sm:$0xff]  }
 0x2fb   :  { %v7075_v24 = vadd.f32 %v2064_v62, %v274_v55  ;;  %2718 = vmatpush1.bf16.msra.mxu1 %v7612_v6  ;;  %v2066_v28 = vpop.f32.mrb[33].mxu0  ;;  %v9049_v31 = vpack.c.bf16 %v8313_v60, %v8309_v14  ;;  %v7648_v55 = vld [vmem:[#allocation4 + $0x2f0] ss:$8 sps:$4 sm:$0xff]   ;;  %v7653_v6 = vld [vmem:[#allocation4 + $0x304] ss:$8 sps:$4 sm:$0xff]  }
 0x2fc   :  { %v7077_v25 = vadd.f32 %v2066_v28, %v276_v56  ;;  %v2068_v35 = vpop.f32.mrb[34].mxu0  ;;  %2719 = vmatprep.subr.bf16.mxu1 %v7617_v15  ;;  %v7651_v14 = vld [vmem:[#allocation4 + $0x300] ss:$8 sps:$4 sm:$0xff]   ;;  %v7656_v56 = vld [vmem:[#allocation4 + $0x314] ss:$8 sps:$4 sm:$0xff]  }
 0x2fd   :  { %8322 = vtanh.f32 %v7075_v24  ;;  %v7079_v16 = vadd.f32 %v2068_v35, %v278_v57  ;;  %v2070_v26 = vpop.f32.mrb[35].mxu0  ;;  %v7654_v15 = vld [vmem:[#allocation4 + $0x310] ss:$8 sps:$4 sm:$0xff]   ;;  %v7657_v57 = vld [vmem:[#allocation4 + $0x320] ss:$8 sps:$4 sm:$0xff]  }
 0x2fe   :  { %8324 = vtanh.f32 %v7077_v25  ;;  %v7081_v33 = vadd.f32 %v2070_v26, %v280_v54  ;;  %v7662_v60 = vld [vmem:[#allocation4 + $0x334] ss:$8 sps:$4 sm:$0xff]   ;;  %v7723_v62 = vld [vmem:[#allocation4 + $0x480] ss:$8 sps:$4 sm:$0xff]   ;;  %v7725_v54 = vld [vmem:[#allocation4 + $0x484] ss:$8 sps:$4 sm:$0xff]  }
 0x2ff   :  { %v8315_v8 = vpop.eup %8314  ;;  %8326 = vtanh.f32 %v7079_v16  ;;  %2720 = vmatpush1.bf16.msra.mxu1 %v7615_v29  ;;  %v7660_v24 = vld [vmem:[#allocation4 + $0x330] ss:$8 sps:$4 sm:$0xff]   ;;  %v7728_v28 = vld [vmem:[#allocation4 + $0x494] ss:$8 sps:$4 sm:$0xff]   ;;  %v7665_v29 = vld [vmem:[#allocation4 + $0x344] ss:$8 sps:$4 sm:$0xff]   ;;  %3709 = vmatprep.subr.bf16.mxu0 %v7725_v54 }
 0x300   :  { %v8317_v34 = vpop.eup %8316  ;;  %8328 = vtanh.f32 %v7081_v33  ;;  %2721 = vmatprep.subr.bf16.mxu1 %v7620_v36  ;;  %3710 = vmatpush1.bf16.msra.mxu0 %v7723_v62  ;;  %v7726_v25 = vld [vmem:[#allocation4 + $0x490] ss:$8 sps:$4 sm:$0xff]   ;;  %v7734_v35 = vld [vmem:[#allocation4 + $0x4a4] ss:$8 sps:$4 sm:$0xff]   ;;  %v7663_v36 = vld [vmem:[#allocation4 + $0x340] ss:$8 sps:$4 sm:$0xff]  }
 0x301   :  { %v8319_v17 = vpop.eup %8318  ;;  %3711 = vmatprep.subr.bf16.mxu0 %v7728_v28  ;;  %v7668_v16 = vld [vmem:[#allocation4 + $0x354] ss:$8 sps:$4 sm:$0xff]   ;;  %v7732_v26 = vld [vmem:[#allocation4 + $0x4a0] ss:$8 sps:$4 sm:$0xff]   ;;  %v7696_v54 = vld [vmem:[#allocation4 + $0x3f0] ss:$8 sps:$4 sm:$0xff]  }
 0x302   :  { %v8321_v9 = vpop.eup %8320  ;;  %v9051_v63 = vpack.c.bf16 %v8319_v17, %v8315_v8  ;;  %v7740_v33 = vld [vmem:[#allocation4 + $0x4b4] ss:$8 sps:$4 sm:$0xff]   ;;  %v7666_v8 = vld [vmem:[#allocation4 + $0x350] ss:$8 sps:$4 sm:$0xff]   ;;  %v7699_v28 = vld [vmem:[#allocation4 + $0x400] ss:$8 sps:$4 sm:$0xff]  }
 0x303   :  { %2722 = vmatpush1.bf16.msra.mxu1 %v7618_v27  ;;  %v9053_v18 = vpack.c.bf16 %v8321_v9, %v8317_v34  ;;  %v7738_v27 = vld [vmem:[#allocation4 + $0x4b0] ss:$8 sps:$4 sm:$0xff]   ;;  %v7746_v34 = vld [vmem:[#allocation4 + $0x4c4] ss:$8 sps:$4 sm:$0xff]   ;;  %v7674_v17 = vld [vmem:[#allocation4 + $0x374] ss:$8 sps:$4 sm:$0xff]  }
 0x304   :  { %2723 = vmatprep.subr.bf16.mxu1 %v7623_v40  ;;  %3712 = vmatpush1.bf16.msra.mxu0 %v7726_v25  ;;  %v7669_v40 = vld [vmem:[#allocation4 + $0x360] ss:$8 sps:$4 sm:$0xff]   ;;  %v7698_v62 = vld [vmem:[#allocation4 + $0x3f4] ss:$8 sps:$4 sm:$0xff]   ;;  %v7702_v25 = vld [vmem:[#allocation4 + $0x410] ss:$8 sps:$4 sm:$0xff]  }
 0x305   :  { %3713 = vmatprep.subr.bf16.mxu0 %v7734_v35  ;;  %v7744_v9 = vld [vmem:[#allocation4 + $0x4c0] ss:$8 sps:$4 sm:$0xff]   ;;  %v7707_v35 = vld [vmem:[#allocation4 + $0x424] ss:$8 sps:$4 sm:$0xff]  }
 0x307   :  { %v9055_v19 = vpop.eup %8322  ;;  %2724 = vmatpush1.bf16.msra.mxu1 %v7621_v41  ;;  %v7752_v41 = vld [vmem:[#allocation4 + $0x4d4] ss:$8 sps:$4 sm:$0xff]  }
 0x308   :  { %v9057_v2 = vpop.eup %8324  ;;  %2725 = vmatprep.subr.bf16.mxu1 %v7626_v1  ;;  %3714 = vmatpush1.bf16.msra.mxu0 %v7732_v26  ;;  %v7672_v1 = vld [vmem:[#allocation4 + $0x370] ss:$8 sps:$4 sm:$0xff]  }
 0x309   :  { %v9059_v42 = vpop.eup %8326  ;;  %3715 = vmatprep.subr.bf16.mxu0 %v7740_v33  ;;  %v7708_v26 = vld [vmem:[#allocation4 + $0x430] ss:$8 sps:$4 sm:$0xff]   ;;  %v7713_v33 = vld [vmem:[#allocation4 + $0x444] ss:$8 sps:$4 sm:$0xff]  }
 0x30a   :  { %v9061_v43 = vpop.eup %8328  ;;  %v2161_v44 = vpack.c.bf16 %v9059_v42, %v9055_v19  ;;  %v7803_v19 = vld [vmem:[#allocation4 + $0x644] ss:$8 sps:$4 sm:$0xff]   ;;  %v7801_v42 = vld [vmem:[#allocation4 + $0x640] ss:$8 sps:$4 sm:$0xff]  }
 0x30b   :  { %2726 = vmatpush1.bf16.msra.mxu1 %v7624_v10  ;;  %v2162_v46 = vpack.c.bf16 %v9061_v43, %v9057_v2  ;;  %v7677_v10 = vld [vmem:[#allocation4 + $0x384] ss:$8 sps:$4 sm:$0xff]   ;;  %v7797_v2 = vld [vmem:[#allocation4 + $0x634] ss:$8 sps:$4 sm:$0xff]   ;;  %v7795_v43 = vld [vmem:[#allocation4 + $0x630] ss:$8 sps:$4 sm:$0xff]  }
 0x30c   :  { %3016 = vmatprep.subr.bf16.mxu1 %v7629_v11  ;;  %3716 = vmatpush1.bf16.msra.mxu0 %v7738_v27  ;;  %v7750_v11 = vld [vmem:[#allocation4 + $0x4d0] ss:$8 sps:$4 sm:$0xff]  }
 0x30d   :  { %3717 = vmatprep.subr.bf16.mxu0 %v7746_v34  ;;  %v7714_v27 = vld [vmem:[#allocation4 + $0x450] ss:$8 sps:$4 sm:$0xff]   ;;  %v7719_v34 = vld [vmem:[#allocation4 + $0x464] ss:$8 sps:$4 sm:$0xff]  }
 0x30e   :  { %2728 = vmatmul.mubr.bf16.vlgmr.msra.gmra.mrb[32].mxu1 %v8976_v51  ;;  %v7639_v51 = vld [vmem:[#allocation4 + $0x2c0] ss:$8 sps:$4 sm:$0xff]  }
 0x30f   :  { %2737 = vmatprep.mubr.bf16.mxu1 %v8992_v39  ;;  %3017 = vmatpush1.bf16.msra.mxu1 %v7627_v45  ;;  %v7758_v45 = vld [vmem:[#allocation4 + $0x4e4] ss:$8 sps:$4 sm:$0xff]  }
 0x310   :  { %3018 = vmatprep.subr.bf16.mxu1 %v7632_v47  ;;  %3718 = vmatpush1.bf16.msra.mxu0 %v7744_v9  ;;  %v7675_v47 = vld [vmem:[#allocation4 + $0x380] ss:$8 sps:$4 sm:$0xff]   ;;  %v7720_v9 = vld [vmem:[#allocation4 + $0x470] ss:$8 sps:$4 sm:$0xff]  }
 0x311   :  { %3719 = vmatprep.subr.bf16.mxu0 %v7752_v41  ;;  %v7731_v41 = vld [vmem:[#allocation4 + $0x584] ss:$8 sps:$4 sm:$0xff]  }
 0x313   :  { %3019 = vmatpush1.bf16.msra.mxu1 %v7630_v48  ;;  %v7680_v48 = vld [vmem:[#allocation4 + $0x394] ss:$8 sps:$4 sm:$0xff]  }
 0x314   :  { %3020 = vmatprep.subr.bf16.mxu1 %v7635_v20  ;;  %3720 = vmatpush1.bf16.msra.mxu0 %v7750_v11  ;;  %v7756_v20 = vld [vmem:[#allocation4 + $0x4e0] ss:$8 sps:$4 sm:$0xff]   ;;  %v7743_v11 = vld [vmem:[#allocation4 + $0x5a4] ss:$8 sps:$4 sm:$0xff]  }
 0x315   :  { %3721 = vmatprep.subr.bf16.mxu0 %v7758_v45  ;;  %v7741_v45 = vld [vmem:[#allocation4 + $0x5a0] ss:$8 sps:$4 sm:$0xff]  }
 0x316   :  { %2738 = vmatmul.mubr.bf16.gmra.mrb[36].mxu1 %v8990_v61 }
 0x317   :  { %2747 = vmatprep.mubr.bf16.mxu1 %v9006_v5  ;;  %3021 = vmatpush1.bf16.msra.mxu1 %v7633_v50  ;;  %v7764_v50 = vld [vmem:[#allocation4 + $0x4f4] ss:$8 sps:$4 sm:$0xff]  }
 0x318   :  { %3022 = vmatprep.subr.bf16.mxu1 %v7638_v12  ;;  %v7678_v12 = vld [vmem:[#allocation4 + $0x390] ss:$8 sps:$4 sm:$0xff]   ;;  %3722 = vmatpush1.bf16.msra.mxu0 %v7756_v20  ;;  %v7755_v20 = vld [vmem:[#allocation4 + $0x5c4] ss:$8 sps:$4 sm:$0xff]  }
 0x319   :  { %3723 = vmatprep.subr.bf16.mxu0 %v7764_v50  ;;  %v7759_v50 = vld [vmem:[#allocation4 + $0x5d0] ss:$8 sps:$4 sm:$0xff]  }
 0x31b   :  { %3023 = vmatpush1.bf16.msra.mxu1 %v7636_v21  ;;  %v7683_v21 = vld [vmem:[#allocation4 + $0x3a4] ss:$8 sps:$4 sm:$0xff]  }
 0x31c   :  { %3024 = vmatprep.subr.bf16.mxu1 %v7641_v58  ;;  %v7762_v58 = vld [vmem:[#allocation4 + $0x4f0] ss:$8 sps:$4 sm:$0xff]  }
 0x31d   :  { %3724 = vmatpush1.bf16.msra.mxu0 %v7762_v58  ;;  %v7779_v58 = vld [vmem:[#allocation4 + $0x604] ss:$8 sps:$4 sm:$0xff]  }
 0x31e   :  { %2748 = vmatmul.mubr.bf16.gmra.mrb[40].mxu1 %v9004_v52 }
 0x31f   :  { %2757 = vmatprep.mubr.bf16.mxu1 %v9020_v38  ;;  %3025 = vmatpush1.bf16.msra.mxu1 %v7639_v51  ;;  %v7770_v51 = vld [vmem:[#allocation4 + $0x504] ss:$8 sps:$4 sm:$0xff]  }
 0x320   :  { %3026 = vmatprep.subr.bf16.mxu1 %v7644_v59  ;;  %v7681_v59 = vld [vmem:[#allocation4 + $0x3a0] ss:$8 sps:$4 sm:$0xff]   ;;  %3725 = vmatprep.subr.bf16.mxu0 %v7770_v51  ;;  %v7783_v51 = vld [vmem:[#allocation4 + $0x610] ss:$8 sps:$4 sm:$0xff]  }
 0x323   :  { %3027 = vmatpush1.bf16.msra.mxu1 %v7642_v13  ;;  %v7686_v13 = vld [vmem:[#allocation4 + $0x3b4] ss:$8 sps:$4 sm:$0xff]  }
 0x324   :  { %3028 = vmatprep.subr.bf16.mxu1 %v7647_v22  ;;  %v7768_v22 = vld [vmem:[#allocation4 + $0x500] ss:$8 sps:$4 sm:$0xff]  }
 0x325   :  { %3726 = vmatpush1.bf16.msra.mxu0 %v7768_v22  ;;  %v7794_v22 = vld [vmem:[#allocation4 + $0x544] ss:$8 sps:$4 sm:$0xff]  }
 0x326   :  { %2758 = vmatmul.mubr.bf16.gmra.mrb[44].mxu1 %v9018_v37 }
 0x327   :  { %2767 = vmatprep.mubr.bf16.mxu1 %v9034_v4  ;;  %3029 = vmatpush1.bf16.msra.mxu1 %v7645_v53  ;;  %v7684_v53 = vld [vmem:[#allocation4 + $0x3b0] ss:$8 sps:$4 sm:$0xff]  }
 0x328   :  { %3030 = vmatprep.subr.bf16.mxu1 %v7650_v23  ;;  %v7689_v23 = vld [vmem:[#allocation4 + $0x3c4] ss:$8 sps:$4 sm:$0xff]  }
 0x32b   :  { %3031 = vmatpush1.bf16.msra.mxu1 %v7648_v55  ;;  %v7774_v55 = vld [vmem:[#allocation4 + $0x510] ss:$8 sps:$4 sm:$0xff]  }
 0x32c   :  { %3032 = vmatprep.subr.bf16.mxu1 %v7653_v6  ;;  %v7782_v6 = vld [vmem:[#allocation4 + $0x524] ss:$8 sps:$4 sm:$0xff]  }
 0x32e   :  { %2768 = vmatmul.mubr.bf16.gmra.mrb[48].mxu1 %v9032_v49 }
 0x32f   :  { %2777 = vmatprep.mubr.bf16.mxu1 %v9049_v31  ;;  %3033 = vmatpush1.bf16.msra.mxu1 %v7651_v14  ;;  %v7687_v14 = vld [vmem:[#allocation4 + $0x3c0] ss:$8 sps:$4 sm:$0xff]  }
 0x330   :  { %3034 = vmatprep.subr.bf16.mxu1 %v7656_v56  ;;  %v7692_v56 = vld [vmem:[#allocation4 + $0x3d4] ss:$8 sps:$4 sm:$0xff]  }
 0x333   :  { %3035 = vmatpush1.bf16.msra.mxu1 %v7654_v15  ;;  %v7780_v15 = vld [vmem:[#allocation4 + $0x520] ss:$8 sps:$4 sm:$0xff]  }
 0x334   :  { %3036 = vmatprep.subr.bf16.mxu1 %v7659_v7  ;;  %v7690_v7 = vld [vmem:[#allocation4 + $0x3d0] ss:$8 sps:$4 sm:$0xff]  }
 0x336   :  { %2778 = vmatmul.mubr.bf16.gmra.mrb[52].mxu1 %v9047_v3 }
 0x337   :  { %3037 = vmatpush1.bf16.msra.mxu1 %v7657_v57  ;;  %3048 = vmatprep.mubr.bf16.mxu1 %v8992_v39  ;;  %v7671_v39 = vld [vmem:[#allocation4 + $0x364] ss:$8 sps:$4 sm:$0xff]  }
 0x338   :  { %3038 = vmatprep.subr.bf16.mxu1 %v7662_v60  ;;  %v7695_v57 = vld [vmem:[#allocation4 + $0x3e4] ss:$8 sps:$4 sm:$0xff]   ;;  %v7693_v60 = vld [vmem:[#allocation4 + $0x3e0] ss:$8 sps:$4 sm:$0xff]  }
 0x33b   :  { %3039 = vmatpush1.bf16.msra.mxu1 %v7660_v24  ;;  %v7701_v24 = vld [vmem:[#allocation4 + $0x404] ss:$8 sps:$4 sm:$0xff]  }
 0x33c   :  { %3040 = vmatprep.subr.bf16.mxu1 %v7665_v29  ;;  %v7704_v29 = vld [vmem:[#allocation4 + $0x414] ss:$8 sps:$4 sm:$0xff]  }
 0x33f   :  { %3041 = vmatpush1.bf16.msra.mxu1 %v7663_v36  ;;  %v7705_v36 = vld [vmem:[#allocation4 + $0x420] ss:$8 sps:$4 sm:$0xff]  }
 0x340   :  { %3042 = vmatprep.subr.bf16.mxu1 %v7668_v16  ;;  %v7710_v16 = vld [vmem:[#allocation4 + $0x434] ss:$8 sps:$4 sm:$0xff]  }
 0x343   :  { %3043 = vmatpush1.bf16.msra.mxu1 %v7666_v8  ;;  %v7711_v8 = vld [vmem:[#allocation4 + $0x440] ss:$8 sps:$4 sm:$0xff]  }
 0x344   :  { %3044 = vmatprep.subr.bf16.mxu1 %v7671_v39  ;;  %v7716_v39 = vld [vmem:[#allocation4 + $0x454] ss:$8 sps:$4 sm:$0xff]  }
 0x347   :  { %3045 = vmatpush1.bf16.msra.mxu1 %v7669_v40  ;;  %v7717_v40 = vld [vmem:[#allocation4 + $0x460] ss:$8 sps:$4 sm:$0xff]  }
 0x348   :  { %3046 = vmatprep.subr.bf16.mxu1 %v7674_v17  ;;  %v7722_v17 = vld [vmem:[#allocation4 + $0x474] ss:$8 sps:$4 sm:$0xff]  }
 0x34b   :  { %3047 = vmatpush1.bf16.msra.mxu1 %v7672_v1  ;;  %v7737_v1 = vld [vmem:[#allocation4 + $0x594] ss:$8 sps:$4 sm:$0xff]  }
 0x34c   :  { %3337 = vmatprep.subr.bf16.mxu1 %v7677_v10  ;;  %v7735_v10 = vld [vmem:[#allocation4 + $0x590] ss:$8 sps:$4 sm:$0xff]  }
 0x34e   :  { %3049 = vmatmul.mubr.bf16.vlgmr.msra.gmra.mrb[32].mxu1 %v8990_v61  ;;  %v7776_v61 = vld [vmem:[#allocation4 + $0x514] ss:$8 sps:$4 sm:$0xff]  }
 0x34f   :  { %3058 = vmatprep.mubr.bf16.mxu1 %v9006_v5  ;;  %3338 = vmatpush1.bf16.msra.mxu1 %v7675_v47  ;;  %v7749_v47 = vld [vmem:[#allocation4 + $0x5b4] ss:$8 sps:$4 sm:$0xff]  }
 0x350   :  { %3339 = vmatprep.subr.bf16.mxu1 %v7680_v48  ;;  %3727 = vmatprep.subr.bf16.mxu0 %v7776_v61  ;;  %v7747_v48 = vld [vmem:[#allocation4 + $0x5b0] ss:$8 sps:$4 sm:$0xff]  }
 0x351   :  { %3728 = vmatpush1.bf16.msra.mxu0 %v7774_v55  ;;  %v7798_v61 = vld [vmem:[#allocation4 + $0x550] ss:$8 sps:$4 sm:$0xff]  }
 0x352   :  { %3729 = vmatprep.subr.bf16.mxu0 %v7782_v6  ;;  %v7807_v55 = vld [vmem:[#allocation4 + $0x650] ss:$8 sps:$4 sm:$0xff]   ;;  %v7812_v6 = vld [vmem:[#allocation4 + $0x574] ss:$8 sps:$4 sm:$0xff]  }
 0x353   :  { %3340 = vmatpush1.bf16.msra.mxu1 %v7678_v12  ;;  %v7767_v12 = vld [vmem:[#allocation4 + $0x5e4] ss:$8 sps:$4 sm:$0xff]  }
 0x354   :  { %3341 = vmatprep.subr.bf16.mxu1 %v7683_v21  ;;  %v7771_v21 = vld [vmem:[#allocation4 + $0x5f0] ss:$8 sps:$4 sm:$0xff]  }
 0x355   :  { %3730 = vmatpush1.bf16.msra.mxu0 %v7780_v15  ;;  %v7813_v15 = vld [vmem:[#allocation4 + $0x660] ss:$8 sps:$4 sm:$0xff]  }
 0x356   :  { %3059 = vmatmul.mubr.bf16.gmra.mrb[36].mxu1 %v9004_v52 }
 0x357   :  { %3068 = vmatprep.mubr.bf16.mxu1 %v9020_v38  ;;  %3342 = vmatpush1.bf16.msra.mxu1 %v7681_v59  ;;  %v7791_v59 = vld [vmem:[#allocation4 + $0x624] ss:$8 sps:$4 sm:$0xff]  }
 0x358   :  { %3343 = vmatprep.subr.bf16.mxu1 %v7686_v13  ;;  %v7789_v13 = vld [vmem:[#allocation4 + $0x620] ss:$8 sps:$4 sm:$0xff]  }
 0x35b   :  { %3344 = vmatpush1.bf16.msra.mxu1 %v7684_v53  ;;  %v7804_v53 = vld [vmem:[#allocation4 + $0x560] ss:$8 sps:$4 sm:$0xff]  }
 0x35c   :  { %3345 = vmatprep.subr.bf16.mxu1 %v7689_v23  ;;  %v7809_v23 = vld [vmem:[#allocation4 + $0x654] ss:$8 sps:$4 sm:$0xff]  }
 0x35e   :  { %3069 = vmatmul.mubr.bf16.gmra.mrb[40].mxu1 %v9018_v37 }
 0x35f   :  { %3078 = vmatprep.mubr.bf16.mxu1 %v9034_v4  ;;  %3346 = vmatpush1.bf16.msra.mxu1 %v7687_v14  ;;  %v7810_v14 = vld [vmem:[#allocation4 + $0x570] ss:$8 sps:$4 sm:$0xff]  }
 0x360   :  { %3347 = vmatprep.subr.bf16.mxu1 %v7692_v56  ;;  %v7815_v56 = vld [vmem:[#allocation4 + $0x664] ss:$8 sps:$4 sm:$0xff]  }
 0x363   :  { %3348 = vmatpush1.bf16.msra.mxu1 %v7690_v7  ;;  %v7818_v7 = vld [vmem:[#allocation4 + $0x674] ss:$8 sps:$4 sm:$0xff]  }
 0x364   :  { %3349 = vmatprep.subr.bf16.mxu1 %v7695_v57  ;;  %v7816_v57 = vld [vmem:[#allocation4 + $0x670] ss:$8 sps:$4 sm:$0xff]  }
 0x366   :  { %3079 = vmatmul.mubr.bf16.gmra.mrb[44].mxu1 %v9032_v49 }
 0x367   :  { %3088 = vmatprep.mubr.bf16.mxu1 %v9049_v31  ;;  %3350 = vmatpush1.bf16.msra.mxu1 %v7693_v60  ;;  %v7821_v60 = vld [vmem:[#allocation4 + $0x684] ss:$8 sps:$4 sm:$0xff]  }
 0x368   :  { %3351 = vmatprep.subr.bf16.mxu1 %v7698_v62  ;;  %v2226_v62 = vld [vmem:[#allocation6 + $0x1] ss:$8 sm:$0x3] }
 0x36b   :  { %3352 = vmatpush1.bf16.msra.mxu1 %v7696_v54  ;;  %v9107_v54 = vrot.slane %v2226_v62, %v8940_v30 }
 0x36c   :  { %3353 = vmatprep.subr.bf16.mxu1 %v7701_v24  ;;  %v9110_v24 = vrot.slane %v2226_v62, %v8942_v32 }
 0x36e   :  { %3089 = vmatmul.mubr.bf16.gmra.mrb[48].mxu1 %v9047_v3 }
 0x36f   :  { %3098 = vmatprep.mubr.bf16.mxu1 %v9053_v18  ;;  %3354 = vmatpush1.bf16.msra.mxu1 %v7699_v28 }
 0x370   :  { %3355 = vmatprep.subr.bf16.mxu1 %v7704_v29 }
 0x373   :  { %3356 = vmatpush1.bf16.msra.mxu1 %v7702_v25 }
 0x374   :  { %3357 = vmatprep.subr.bf16.mxu1 %v7707_v35 }
 0x376   :  { %3099 = vmatmul.mubr.bf16.gmra.mrb[52].mxu1 %v9051_v63 }
 0x377   :  { %3358 = vmatpush1.bf16.msra.mxu1 %v7705_v36  ;;  %3369 = vmatprep.mubr.bf16.mxu1 %v9006_v5  ;;  %v7729_v5 = vld [vmem:[#allocation4 + $0x580] ss:$8 sps:$4 sm:$0xff]  }
 0x378   :  { %3359 = vmatprep.subr.bf16.mxu1 %v7710_v16 }
 0x37b   :  { %3360 = vmatpush1.bf16.msra.mxu1 %v7708_v26 }
 0x37c   :  { %3361 = vmatprep.subr.bf16.mxu1 %v7713_v33 }
 0x37f   :  { %3362 = vmatpush1.bf16.msra.mxu1 %v7711_v8 }
 0x380   :  { %3363 = vmatprep.subr.bf16.mxu1 %v7716_v39 }
 0x383   :  { %3364 = vmatpush1.bf16.msra.mxu1 %v7714_v27 }
 0x384   :  { %3365 = vmatprep.subr.bf16.mxu1 %v7719_v34 }
 0x387   :  { %3366 = vmatpush1.bf16.msra.mxu1 %v7717_v40 }
 0x388   :  { %3367 = vmatprep.subr.bf16.mxu1 %v7722_v17 }
 0x38b   :  { %3368 = vmatpush1.bf16.msra.mxu1 %v7720_v9 }
 0x38c   :  { %3946 = vmatprep.subr.bf16.mxu1 %v7731_v41 }
 0x38e   :  { %3370 = vmatmul.mubr.bf16.vlgmr.msra.gmra.mrb[32].mxu1 %v9004_v52  ;;  %v7753_v52 = vld [vmem:[#allocation4 + $0x5c0] ss:$8 sps:$4 sm:$0xff]  }
 0x38f   :  { %3379 = vmatprep.mubr.bf16.mxu1 %v9020_v38  ;;  %3947 = vmatpush1.bf16.msra.mxu1 %v7729_v5  ;;  %v7761_v38 = vld [vmem:[#allocation4 + $0x5d4] ss:$8 sps:$4 sm:$0xff]  }
 0x390   :  { %3948 = vmatprep.subr.bf16.mxu1 %v7737_v1 }
 0x393   :  { %3949 = vmatpush1.bf16.msra.mxu1 %v7735_v10 }
 0x394   :  { %3950 = vmatprep.subr.bf16.mxu1 %v7743_v11 }
 0x396   :  { %3380 = vmatmul.mubr.bf16.gmra.mrb[36].mxu1 %v9018_v37  ;;  %v7765_v37 = vld [vmem:[#allocation4 + $0x5e0] ss:$8 sps:$4 sm:$0xff]  }
 0x397   :  { %3389 = vmatprep.mubr.bf16.mxu1 %v9034_v4  ;;  %3951 = vmatpush1.bf16.msra.mxu1 %v7741_v45  ;;  %v7773_v4 = vld [vmem:[#allocation4 + $0x5f4] ss:$8 sps:$4 sm:$0xff]  }
 0x398   :  { %3952 = vmatprep.subr.bf16.mxu1 %v7749_v47 }
 0x39b   :  { %3953 = vmatpush1.bf16.msra.mxu1 %v7747_v48 }
 0x39c   :  { %3954 = vmatprep.subr.bf16.mxu1 %v7755_v20 }
 0x39e   :  { %3390 = vmatmul.mubr.bf16.gmra.mrb[40].mxu1 %v9032_v49  ;;  %v7777_v49 = vld [vmem:[#allocation4 + $0x600] ss:$8 sps:$4 sm:$0xff]  }
 0x39f   :  { %3399 = vmatprep.mubr.bf16.mxu1 %v9049_v31  ;;  %3955 = vmatpush1.bf16.msra.mxu1 %v7753_v52  ;;  %v7785_v31 = vld [vmem:[#allocation4 + $0x614] ss:$8 sps:$4 sm:$0xff]  }
 0x3a0   :  { %3956 = vmatprep.subr.bf16.mxu1 %v7761_v38 }
 0x3a3   :  { %3957 = vmatpush1.bf16.msra.mxu1 %v7759_v50 }
 0x3a4   :  { %3958 = vmatprep.subr.bf16.mxu1 %v7767_v12 }
 0x3a6   :  { %3400 = vmatmul.mubr.bf16.gmra.mrb[44].mxu1 %v9047_v3  ;;  %v7788_v3 = vld [vmem:[#allocation4 + $0x534] ss:$8 sps:$4 sm:$0xff]  }
 0x3a7   :  { %3409 = vmatprep.mubr.bf16.mxu1 %v9053_v18  ;;  %3959 = vmatpush1.bf16.msra.mxu1 %v7765_v37  ;;  %v7786_v18 = vld [vmem:[#allocation4 + $0x530] ss:$8 sps:$4 sm:$0xff]  }
 0x3a8   :  { %3960 = vmatprep.subr.bf16.mxu1 %v7773_v4  ;;  %3731 = vmatprep.subr.bf16.mxu0 %v7788_v3 }
 0x3a9   :  { %3732 = vmatpush1.bf16.msra.mxu0 %v7786_v18 }
 0x3aa   :  { %3733 = vmatprep.subr.bf16.mxu0 %v7794_v22  ;;  %v7819_v22 = vld [vmem:[#allocation4 + $0x680] ss:$8 sps:$4 sm:$0xff]  }
 0x3ab   :  { %3961 = vmatpush1.bf16.msra.mxu1 %v7771_v21 }
 0x3ac   :  { %3962 = vmatprep.subr.bf16.mxu1 %v7779_v58 }
 0x3ae   :  { %3410 = vmatmul.mubr.bf16.gmra.mrb[48].mxu1 %v9051_v63  ;;  %v7792_v63 = vld [vmem:[#allocation4 + $0x540] ss:$8 sps:$4 sm:$0xff]  }
 0x3af   :  { %3419 = vmatprep.mubr.bf16.mxu1 %v2162_v46  ;;  %3963 = vmatpush1.bf16.msra.mxu1 %v7777_v49  ;;  %v7800_v46 = vld [vmem:[#allocation4 + $0x554] ss:$8 sps:$4 sm:$0xff]  }
 0x3b0   :  { %3964 = vmatprep.subr.bf16.mxu1 %v7785_v31  ;;  %3734 = vmatpush1.bf16.msra.mxu0 %v7792_v63 }
 0x3b1   :  { %3735 = vmatprep.subr.bf16.mxu0 %v7800_v46 }
 0x3b3   :  { %3965 = vmatpush1.bf16.msra.mxu1 %v7783_v51 }
 0x3b4   :  { %3966 = vmatprep.subr.bf16.mxu1 %v7791_v59  ;;  %3736 = vmatpush1.bf16.msra.mxu0 %v7798_v61 }
 0x3b6   :  { %3420 = vmatmul.mubr.bf16.gmra.mrb[52].mxu1 %v2161_v44  ;;  %v7806_v44 = vld [vmem:[#allocation4 + $0x564] ss:$8 sps:$4 sm:$0xff]  }
 0x3b7   :  { %3967 = vmatpush1.bf16.msra.mxu1 %v7789_v13  ;;  %3737 = vmatprep.subr.bf16.mxu0 %v7806_v44  ;;  %v7822_v44 = vld [vmem:[#allocation4 + $0x690] ss:$8 sps:$4 sm:$0xff]  }
 0x3b8   :  { %3968 = vmatprep.subr.bf16.mxu1 %v7797_v2  ;;  %3738 = vmatpush1.bf16.msra.mxu0 %v7804_v53 }
 0x3b9   :  { %3739 = vmatprep.subr.bf16.mxu0 %v7812_v6 }
 0x3bb   :  { %3969 = vmatpush1.bf16.msra.mxu1 %v7795_v43  ;;  %v7824_v43 = vld [vmem:[#allocation4 + $0x694] ss:$8 sps:$4 sm:$0xff]  }
 0x3bc   :  { %3970 = vmatprep.subr.bf16.mxu1 %v7803_v19  ;;  %3740 = vmatpush1.bf16.msra.mxu0 %v7810_v14 }
 0x3bf   :  { %3971 = vmatpush1.bf16.msra.mxu1 %v7801_v42 }
 0x3c0   :  { %3972 = vmatprep.subr.bf16.mxu1 %v7809_v23  ;;  %v7827_v23 = vld [vmem:[#allocation4 + $0x6a4] ss:$8 sps:$4 sm:$0xff]  }
 0x3c3   :  { %3973 = vmatpush1.bf16.msra.mxu1 %v7807_v55 }
 0x3c4   :  { %3974 = vmatprep.subr.bf16.mxu1 %v7815_v56 }
 0x3c7   :  { %3975 = vmatpush1.bf16.msra.mxu1 %v7813_v15 }
 0x3c8   :  { %3976 = vmatprep.subr.bf16.mxu1 %v7818_v7 }
 0x3cb   :  { %3977 = vmatpush1.bf16.msra.mxu1 %v7816_v57  ;;  %v7825_v57 = vld [vmem:[#allocation4 + $0x6a0] ss:$8 sps:$4 sm:$0xff]  }
 0x3cc   :  { %4187 = vmatprep.subr.bf16.mxu1 %v7821_v60 }
 0x461   :  { %v3371_v28 = vpop.f32.mrb[32].mxu1 }
 0x462   :  { %v7082_v29 = vadd.f32 %v3371_v28, %v9107_v54  ;;  %v3373_v25 = vpop.f32.mrb[33].mxu1 }
 0x463   :  { %v7083_v35 = vadd.f32 %v3373_v25, %v9110_v24  ;;  %v3375_v36 = vpop.f32.mrb[34].mxu1 }
 0x464   :  { %8330 = vtanh.f32 %v7082_v29  ;;  %v7084_v16 = vadd.f32 %v3375_v36, %v9107_v54  ;;  %v3377_v26 = vpop.f32.mrb[35].mxu1  ;;  %v7830_v29 = vld [vmem:[#allocation4 + $0x6b4] ss:$8 sps:$4 sm:$0xff]  }
 0x465   :  { %8332 = vtanh.f32 %v7083_v35  ;;  %v7085_v33 = vadd.f32 %v3377_v26, %v9110_v24  ;;  %v7828_v26 = vld [vmem:[#allocation4 + $0x6b0] ss:$8 sps:$4 sm:$0xff]  }
 0x466   :  { %8334 = vtanh.f32 %v7084_v16 }
 0x467   :  { %8336 = vtanh.f32 %v7085_v33 }
 0x469   :  { %v3381_v8 = vpop.f32.mrb[36].mxu1 }
 0x46a   :  { %v7086_v39 = vadd.f32 %v3381_v8, %v9107_v54  ;;  %v3383_v27 = vpop.f32.mrb[37].mxu1  ;;  %v7833_v8 = vld [vmem:[#allocation4 + $0x6c4] ss:$8 sps:$4 sm:$0xff]  }
 0x46b   :  { %v7087_v34 = vadd.f32 %v3383_v27, %v9110_v24  ;;  %v3385_v40 = vpop.f32.mrb[38].mxu1 }
 0x46c   :  { %8338 = vtanh.f32 %v7086_v39  ;;  %v7088_v17 = vadd.f32 %v3385_v40, %v9107_v54  ;;  %v3387_v9 = vpop.f32.mrb[39].mxu1 }
 0x46d   :  { %8340 = vtanh.f32 %v7087_v34  ;;  %v7089_v41 = vadd.f32 %v3387_v9, %v9110_v24 }
 0x46e   :  { %v8331_v5 = vpop.eup %8330  ;;  %8342 = vtanh.f32 %v7088_v17 }
 0x46f   :  { %v8333_v1 = vpop.eup %8332  ;;  %8344 = vtanh.f32 %v7089_v41  ;;  %v7831_v41 = vld [vmem:[#allocation4 + $0x6c0] ss:$8 sps:$4 sm:$0xff]  }
 0x470   :  { %v8335_v10 = vpop.eup %8334 }
 0x471   :  { %v8337_v11 = vpop.eup %8336  ;;  %v3391_v45 = vpop.f32.mrb[40].mxu1  ;;  %v3478_v47 = vpack.c.bf16 %v8335_v10, %v8331_v5 }
 0x472   :  { %v7090_v48 = vadd.f32 %v3391_v45, %v9107_v54  ;;  %v3393_v20 = vpop.f32.mrb[41].mxu1  ;;  %v3479_v52 = vpack.c.bf16 %v8337_v11, %v8333_v1  ;;  %v7836_v11 = vld [vmem:[#allocation4 + $0x6d4] ss:$8 sps:$4 sm:$0xff]  }
 0x473   :  { %v7091_v38 = vadd.f32 %v3393_v20, %v9110_v24  ;;  %v3395_v50 = vpop.f32.mrb[42].mxu1 }
 0x474   :  { %8346 = vtanh.f32 %v7090_v48  ;;  %v7092_v12 = vadd.f32 %v3395_v50, %v9107_v54  ;;  %v3397_v37 = vpop.f32.mrb[43].mxu1  ;;  %3741 = vmatprep.mubr.bf16.mxu0 %v3479_v52  ;;  %v7834_v52 = vld [vmem:[#allocation4 + $0x6d0] ss:$8 sps:$4 sm:$0xff]   ;;  %v7839_v50 = vld [vmem:[#allocation4 + $0x6e4] ss:$8 sps:$4 sm:$0xff]  }
 0x475   :  { %8348 = vtanh.f32 %v7091_v38  ;;  %v7093_v4 = vadd.f32 %v3397_v37, %v9110_v24  ;;  %3742 = vmatmul.mubr.bf16.vlgmr.msra.gmra.mrb[36].mxu0 %v3478_v47 }
 0x476   :  { %v8339_v21 = vpop.eup %8338  ;;  %8350 = vtanh.f32 %v7092_v12  ;;  %5104 = vmatprep.mubr.bf16.mxu0 %v8470_v0 }
 0x477   :  { %v8341_v58 = vpop.eup %8340  ;;  %8352 = vtanh.f32 %v7093_v4  ;;  %v7837_v4 = vld [vmem:[#allocation4 + $0x6e0] ss:$8 sps:$4 sm:$0xff]  }
 0x478   :  { %v8343_v49 = vpop.eup %8342 }
 0x479   :  { %v8345_v31 = vpop.eup %8344  ;;  %v3401_v51 = vpop.f32.mrb[44].mxu1  ;;  %v3480_v3 = vpack.c.bf16 %v8343_v49, %v8339_v21  ;;  %v7842_v21 = vld [vmem:[#allocation4 + $0x6f4] ss:$8 sps:$4 sm:$0xff]   ;;  %v7840_v49 = vld [vmem:[#allocation4 + $0x6f0] ss:$8 sps:$4 sm:$0xff]  }
 0x47a   :  { %v7094_v18 = vadd.f32 %v3401_v51, %v9107_v54  ;;  %v3403_v59 = vpop.f32.mrb[45].mxu1  ;;  %v3481_v13 = vpack.c.bf16 %v8345_v31, %v8341_v58  ;;  %v7845_v51 = vld [vmem:[#allocation4 + $0x704] ss:$8 sps:$4 sm:$0xff]  }
 0x47b   :  { %v7095_v63 = vadd.f32 %v3403_v59, %v9110_v24  ;;  %v3405_v2 = vpop.f32.mrb[46].mxu1 }
 0x47c   :  { %8354 = vtanh.f32 %v7094_v18  ;;  %v7096_v46 = vadd.f32 %v3405_v2, %v9107_v54  ;;  %v3407_v61 = vpop.f32.mrb[47].mxu1  ;;  %3978 = vmatprep.mubr.bf16.mxu1 %v3481_v13  ;;  %v7843_v13 = vld [vmem:[#allocation4 + $0x700] ss:$8 sps:$4 sm:$0xff]   ;;  %v7846_v2 = vld [vmem:[#allocation4 + $0x710] ss:$8 sps:$4 sm:$0xff]  }
 0x47d   :  { %8356 = vtanh.f32 %v7095_v63  ;;  %v7097_v19 = vadd.f32 %v3407_v61, %v9110_v24  ;;  %3979 = vmatmul.mubr.bf16.vlgmr.msra.gmra.mrb[56].mxu1 %v3480_v3  ;;  %v7848_v63 = vld [vmem:[#allocation4 + $0x714] ss:$8 sps:$4 sm:$0xff]  }
 0x47e   :  { %v9129_v42 = vpop.eup %8346  ;;  %8358 = vtanh.f32 %v7096_v46  ;;  %4188 = vmatpush1.bf16.msra.mxu1 %v7819_v22  ;;  %v7849_v46 = vld [vmem:[#allocation4 + $0x720] ss:$8 sps:$4 sm:$0xff]   ;;  %v7854_v61 = vld [vmem:[#allocation4 + $0x734] ss:$8 sps:$4 sm:$0xff]  }
 0x47f   :  { %v8349_v53 = vpop.eup %8348  ;;  %8360 = vtanh.f32 %v7097_v19  ;;  %4189 = vmatprep.subr.bf16.mxu1 %v7824_v43  ;;  %v7851_v43 = vld [vmem:[#allocation4 + $0x724] ss:$8 sps:$4 sm:$0xff]   ;;  %v7852_v19 = vld [vmem:[#allocation4 + $0x730] ss:$8 sps:$4 sm:$0xff]  }
 0x480   :  { %v9131_v55 = vpop.eup %8350 }
 0x481   :  { %v8353_v6 = vpop.eup %8352  ;;  %v3411_v14 = vpop.f32.mrb[48].mxu1  ;;  %v3482_v56 = vpack.c.bf16 %v9131_v55, %v9129_v42  ;;  %v7878_v42 = vld [vmem:[#allocation4 + $0x7b4] ss:$8 sps:$4 sm:$0xff]   ;;  %v7876_v55 = vld [vmem:[#allocation4 + $0x7b0] ss:$8 sps:$4 sm:$0xff]  }
 0x482   :  { %v7098_v15 = vadd.f32 %v3411_v14, %v9107_v54  ;;  %4190 = vmatpush1.bf16.msra.mxu1 %v7822_v44  ;;  %v3413_v7 = vpop.f32.mrb[49].mxu1  ;;  %v3483_v60 = vpack.c.bf16 %v8353_v6, %v8349_v53  ;;  %v7857_v44 = vld [vmem:[#allocation4 + $0x744] ss:$8 sps:$4 sm:$0xff]   ;;  %v7855_v53 = vld [vmem:[#allocation4 + $0x740] ss:$8 sps:$4 sm:$0xff]  }
 0x483   :  { %v7099_v62 = vadd.f32 %v3413_v7, %v9110_v24  ;;  %v3415_v28 = vpop.f32.mrb[50].mxu1  ;;  %4191 = vmatprep.subr.bf16.mxu1 %v7827_v23  ;;  %v7860_v23 = vld [vmem:[#allocation4 + $0x754] ss:$8 sps:$4 sm:$0xff]   ;;  %v7858_v6 = vld [vmem:[#allocation4 + $0x750] ss:$8 sps:$4 sm:$0xff]  }
 0x484   :  { %8362 = vtanh.f32 %v7098_v15  ;;  %v7100_v25 = vadd.f32 %v3415_v28, %v9107_v54  ;;  %v3417_v35 = vpop.f32.mrb[51].mxu1  ;;  %4219 = vmatprep.mubr.bf16.mxu1 %v3483_v60  ;;  %v7863_v14 = vld [vmem:[#allocation4 + $0x764] ss:$8 sps:$4 sm:$0xff]   ;;  %v7861_v15 = vld [vmem:[#allocation4 + $0x760] ss:$8 sps:$4 sm:$0xff]  }
 0x485   :  { %8364 = vtanh.f32 %v7099_v62  ;;  %v7101_v36 = vadd.f32 %v3417_v35, %v9110_v24  ;;  %v7866_v7 = vld [vmem:[#allocation4 + $0x774] ss:$8 sps:$4 sm:$0xff]   ;;  %v7869_v60 = vld [vmem:[#allocation4 + $0x784] ss:$8 sps:$4 sm:$0xff]   ;;  %v7867_v62 = vld [vmem:[#allocation4 + $0x780] ss:$8 sps:$4 sm:$0xff]  }
 0x486   :  { %v9139_v16 = vpop.eup %8354  ;;  %8366 = vtanh.f32 %v7100_v25  ;;  %4192 = vmatpush1.bf16.msra.mxu1 %v7825_v57  ;;  %v7864_v57 = vld [vmem:[#allocation4 + $0x770] ss:$8 sps:$4 sm:$0xff]   ;;  %v7872_v28 = vld [vmem:[#allocation4 + $0x794] ss:$8 sps:$4 sm:$0xff]  }
 0x487   :  { %v9141_v33 = vpop.eup %8356  ;;  %8368 = vtanh.f32 %v7101_v36  ;;  %4193 = vmatprep.subr.bf16.mxu1 %v7830_v29  ;;  %v7968_v29 = vld [vmem:[#allocation4 + $0xa94] ss:$8 sps:$4 sm:$0xff]   ;;  %v7966_v25 = vld [vmem:[#allocation4 + $0xa90] ss:$8 sps:$4 sm:$0xff]   ;;  %v7875_v36 = vld [vmem:[#allocation4 + $0x7a4] ss:$8 sps:$4 sm:$0xff]  }
 0x488   :  { %v9143_v39 = vpop.eup %8358  ;;  %v7870_v35 = vld [vmem:[#allocation4 + $0x790] ss:$8 sps:$4 sm:$0xff]   ;;  %5072 = vmatprep.subr.bf16.mxu0 %v7968_v29 }
 0x489   :  { %v9145_v27 = vpop.eup %8360  ;;  %v3421_v34 = vpop.f32.mrb[52].mxu1  ;;  %v3484_v40 = vpack.c.bf16 %v9143_v39, %v9139_v16  ;;  %5073 = vmatpush1.bf16.msra.mxu0 %v7966_v25  ;;  %v7929_v16 = vld [vmem:[#allocation4 + $0x8c4] ss:$8 sps:$4 sm:$0xff]   ;;  %v8021_v39 = vld [vmem:[#allocation4 + $0xbb0] ss:$8 sps:$4 sm:$0xff]  }
 0x48a   :  { %v7102_v17 = vadd.f32 %v3421_v34, %v9107_v54  ;;  %4194 = vmatpush1.bf16.msra.mxu1 %v7828_v26  ;;  %v3423_v9 = vpop.f32.mrb[53].mxu1  ;;  %v3485_v5 = vpack.c.bf16 %v9145_v27, %v9141_v33  ;;  %v9188_v26 = vld [vmem:[%s9265_s1] sm:$0xff]   ;;  %v7884_v27 = vld [vmem:[#allocation4 + $0x7d4] ss:$8 sps:$4 sm:$0xff]   ;;  %v7882_v34 = vld [vmem:[#allocation4 + $0x7d0] ss:$8 sps:$4 sm:$0xff]  }
 0x48b   :  { %v7103_v1 = vadd.f32 %v3423_v9, %v9110_v24  ;;  %v3425_v10 = vpop.f32.mrb[54].mxu1  ;;  %4195 = vmatprep.subr.bf16.mxu1 %v7833_v8  ;;  %v7873_v8 = vld [vmem:[#allocation4 + $0x7a0] ss:$8 sps:$4 sm:$0xff]   ;;  %v8027_v29 = vld [vmem:[#allocation4 + $0xbd0] ss:$8 sps:$4 sm:$0xff]  }
 0x48c   :  { %8370 = vtanh.f32 %v7102_v17  ;;  %v7104_v45 = vadd.f32 %v3425_v10, %v9107_v54  ;;  %v3427_v47 = vpop.f32.mrb[55].mxu1  ;;  %6851 = vmatmul.mubr.msk.bf16.vlgmr.msra.gmra.mrb[40].mxu0 %vm131_vm0, %v9188_v26  ;;  %v7879_v33 = vld [vmem:[#allocation4 + $0x7c0] ss:$8 sps:$4 sm:$0xff]   ;;  %v7887_v17 = vld [vmem:[#allocation4 + $0x7e4] ss:$8 sps:$4 sm:$0xff]  }
 0x48d   :  { %8372 = vtanh.f32 %v7103_v1  ;;  %v7105_v48 = vadd.f32 %v3427_v47, %v9110_v24  ;;  %v7885_v9 = vld [vmem:[#allocation4 + $0x7e0] ss:$8 sps:$4 sm:$0xff]   ;;  %v7893_v1 = vld [vmem:[#allocation4 + $0x804] ss:$8 sps:$4 sm:$0xff]  }
 0x48e   :  { %v9155_v20 = vpop.eup %8362  ;;  %8374 = vtanh.f32 %v7104_v45  ;;  %4196 = vmatpush1.bf16.msra.mxu1 %v7831_v41  ;;  %v7890_v41 = vld [vmem:[#allocation4 + $0x7f4] ss:$8 sps:$4 sm:$0xff]   ;;  %v7891_v10 = vld [vmem:[#allocation4 + $0x800] ss:$8 sps:$4 sm:$0xff]   ;;  %v7894_v45 = vld [vmem:[#allocation4 + $0x810] ss:$8 sps:$4 sm:$0xff]  }
 0x48f   :  { %v9157_v38 = vpop.eup %8364  ;;  %8376 = vtanh.f32 %v7105_v48  ;;  %4197 = vmatprep.subr.bf16.mxu1 %v7836_v11  ;;  %v7896_v11 = vld [vmem:[#allocation4 + $0x814] ss:$8 sps:$4 sm:$0xff]   ;;  %v7899_v47 = vld [vmem:[#allocation4 + $0x824] ss:$8 sps:$4 sm:$0xff]   ;;  %v7897_v48 = vld [vmem:[#allocation4 + $0x820] ss:$8 sps:$4 sm:$0xff]  }
 0x490   :  { %v9159_v12 = vpop.eup %8366  ;;  %v8032_v25 = vld [vmem:[#allocation4 + $0xbe4] ss:$8 sps:$4 sm:$0xff]  }
 0x491   :  { %v9161_v37 = vpop.eup %8368  ;;  %v3486_v54 = vpack.c.bf16 %v9159_v12, %v9155_v20  ;;  %v7976_v20 = vld [vmem:[#allocation4 + $0x9b0] ss:$8 sps:$4 sm:$0xff]   ;;  %v7981_v12 = vld [vmem:[#allocation4 + $0x9c4] ss:$8 sps:$4 sm:$0xff]  }
 0x492   :  { %4198 = vmatpush1.bf16.msra.mxu1 %v7834_v52  ;;  %v3487_v24 = vpack.c.bf16 %v9161_v37, %v9157_v38  ;;  %v7902_v52 = vld [vmem:[#allocation4 + $0x834] ss:$8 sps:$4 sm:$0xff]   ;;  %v7927_v38 = vld [vmem:[#allocation4 + $0x8c0] ss:$8 sps:$4 sm:$0xff]  }
 0x493   :  { %4199 = vmatprep.subr.bf16.mxu1 %v7839_v50  ;;  %v7900_v50 = vld [vmem:[#allocation4 + $0x830] ss:$8 sps:$4 sm:$0xff]   ;;  %v7932_v37 = vld [vmem:[#allocation4 + $0x8d4] ss:$8 sps:$4 sm:$0xff]  }
 0x496   :  { %v9167_v58 = vpop.eup %8370  ;;  %4200 = vmatpush1.bf16.msra.mxu1 %v7837_v4  ;;  %v7905_v4 = vld [vmem:[#allocation4 + $0x844] ss:$8 sps:$4 sm:$0xff]  }
 0x497   :  { %v9169_v31 = vpop.eup %8372  ;;  %4201 = vmatprep.subr.bf16.mxu1 %v7842_v21  ;;  %v7903_v21 = vld [vmem:[#allocation4 + $0x840] ss:$8 sps:$4 sm:$0xff]  }
 0x498   :  { %v9171_v3 = vpop.eup %8374 }
 0x499   :  { %v9173_v18 = vpop.eup %8376  ;;  %v3488_v59 = vpack.c.bf16 %v9171_v3, %v9167_v58 }
 0x49a   :  { %4202 = vmatpush1.bf16.msra.mxu1 %v7840_v49  ;;  %v3489_v22 = vpack.c.bf16 %v9173_v18, %v9169_v31  ;;  %v7908_v49 = vld [vmem:[#allocation4 + $0x854] ss:$8 sps:$4 sm:$0xff]  }
 0x49b   :  { %4203 = vmatprep.subr.bf16.mxu1 %v7845_v51  ;;  %v7906_v51 = vld [vmem:[#allocation4 + $0x850] ss:$8 sps:$4 sm:$0xff]  }
 0x49e   :  { %4204 = vmatpush1.bf16.msra.mxu1 %v7843_v13  ;;  %v7911_v13 = vld [vmem:[#allocation4 + $0x864] ss:$8 sps:$4 sm:$0xff]  }
 0x49f   :  { %4205 = vmatprep.subr.bf16.mxu1 %v7848_v63  ;;  %v7909_v63 = vld [vmem:[#allocation4 + $0x860] ss:$8 sps:$4 sm:$0xff]  }
 0x4a2   :  { %4206 = vmatpush1.bf16.msra.mxu1 %v7846_v2  ;;  %v7914_v2 = vld [vmem:[#allocation4 + $0x874] ss:$8 sps:$4 sm:$0xff]  }
 0x4a3   :  { %4207 = vmatprep.subr.bf16.mxu1 %v7851_v43  ;;  %v7912_v43 = vld [vmem:[#allocation4 + $0x870] ss:$8 sps:$4 sm:$0xff]  }
 0x4a6   :  { %4208 = vmatpush1.bf16.msra.mxu1 %v7849_v46  ;;  %v7917_v46 = vld [vmem:[#allocation4 + $0x884] ss:$8 sps:$4 sm:$0xff]  }
 0x4a7   :  { %4209 = vmatprep.subr.bf16.mxu1 %v7854_v61  ;;  %v7915_v61 = vld [vmem:[#allocation4 + $0x880] ss:$8 sps:$4 sm:$0xff]  }
 0x4aa   :  { %4210 = vmatpush1.bf16.msra.mxu1 %v7852_v19  ;;  %v7920_v19 = vld [vmem:[#allocation4 + $0x894] ss:$8 sps:$4 sm:$0xff]  }
 0x4ab   :  { %4211 = vmatprep.subr.bf16.mxu1 %v7857_v44  ;;  %v7918_v44 = vld [vmem:[#allocation4 + $0x890] ss:$8 sps:$4 sm:$0xff]  }
 0x4ae   :  { %4212 = vmatpush1.bf16.msra.mxu1 %v7855_v53  ;;  %v7923_v53 = vld [vmem:[#allocation4 + $0x8a4] ss:$8 sps:$4 sm:$0xff]  }
 0x4af   :  { %4213 = vmatprep.subr.bf16.mxu1 %v7860_v23  ;;  %v7921_v23 = vld [vmem:[#allocation4 + $0x8a0] ss:$8 sps:$4 sm:$0xff]  }
 0x4b2   :  { %4214 = vmatpush1.bf16.msra.mxu1 %v7858_v6  ;;  %v7926_v6 = vld [vmem:[#allocation4 + $0x8b4] ss:$8 sps:$4 sm:$0xff]  }
 0x4b3   :  { %4215 = vmatprep.subr.bf16.mxu1 %v7863_v14  ;;  %v8018_v14 = vld [vmem:[#allocation4 + $0xba0] ss:$8 sps:$4 sm:$0xff]  }
 0x4b6   :  { %4216 = vmatpush1.bf16.msra.mxu1 %v7861_v15  ;;  %v8020_v15 = vld [vmem:[#allocation4 + $0xba4] ss:$8 sps:$4 sm:$0xff]  }
 0x4b7   :  { %4217 = vmatprep.subr.bf16.mxu1 %v7866_v7  ;;  %v7924_v7 = vld [vmem:[#allocation4 + $0x8b0] ss:$8 sps:$4 sm:$0xff]   ;;  %5345 = vmatprep.subr.bf16.mxu0 %v8020_v15  ;;  %v7965_v15 = vld [vmem:[#allocation4 + $0x984] ss:$8 sps:$4 sm:$0xff]  }
 0x4b8   :  { %5346 = vmatpush1.bf16.msra.mxu0 %v8018_v14  ;;  %v7960_v14 = vld [vmem:[#allocation4 + $0x970] ss:$8 sps:$4 sm:$0xff]  }
 0x4ba   :  { %4218 = vmatpush1.bf16.msra.mxu1 %v7864_v57  ;;  %v8023_v57 = vld [vmem:[#allocation4 + $0xbb4] ss:$8 sps:$4 sm:$0xff]  }
 0x4bb   :  { %4428 = vmatprep.subr.bf16.mxu1 %v7869_v60  ;;  %5347 = vmatprep.subr.bf16.mxu0 %v8023_v57  ;;  %v8029_v60 = vld [vmem:[#allocation4 + $0xbd4] ss:$8 sps:$4 sm:$0xff]   ;;  %v8062_v57 = vld [vmem:[#allocation4 + $0xc84] ss:$8 sps:$4 sm:$0xff]  }
 0x4bc   :  { %5348 = vmatpush1.bf16.msra.mxu0 %v8021_v39  ;;  %v7971_v39 = vld [vmem:[#allocation4 + $0x994] ss:$8 sps:$4 sm:$0xff]  }
 0x4bd   :  { %4220 = vmatmul.mubr.bf16.vlgmr.msra.gmra.mrb[56].mxu1 %v3482_v56  ;;  %v7881_v56 = vld [vmem:[#allocation4 + $0x7c4] ss:$8 sps:$4 sm:$0xff]  }
 0x4be   :  { %4429 = vmatpush1.bf16.msra.mxu1 %v7867_v62  ;;  %4460 = vmatprep.mubr.bf16.mxu1 %v3485_v5  ;;  %v7888_v5 = vld [vmem:[#allocation4 + $0x7f0] ss:$8 sps:$4 sm:$0xff]  }
 0x4bf   :  { %4430 = vmatprep.subr.bf16.mxu1 %v7872_v28  ;;  %v7930_v62 = vld [vmem:[#allocation4 + $0x8d0] ss:$8 sps:$4 sm:$0xff]   ;;  %v7935_v28 = vld [vmem:[#allocation4 + $0x8e4] ss:$8 sps:$4 sm:$0xff]  }
 0x4c2   :  { %4431 = vmatpush1.bf16.msra.mxu1 %v7870_v35  ;;  %v7933_v35 = vld [vmem:[#allocation4 + $0x8e0] ss:$8 sps:$4 sm:$0xff]  }
 0x4c3   :  { %4432 = vmatprep.subr.bf16.mxu1 %v7875_v36  ;;  %v7938_v36 = vld [vmem:[#allocation4 + $0x8f4] ss:$8 sps:$4 sm:$0xff]  }
 0x4c6   :  { %4433 = vmatpush1.bf16.msra.mxu1 %v7873_v8  ;;  %v8030_v8 = vld [vmem:[#allocation4 + $0xbe0] ss:$8 sps:$4 sm:$0xff]  }
 0x4c7   :  { %4434 = vmatprep.subr.bf16.mxu1 %v7878_v42  ;;  %v8035_v42 = vld [vmem:[#allocation4 + $0xbf4] ss:$8 sps:$4 sm:$0xff]  }
 0x4ca   :  { %4435 = vmatpush1.bf16.msra.mxu1 %v7876_v55  ;;  %v7936_v55 = vld [vmem:[#allocation4 + $0x8f0] ss:$8 sps:$4 sm:$0xff]  }
 0x4cb   :  { %4436 = vmatprep.subr.bf16.mxu1 %v7881_v56  ;;  %v7941_v56 = vld [vmem:[#allocation4 + $0x904] ss:$8 sps:$4 sm:$0xff]  }
 0x4ce   :  { %4437 = vmatpush1.bf16.msra.mxu1 %v7879_v33  ;;  %v8033_v33 = vld [vmem:[#allocation4 + $0xbf0] ss:$8 sps:$4 sm:$0xff]  }
 0x4cf   :  { %4438 = vmatprep.subr.bf16.mxu1 %v7884_v27  ;;  %v8038_v27 = vld [vmem:[#allocation4 + $0xc04] ss:$8 sps:$4 sm:$0xff]  }
 0x4d2   :  { %4439 = vmatpush1.bf16.msra.mxu1 %v7882_v34  ;;  %v7939_v34 = vld [vmem:[#allocation4 + $0x900] ss:$8 sps:$4 sm:$0xff]  }
 0x4d3   :  { %4440 = vmatprep.subr.bf16.mxu1 %v7887_v17  ;;  %v7944_v17 = vld [vmem:[#allocation4 + $0x914] ss:$8 sps:$4 sm:$0xff]  }
 0x4d6   :  { %4441 = vmatpush1.bf16.msra.mxu1 %v7885_v9  ;;  %v8036_v9 = vld [vmem:[#allocation4 + $0xc00] ss:$8 sps:$4 sm:$0xff]  }
 0x4d7   :  { %4442 = vmatprep.subr.bf16.mxu1 %v7890_v41  ;;  %v8041_v41 = vld [vmem:[#allocation4 + $0xc14] ss:$8 sps:$4 sm:$0xff]  }
 0x4da   :  { %4443 = vmatpush1.bf16.msra.mxu1 %v7888_v5  ;;  %v7942_v5 = vld [vmem:[#allocation4 + $0x910] ss:$8 sps:$4 sm:$0xff]  }
 0x4db   :  { %4444 = vmatprep.subr.bf16.mxu1 %v7893_v1  ;;  %v7947_v1 = vld [vmem:[#allocation4 + $0x924] ss:$8 sps:$4 sm:$0xff]  }
 0x4de   :  { %4445 = vmatpush1.bf16.msra.mxu1 %v7891_v10  ;;  %v8039_v10 = vld [vmem:[#allocation4 + $0xc10] ss:$8 sps:$4 sm:$0xff]  }
 0x4df   :  { %4446 = vmatprep.subr.bf16.mxu1 %v7896_v11  ;;  %v8044_v11 = vld [vmem:[#allocation4 + $0xc24] ss:$8 sps:$4 sm:$0xff]  }
 0x4e2   :  { %4447 = vmatpush1.bf16.msra.mxu1 %v7894_v45  ;;  %v7945_v45 = vld [vmem:[#allocation4 + $0x920] ss:$8 sps:$4 sm:$0xff]  }
 0x4e3   :  { %4448 = vmatprep.subr.bf16.mxu1 %v7899_v47  ;;  %v7950_v47 = vld [vmem:[#allocation4 + $0x934] ss:$8 sps:$4 sm:$0xff]  }
 0x4e6   :  { %4449 = vmatpush1.bf16.msra.mxu1 %v7897_v48  ;;  %v8042_v48 = vld [vmem:[#allocation4 + $0xc20] ss:$8 sps:$4 sm:$0xff]  }
 0x4e7   :  { %4450 = vmatprep.subr.bf16.mxu1 %v7902_v52  ;;  %v8047_v52 = vld [vmem:[#allocation4 + $0xc34] ss:$8 sps:$4 sm:$0xff]  }
 0x4ea   :  { %4451 = vmatpush1.bf16.msra.mxu1 %v7900_v50  ;;  %v7948_v50 = vld [vmem:[#allocation4 + $0x930] ss:$8 sps:$4 sm:$0xff]  }
 0x4eb   :  { %4452 = vmatprep.subr.bf16.mxu1 %v7905_v4  ;;  %v7953_v4 = vld [vmem:[#allocation4 + $0x944] ss:$8 sps:$4 sm:$0xff]  }
 0x4ee   :  { %4453 = vmatpush1.bf16.msra.mxu1 %v7903_v21  ;;  %v8045_v21 = vld [vmem:[#allocation4 + $0xc30] ss:$8 sps:$4 sm:$0xff]  }
 0x4ef   :  { %4454 = vmatprep.subr.bf16.mxu1 %v7908_v49  ;;  %v8050_v49 = vld [vmem:[#allocation4 + $0xc44] ss:$8 sps:$4 sm:$0xff]  }
 0x4f2   :  { %4455 = vmatpush1.bf16.msra.mxu1 %v7906_v51  ;;  %v7951_v51 = vld [vmem:[#allocation4 + $0x940] ss:$8 sps:$4 sm:$0xff]  }
 0x4f3   :  { %4456 = vmatprep.subr.bf16.mxu1 %v7911_v13  ;;  %v7956_v13 = vld [vmem:[#allocation4 + $0x954] ss:$8 sps:$4 sm:$0xff]  }
 0x4f6   :  { %4457 = vmatpush1.bf16.msra.mxu1 %v7909_v63  ;;  %v8048_v63 = vld [vmem:[#allocation4 + $0xc40] ss:$8 sps:$4 sm:$0xff]  }
 0x4f7   :  { %4458 = vmatprep.subr.bf16.mxu1 %v7914_v2  ;;  %v8053_v2 = vld [vmem:[#allocation4 + $0xc54] ss:$8 sps:$4 sm:$0xff]  }
 0x4fa   :  { %4459 = vmatpush1.bf16.msra.mxu1 %v7912_v43  ;;  %v7954_v43 = vld [vmem:[#allocation4 + $0x950] ss:$8 sps:$4 sm:$0xff]  }
 0x4fb   :  { %4669 = vmatprep.subr.bf16.mxu1 %v7917_v46  ;;  %v7959_v46 = vld [vmem:[#allocation4 + $0x964] ss:$8 sps:$4 sm:$0xff]  }
 0x4fd   :  { %4461 = vmatmul.mubr.bf16.vlgmr.msra.gmra.mrb[56].mxu1 %v3484_v40  ;;  %v8026_v40 = vld [vmem:[#allocation4 + $0xbc4] ss:$8 sps:$4 sm:$0xff]  }
 0x4fe   :  { %4670 = vmatpush1.bf16.msra.mxu1 %v7915_v61  ;;  %4701 = vmatprep.mubr.bf16.mxu1 %v3487_v24  ;;  %v8024_v24 = vld [vmem:[#allocation4 + $0xbc0] ss:$8 sps:$4 sm:$0xff]   ;;  %v8051_v61 = vld [vmem:[#allocation4 + $0xc50] ss:$8 sps:$4 sm:$0xff]  }
 0x4ff   :  { %4671 = vmatprep.subr.bf16.mxu1 %v7920_v19  ;;  %5349 = vmatprep.subr.bf16.mxu0 %v8026_v40  ;;  %v8056_v19 = vld [vmem:[#allocation4 + $0xc64] ss:$8 sps:$4 sm:$0xff]   ;;  %v8060_v40 = vld [vmem:[#allocation4 + $0xc80] ss:$8 sps:$4 sm:$0xff]  }
 0x500   :  { %5350 = vmatpush1.bf16.msra.mxu0 %v8024_v24  ;;  %v7975_v24 = vld [vmem:[#allocation4 + $0x9a4] ss:$8 sps:$4 sm:$0xff]  }
 0x501   :  { %5351 = vmatprep.subr.bf16.mxu0 %v8029_v60  ;;  %v8063_v60 = vld [vmem:[#allocation4 + $0xc90] ss:$8 sps:$4 sm:$0xff]  }
 0x502   :  { %4672 = vmatpush1.bf16.msra.mxu1 %v7918_v44  ;;  %v7957_v44 = vld [vmem:[#allocation4 + $0x960] ss:$8 sps:$4 sm:$0xff]  }
 0x503   :  { %4673 = vmatprep.subr.bf16.mxu1 %v7923_v53  ;;  %v7962_v53 = vld [vmem:[#allocation4 + $0x974] ss:$8 sps:$4 sm:$0xff]  }
 0x504   :  { %5352 = vmatpush1.bf16.msra.mxu0 %v8027_v29  ;;  %v7978_v29 = vld [vmem:[#allocation4 + $0x9b4] ss:$8 sps:$4 sm:$0xff]  }
 0x505   :  { %5353 = vmatprep.subr.bf16.mxu0 %v8032_v25 }
 0x506   :  { %4674 = vmatpush1.bf16.msra.mxu1 %v7921_v23  ;;  %v8054_v23 = vld [vmem:[#allocation4 + $0xc60] ss:$8 sps:$4 sm:$0xff]  }
 0x507   :  { %4675 = vmatprep.subr.bf16.mxu1 %v7926_v6  ;;  %v8059_v6 = vld [vmem:[#allocation4 + $0xc74] ss:$8 sps:$4 sm:$0xff]  }
 0x508   :  { %5354 = vmatpush1.bf16.msra.mxu0 %v8030_v8  ;;  %v7987_v8 = vld [vmem:[#allocation4 + $0x9e4] ss:$8 sps:$4 sm:$0xff]  }
 0x509   :  { %5355 = vmatprep.subr.bf16.mxu0 %v8035_v42  ;;  %v7985_v42 = vld [vmem:[#allocation4 + $0x9e0] ss:$8 sps:$4 sm:$0xff]  }
 0x50a   :  { %4676 = vmatpush1.bf16.msra.mxu1 %v7924_v7  ;;  %v8057_v7 = vld [vmem:[#allocation4 + $0xc70] ss:$8 sps:$4 sm:$0xff]  }
 0x50b   :  { %4677 = vmatprep.subr.bf16.mxu1 %v7929_v16  ;;  %v7963_v16 = vld [vmem:[#allocation4 + $0x980] ss:$8 sps:$4 sm:$0xff]  }
 0x50c   :  { %5356 = vmatpush1.bf16.msra.mxu0 %v8033_v33  ;;  %v7993_v33 = vld [vmem:[#allocation4 + $0xa04] ss:$8 sps:$4 sm:$0xff]  }
 0x50d   :  { %5357 = vmatprep.subr.bf16.mxu0 %v8038_v27  ;;  %v7991_v27 = vld [vmem:[#allocation4 + $0xa00] ss:$8 sps:$4 sm:$0xff]  }
 0x50e   :  { %4678 = vmatpush1.bf16.msra.mxu1 %v7927_v38  ;;  %v8065_v38 = vld [vmem:[#allocation4 + $0xc94] ss:$8 sps:$4 sm:$0xff]  }
 0x50f   :  { %4679 = vmatprep.subr.bf16.mxu1 %v7932_v37  ;;  %v7969_v37 = vld [vmem:[#allocation4 + $0x990] ss:$8 sps:$4 sm:$0xff]  }
 0x510   :  { %5358 = vmatpush1.bf16.msra.mxu0 %v8036_v9  ;;  %v7999_v9 = vld [vmem:[#allocation4 + $0xa24] ss:$8 sps:$4 sm:$0xff]  }
 0x511   :  { %5359 = vmatprep.subr.bf16.mxu0 %v8041_v41  ;;  %v7997_v41 = vld [vmem:[#allocation4 + $0xa20] ss:$8 sps:$4 sm:$0xff]  }
 0x512   :  { %4680 = vmatpush1.bf16.msra.mxu1 %v7930_v62  ;;  %v8068_v62 = vld [vmem:[#allocation4 + $0xaa4] ss:$8 sps:$4 sm:$0xff]  }
 0x513   :  { %4681 = vmatprep.subr.bf16.mxu1 %v7935_v28  ;;  %v7973_v28 = vld [vmem:[#allocation4 + $0x9a0] ss:$8 sps:$4 sm:$0xff]  }
 0x514   :  { %5360 = vmatpush1.bf16.msra.mxu0 %v8039_v10  ;;  %v8005_v10 = vld [vmem:[#allocation4 + $0xa44] ss:$8 sps:$4 sm:$0xff]  }
 0x515   :  { %5361 = vmatprep.subr.bf16.mxu0 %v8044_v11  ;;  %v8003_v11 = vld [vmem:[#allocation4 + $0xa40] ss:$8 sps:$4 sm:$0xff]  }
 0x516   :  { %4682 = vmatpush1.bf16.msra.mxu1 %v7933_v35  ;;  %v7984_v35 = vld [vmem:[#allocation4 + $0x9d4] ss:$8 sps:$4 sm:$0xff]  }
 0x517   :  { %4683 = vmatprep.subr.bf16.mxu1 %v7938_v36  ;;  %v7982_v36 = vld [vmem:[#allocation4 + $0x9d0] ss:$8 sps:$4 sm:$0xff]  }
 0x518   :  { %5362 = vmatpush1.bf16.msra.mxu0 %v8042_v48  ;;  %v8011_v48 = vld [vmem:[#allocation4 + $0xa64] ss:$8 sps:$4 sm:$0xff]  }
 0x519   :  { %5363 = vmatprep.subr.bf16.mxu0 %v8047_v52  ;;  %v8009_v52 = vld [vmem:[#allocation4 + $0xa60] ss:$8 sps:$4 sm:$0xff]  }
 0x51a   :  { %4684 = vmatpush1.bf16.msra.mxu1 %v7936_v55  ;;  %v7990_v55 = vld [vmem:[#allocation4 + $0x9f4] ss:$8 sps:$4 sm:$0xff]  }
 0x51b   :  { %4685 = vmatprep.subr.bf16.mxu1 %v7941_v56  ;;  %v7988_v56 = vld [vmem:[#allocation4 + $0x9f0] ss:$8 sps:$4 sm:$0xff]  }
 0x51c   :  { %5364 = vmatpush1.bf16.msra.mxu0 %v8045_v21  ;;  %v8017_v21 = vld [vmem:[#allocation4 + $0xa84] ss:$8 sps:$4 sm:$0xff]  }
 0x51d   :  { %5365 = vmatprep.subr.bf16.mxu0 %v8050_v49  ;;  %v8015_v49 = vld [vmem:[#allocation4 + $0xa80] ss:$8 sps:$4 sm:$0xff]  }
 0x51e   :  { %4686 = vmatpush1.bf16.msra.mxu1 %v7939_v34  ;;  %v7996_v34 = vld [vmem:[#allocation4 + $0xa14] ss:$8 sps:$4 sm:$0xff]  }
 0x51f   :  { %4687 = vmatprep.subr.bf16.mxu1 %v7944_v17  ;;  %v7994_v17 = vld [vmem:[#allocation4 + $0xa10] ss:$8 sps:$4 sm:$0xff]  }
 0x520   :  { %5366 = vmatpush1.bf16.msra.mxu0 %v8048_v63 }
 0x521   :  { %5367 = vmatprep.subr.bf16.mxu0 %v8053_v2 }
 0x522   :  { %4688 = vmatpush1.bf16.msra.mxu1 %v7942_v5  ;;  %v8002_v5 = vld [vmem:[#allocation4 + $0xa34] ss:$8 sps:$4 sm:$0xff]  }
 0x523   :  { %4689 = vmatprep.subr.bf16.mxu1 %v7947_v1  ;;  %v8000_v1 = vld [vmem:[#allocation4 + $0xa30] ss:$8 sps:$4 sm:$0xff]  }
 0x524   :  { %5368 = vmatpush1.bf16.msra.mxu0 %v8051_v61 }
 0x525   :  { %5369 = vmatprep.subr.bf16.mxu0 %v8056_v19 }
 0x526   :  { %4690 = vmatpush1.bf16.msra.mxu1 %v7945_v45  ;;  %v8008_v45 = vld [vmem:[#allocation4 + $0xa54] ss:$8 sps:$4 sm:$0xff]  }
 0x527   :  { %4691 = vmatprep.subr.bf16.mxu1 %v7950_v47  ;;  %v8006_v47 = vld [vmem:[#allocation4 + $0xa50] ss:$8 sps:$4 sm:$0xff]  }
 0x528   :  { %5370 = vmatpush1.bf16.msra.mxu0 %v8054_v23 }
 0x529   :  { %5371 = vmatprep.subr.bf16.mxu0 %v8059_v6 }
 0x52a   :  { %4692 = vmatpush1.bf16.msra.mxu1 %v7948_v50  ;;  %v8014_v50 = vld [vmem:[#allocation4 + $0xa74] ss:$8 sps:$4 sm:$0xff]  }
 0x52b   :  { %4693 = vmatprep.subr.bf16.mxu1 %v7953_v4  ;;  %v8012_v4 = vld [vmem:[#allocation4 + $0xa70] ss:$8 sps:$4 sm:$0xff]  }
 0x52c   :  { %5372 = vmatpush1.bf16.msra.mxu0 %v8057_v7  ;;  %v8069_v7 = vld [vmem:[#allocation4 + $0xab0] ss:$8 sps:$4 sm:$0xff]  }
 0x52d   :  { %5373 = vmatprep.subr.bf16.mxu0 %v8062_v57  ;;  %v8074_v57 = vld [vmem:[#allocation4 + $0xac4] ss:$8 sps:$4 sm:$0xff]  }
 0x52e   :  { %4694 = vmatpush1.bf16.msra.mxu1 %v7951_v51  ;;  %v5050_v51 = vld [vmem:[#allocation6 + $0x4] ss:$8 sm:$0x3] }
 0x52f   :  { %4695 = vmatprep.subr.bf16.mxu1 %v7956_v13  ;;  %v5055_v13 = vrot.slane %v5050_v51, %v8940_v30  ;;  %v5059_v63 = vrot.slane %v5050_v51, %v8942_v32  ;;  %v8131_v51 = vld [vmem:[#allocation4 + $0xdf4] ss:$8 sps:$4 sm:$0xff]  }
 0x530   :  { %5374 = vmatpush1.bf16.msra.mxu0 %v8060_v40  ;;  %v8075_v40 = vld [vmem:[#allocation4 + $0xad0] ss:$8 sps:$4 sm:$0xff]  }
 0x531   :  { %5375 = vmatprep.subr.bf16.mxu0 %v8065_v38  ;;  %v8080_v38 = vld [vmem:[#allocation4 + $0xae4] ss:$8 sps:$4 sm:$0xff]  }
 0x532   :  { %4696 = vmatpush1.bf16.msra.mxu1 %v7954_v43 }
 0x533   :  { %4697 = vmatprep.subr.bf16.mxu1 %v7959_v46 }
 0x534   :  { %5376 = vmatpush1.bf16.msra.mxu0 %v8063_v60  ;;  %v8081_v60 = vld [vmem:[#allocation4 + $0xaf0] ss:$8 sps:$4 sm:$0xff]  }
 0x535   :  { %5548 = vmatprep.subr.bf16.mxu0 %v8068_v62  ;;  %v8086_v62 = vld [vmem:[#allocation4 + $0xb04] ss:$8 sps:$4 sm:$0xff]  }
 0x536   :  { %4698 = vmatpush1.bf16.msra.mxu1 %v7957_v44 }
 0x537   :  { %4699 = vmatprep.subr.bf16.mxu1 %v7962_v53 }
 0x53a   :  { %4700 = vmatpush1.bf16.msra.mxu1 %v7960_v14  ;;  %v8066_v14 = vld [vmem:[#allocation4 + $0xaa0] ss:$8 sps:$4 sm:$0xff]  }
 0x53b   :  { %4910 = vmatprep.subr.bf16.mxu1 %v7965_v15  ;;  %v8071_v15 = vld [vmem:[#allocation4 + $0xab4] ss:$8 sps:$4 sm:$0xff]  }
 0x53d   :  { %4702 = vmatmul.mubr.bf16.vlgmr.msra.gmra.mrb[56].mxu1 %v3486_v54 }
 0x53e   :  { %4911 = vmatpush1.bf16.msra.mxu1 %v7963_v16  ;;  %4942 = vmatprep.mubr.bf16.mxu1 %v3489_v22  ;;  %v7979_v22 = vld [vmem:[#allocation4 + $0x9c0] ss:$8 sps:$4 sm:$0xff]  }
 0x53f   :  { %4912 = vmatprep.subr.bf16.mxu1 %v7971_v39  ;;  %v8072_v16 = vld [vmem:[#allocation4 + $0xac0] ss:$8 sps:$4 sm:$0xff]   ;;  %v8077_v39 = vld [vmem:[#allocation4 + $0xad4] ss:$8 sps:$4 sm:$0xff]  }
 0x542   :  { %4913 = vmatpush1.bf16.msra.mxu1 %v7969_v37  ;;  %v8078_v37 = vld [vmem:[#allocation4 + $0xae0] ss:$8 sps:$4 sm:$0xff]  }
 0x543   :  { %4914 = vmatprep.subr.bf16.mxu1 %v7975_v24  ;;  %v8083_v24 = vld [vmem:[#allocation4 + $0xaf4] ss:$8 sps:$4 sm:$0xff]  }
 0x546   :  { %4915 = vmatpush1.bf16.msra.mxu1 %v7973_v28  ;;  %v8084_v28 = vld [vmem:[#allocation4 + $0xb00] ss:$8 sps:$4 sm:$0xff]  }
 0x547   :  { %4916 = vmatprep.subr.bf16.mxu1 %v7978_v29  ;;  %v8089_v29 = vld [vmem:[#allocation4 + $0xb14] ss:$8 sps:$4 sm:$0xff]  }
 0x548   :  { %v9204_v54 = vpop.f32.mrb[36].mxu0 }
 0x549   :  { %v9206_v31 = vpop.f32.mrb[37].mxu0 }
 0x54a   :  { %4917 = vmatpush1.bf16.msra.mxu1 %v7976_v20  ;;  %v9208_v18 = vpop.f32.mrb[38].mxu0  ;;  %v8087_v20 = vld [vmem:[#allocation4 + $0xb10] ss:$8 sps:$4 sm:$0xff]  }
 0x54b   :  { %v9210_v25 = vpop.f32.mrb[39].mxu0  ;;  %4918 = vmatprep.subr.bf16.mxu1 %v7981_v12  ;;  %v8092_v12 = vld [vmem:[#allocation4 + $0xb24] ss:$8 sps:$4 sm:$0xff]  }
 0x54e   :  { %4919 = vmatpush1.bf16.msra.mxu1 %v7979_v22  ;;  %v8090_v22 = vld [vmem:[#allocation4 + $0xb20] ss:$8 sps:$4 sm:$0xff]  }
 0x54f   :  { %4920 = vmatprep.subr.bf16.mxu1 %v7984_v35  ;;  %v8095_v35 = vld [vmem:[#allocation4 + $0xb34] ss:$8 sps:$4 sm:$0xff]  }
 0x552   :  { %4921 = vmatpush1.bf16.msra.mxu1 %v7982_v36  ;;  %v8093_v36 = vld [vmem:[#allocation4 + $0xb30] ss:$8 sps:$4 sm:$0xff]  }
 0x553   :  { %4922 = vmatprep.subr.bf16.mxu1 %v7987_v8  ;;  %v8098_v8 = vld [vmem:[#allocation4 + $0xb44] ss:$8 sps:$4 sm:$0xff]  }
 0x556   :  { %4923 = vmatpush1.bf16.msra.mxu1 %v7985_v42  ;;  %v8096_v42 = vld [vmem:[#allocation4 + $0xb40] ss:$8 sps:$4 sm:$0xff]  }
 0x557   :  { %4924 = vmatprep.subr.bf16.mxu1 %v7990_v55  ;;  %v8101_v55 = vld [vmem:[#allocation4 + $0xb54] ss:$8 sps:$4 sm:$0xff]  }
 0x55a   :  { %4925 = vmatpush1.bf16.msra.mxu1 %v7988_v56  ;;  %v8099_v56 = vld [vmem:[#allocation4 + $0xb50] ss:$8 sps:$4 sm:$0xff]  }
 0x55b   :  { %4926 = vmatprep.subr.bf16.mxu1 %v7993_v33  ;;  %v8104_v33 = vld [vmem:[#allocation4 + $0xb64] ss:$8 sps:$4 sm:$0xff]  }
 0x55e   :  { %4927 = vmatpush1.bf16.msra.mxu1 %v7991_v27  ;;  %v8102_v27 = vld [vmem:[#allocation4 + $0xb60] ss:$8 sps:$4 sm:$0xff]  }
 0x55f   :  { %4928 = vmatprep.subr.bf16.mxu1 %v7996_v34  ;;  %v5106_v2 = vpop.f32.mrb[40].mxu0  ;;  %v8105_v34 = vld [vmem:[#allocation4 + $0xb70] ss:$8 sps:$4 sm:$0xff]  }
 0x560   :  { %v5107_v43 = vadd.f32 %v5106_v2, %v5055_v13  ;;  %v5108_v46 = vpop.f32.mrb[41].mxu0  ;;  %v8132_v2 = vld [vmem:[#allocation4 + $0xe00] ss:$8 sps:$4 sm:$0xff]  }
 0x561   :  { %v5109_v61 = vadd.f32 %v5108_v46, %v5059_v63  ;;  %v5110_v19 = vpop.f32.mrb[42].mxu0  ;;  %v8135_v46 = vld [vmem:[#allocation4 + $0xe10] ss:$8 sps:$4 sm:$0xff]  }
 0x562   :  { %4929 = vmatpush1.bf16.msra.mxu1 %v7994_v17  ;;  %8378 = vtanh.f32 %v5107_v43  ;;  %v5111_v44 = vadd.f32 %v5110_v19, %v5055_v13  ;;  %v5112_v58 = vpop.f32.mrb[43].mxu0  ;;  %v8107_v17 = vld [vmem:[#allocation4 + $0xb74] ss:$8 sps:$4 sm:$0xff]   ;;  %v8129_v13 = vld [vmem:[#allocation4 + $0xdf0] ss:$8 sps:$4 sm:$0xff]  }
 0x563   :  { %4930 = vmatprep.subr.bf16.mxu1 %v7999_v9  ;;  %8380 = vtanh.f32 %v5109_v61  ;;  %v5113_v3 = vadd.f32 %v5112_v58, %v5059_v63  ;;  %v8110_v9 = vld [vmem:[#allocation4 + $0xb84] ss:$8 sps:$4 sm:$0xff]   ;;  %v8137_v43 = vld [vmem:[#allocation4 + $0xe14] ss:$8 sps:$4 sm:$0xff]   ;;  %v8138_v19 = vld [vmem:[#allocation4 + $0xe20] ss:$8 sps:$4 sm:$0xff]  }
 0x564   :  { %8382 = vtanh.f32 %v5111_v44  ;;  %v8134_v63 = vld [vmem:[#allocation4 + $0xe04] ss:$8 sps:$4 sm:$0xff]   ;;  %v8143_v44 = vld [vmem:[#allocation4 + $0xe34] ss:$8 sps:$4 sm:$0xff]   ;;  %v8141_v58 = vld [vmem:[#allocation4 + $0xe30] ss:$8 sps:$4 sm:$0xff]  }
 0x565   :  { %8384 = vtanh.f32 %v5113_v3  ;;  %v8140_v61 = vld [vmem:[#allocation4 + $0xe24] ss:$8 sps:$4 sm:$0xff]  }
 0x566   :  { %4931 = vmatpush1.bf16.msra.mxu1 %v7997_v41  ;;  %v8108_v41 = vld [vmem:[#allocation4 + $0xb80] ss:$8 sps:$4 sm:$0xff]   ;;  %v8146_v3 = vld [vmem:[#allocation4 + $0xe44] ss:$8 sps:$4 sm:$0xff]  }
 0x567   :  { %4932 = vmatprep.subr.bf16.mxu1 %v8002_v5  ;;  %v8113_v5 = vld [vmem:[#allocation4 + $0xb94] ss:$8 sps:$4 sm:$0xff]  }
 0x56a   :  { %4933 = vmatpush1.bf16.msra.mxu1 %v8000_v1  ;;  %v8111_v1 = vld [vmem:[#allocation4 + $0xb90] ss:$8 sps:$4 sm:$0xff]  }
 0x56b   :  { %4934 = vmatprep.subr.bf16.mxu1 %v8005_v10  ;;  %v8114_v10 = vld [vmem:[#allocation4 + $0xda0] ss:$8 sps:$4 sm:$0xff]  }
 0x56e   :  { %4935 = vmatpush1.bf16.msra.mxu1 %v8003_v11  ;;  %v8116_v11 = vld [vmem:[#allocation4 + $0xda4] ss:$8 sps:$4 sm:$0xff]  }
 0x56f   :  { %4936 = vmatprep.subr.bf16.mxu1 %v8008_v45  ;;  %v8119_v45 = vld [vmem:[#allocation4 + $0xdb4] ss:$8 sps:$4 sm:$0xff]  }
 0x572   :  { %4937 = vmatpush1.bf16.msra.mxu1 %v8006_v47  ;;  %v8117_v47 = vld [vmem:[#allocation4 + $0xdb0] ss:$8 sps:$4 sm:$0xff]  }
 0x573   :  { %4938 = vmatprep.subr.bf16.mxu1 %v8011_v48  ;;  %v8122_v48 = vld [vmem:[#allocation4 + $0xdc4] ss:$8 sps:$4 sm:$0xff]  }
 0x576   :  { %4939 = vmatpush1.bf16.msra.mxu1 %v8009_v52  ;;  %v8120_v52 = vld [vmem:[#allocation4 + $0xdc0] ss:$8 sps:$4 sm:$0xff]  }
 0x577   :  { %4940 = vmatprep.subr.bf16.mxu1 %v8014_v50  ;;  %v8125_v50 = vld [vmem:[#allocation4 + $0xdd4] ss:$8 sps:$4 sm:$0xff]  }
 0x57a   :  { %4941 = vmatpush1.bf16.msra.mxu1 %v8012_v4  ;;  %v8123_v4 = vld [vmem:[#allocation4 + $0xdd0] ss:$8 sps:$4 sm:$0xff]  }
 0x57b   :  { %4998 = vmatprep.subr.bf16.mxu1 %v8017_v21  ;;  %v8128_v21 = vld [vmem:[#allocation4 + $0xde4] ss:$8 sps:$4 sm:$0xff]  }
 0x57d   :  { %4943 = vmatmul.mubr.bf16.vlgmr.msra.gmra.mrb[56].mxu1 %v3488_v59 }
 0x57e   :  { %4999 = vmatpush1.bf16.msra.mxu1 %v8015_v49  ;;  %5030 = vmatprep.mubr.bf16.mxu1 %v8470_v0  ;;  %v8379_v0 = vpop.eup %8378  ;;  %v8126_v49 = vld [vmem:[#allocation4 + $0xde0] ss:$8 sps:$4 sm:$0xff]  }
 0x57f   :  { %v8381_v59 = vpop.eup %8380  ;;  %5838 = vmatprep.subr.bf16.mxu1 %v8116_v11  ;;  %v8150_v11 = vld [vmem:[#allocation4 + $0xe60] ss:$8 sps:$4 sm:$0xff]  }
 0x585   :  { %6848 = vmatmul.mubr.msk.bf16.vlgmr.msra.gmra.mrb[60].mxu1 %vm131_vm0, %v9188_v26  ;;  %v8383_v26 = vpop.eup %8382 }
 0x586   :  { %v8385_v53 = vpop.eup %8384  ;;  %v5119_v23 = vpack.c.bf16 %v8383_v26, %v8379_v0  ;;  %5839 = vmatpush1.bf16.msra.mxu1 %v8114_v10  ;;  %v8144_v0 = vld [vmem:[#allocation4 + $0xe40] ss:$8 sps:$4 sm:$0xff]   ;;  %v8147_v26 = vld [vmem:[#allocation4 + $0xe50] ss:$8 sps:$4 sm:$0xff]   ;;  %v8152_v10 = vld [vmem:[#allocation4 + $0xe64] ss:$8 sps:$4 sm:$0xff]  }
 0x587   :  { %v5120_v6 = vpack.c.bf16 %v8385_v53, %v8381_v59  ;;  %5840 = vmatprep.subr.bf16.mxu1 %v8119_v45  ;;  %v8149_v59 = vld [vmem:[#allocation4 + $0xe54] ss:$8 sps:$4 sm:$0xff]   ;;  %v3537_v53 = vld [vmem:[#allocation6 + $0x2] ss:$8 sm:$0x3] }
 0x588   :  { %v8155_v45 = vld [vmem:[#allocation4 + $0xe74] ss:$8 sps:$4 sm:$0xff]  }
 0x589   :  { %5377 = vmatprep.mubr.bf16.mxu0 %v5120_v6  ;;  %v3546_v6 = vrot.slane %v3537_v53, %v8942_v32 }
 0x58a   :  { %5378 = vmatmul.mubr.bf16.vlgmr.msra.gmra.mrb[44].mxu0 %v5119_v23  ;;  %5841 = vmatpush1.bf16.msra.mxu1 %v8117_v47  ;;  %v3542_v23 = vrot.slane %v3537_v53, %v8940_v30  ;;  %v8153_v47 = vld [vmem:[#allocation4 + $0xe70] ss:$8 sps:$4 sm:$0xff]  }
 0x58b   :  { %5549 = vmatpush1.bf16.msra.mxu0 %v8066_v14  ;;  %5842 = vmatprep.subr.bf16.mxu1 %v8122_v48  ;;  %v8158_v48 = vld [vmem:[#allocation4 + $0xe84] ss:$8 sps:$4 sm:$0xff]   ;;  %v8231_v53 = vld [vmem:[#allocation4 + $0xf10] ss:$8 sps:$4 sm:$0xff]  }
 0x58c   :  { %5550 = vmatprep.subr.bf16.mxu0 %v8071_v15  ;;  %v3744_v14 = vadd.f32 %v9204_v54, %v3542_v23  ;;  %v3746_v15 = vadd.f32 %v9206_v31, %v3546_v6 }
 0x58e   :  { %5843 = vmatpush1.bf16.msra.mxu1 %v8120_v52  ;;  %v8156_v52 = vld [vmem:[#allocation4 + $0xe80] ss:$8 sps:$4 sm:$0xff]  }
 0x58f   :  { %5551 = vmatpush1.bf16.msra.mxu0 %v8069_v7  ;;  %5844 = vmatprep.subr.bf16.mxu1 %v8125_v50  ;;  %v8161_v50 = vld [vmem:[#allocation4 + $0xe94] ss:$8 sps:$4 sm:$0xff]  }
 0x590   :  { %5552 = vmatprep.subr.bf16.mxu0 %v8074_v57  ;;  %v3748_v57 = vadd.f32 %v9208_v18, %v3542_v23  ;;  %v8236_v23 = vld [vmem:[#allocation4 + $0xf24] ss:$8 sps:$4 sm:$0xff]  }
 0x592   :  { %5845 = vmatpush1.bf16.msra.mxu1 %v8123_v4  ;;  %v8159_v4 = vld [vmem:[#allocation4 + $0xe90] ss:$8 sps:$4 sm:$0xff]  }
 0x593   :  { %5553 = vmatpush1.bf16.msra.mxu0 %v8072_v16  ;;  %5846 = vmatprep.subr.bf16.mxu1 %v8128_v21  ;;  %v8164_v21 = vld [vmem:[#allocation4 + $0xca4] ss:$8 sps:$4 sm:$0xff]  }
 0x594   :  { %5554 = vmatprep.subr.bf16.mxu0 %v8077_v39 }
 0x596   :  { %5847 = vmatpush1.bf16.msra.mxu1 %v8126_v49  ;;  %v8210_v49 = vld [vmem:[#allocation4 + $0xea0] ss:$8 sps:$4 sm:$0xff]  }
 0x597   :  { %5555 = vmatpush1.bf16.msra.mxu0 %v8075_v40  ;;  %5848 = vmatprep.subr.bf16.mxu1 %v8131_v51  ;;  %v3750_v40 = vadd.f32 %v9210_v25, %v3546_v6  ;;  %v8212_v51 = vld [vmem:[#allocation4 + $0xea4] ss:$8 sps:$4 sm:$0xff]   ;;  %v8234_v6 = vld [vmem:[#allocation4 + $0xf20] ss:$8 sps:$4 sm:$0xff]  }
 0x598   :  { %5556 = vmatprep.subr.bf16.mxu0 %v8080_v38 }
 0x59a   :  { %5849 = vmatpush1.bf16.msra.mxu1 %v8129_v13  ;;  %v8215_v13 = vld [vmem:[#allocation4 + $0xeb4] ss:$8 sps:$4 sm:$0xff]  }
 0x59b   :  { %5557 = vmatpush1.bf16.msra.mxu0 %v8078_v37  ;;  %5850 = vmatprep.subr.bf16.mxu1 %v8134_v63  ;;  %v8213_v63 = vld [vmem:[#allocation4 + $0xeb0] ss:$8 sps:$4 sm:$0xff]  }
 0x59c   :  { %5558 = vmatprep.subr.bf16.mxu0 %v8083_v24  ;;  %v4968_v24 = vld [vmem:[#allocation6 + $0x3] ss:$8 sm:$0x3] }
 0x59d   :  { %v4973_v54 = vrot.slane %v4968_v24, %v8940_v30  ;;  %v4977_v31 = vrot.slane %v4968_v24, %v8942_v32 }
 0x59e   :  { %5851 = vmatpush1.bf16.msra.mxu1 %v8132_v2  ;;  %v8218_v2 = vld [vmem:[#allocation4 + $0xec4] ss:$8 sps:$4 sm:$0xff]  }
 0x59f   :  { %5559 = vmatpush1.bf16.msra.mxu0 %v8081_v60  ;;  %5852 = vmatprep.subr.bf16.mxu1 %v8137_v43  ;;  %v8216_v43 = vld [vmem:[#allocation4 + $0xec0] ss:$8 sps:$4 sm:$0xff]  }
 0x5a0   :  { %5560 = vmatprep.subr.bf16.mxu0 %v8086_v62 }
 0x5a2   :  { %5853 = vmatpush1.bf16.msra.mxu1 %v8135_v46  ;;  %v8221_v46 = vld [vmem:[#allocation4 + $0xed4] ss:$8 sps:$4 sm:$0xff]  }
 0x5a3   :  { %5561 = vmatpush1.bf16.msra.mxu0 %v8084_v28  ;;  %5854 = vmatprep.subr.bf16.mxu1 %v8140_v61  ;;  %v8219_v61 = vld [vmem:[#allocation4 + $0xed0] ss:$8 sps:$4 sm:$0xff]  }
 0x5a4   :  { %5562 = vmatprep.subr.bf16.mxu0 %v8089_v29 }
 0x5a6   :  { %5855 = vmatpush1.bf16.msra.mxu1 %v8138_v19  ;;  %v8224_v19 = vld [vmem:[#allocation4 + $0xee4] ss:$8 sps:$4 sm:$0xff]  }
 0x5a7   :  { %5563 = vmatpush1.bf16.msra.mxu0 %v8087_v20  ;;  %5856 = vmatprep.subr.bf16.mxu1 %v8143_v44  ;;  %v8222_v44 = vld [vmem:[#allocation4 + $0xee0] ss:$8 sps:$4 sm:$0xff]  }
 0x5a8   :  { %5564 = vmatprep.subr.bf16.mxu0 %v8092_v12 }
 0x5aa   :  { %5857 = vmatpush1.bf16.msra.mxu1 %v8141_v58  ;;  %v8227_v58 = vld [vmem:[#allocation4 + $0xef4] ss:$8 sps:$4 sm:$0xff]  }
 0x5ab   :  { %5565 = vmatpush1.bf16.msra.mxu0 %v8090_v22  ;;  %5858 = vmatprep.subr.bf16.mxu1 %v8146_v3  ;;  %v8225_v3 = vld [vmem:[#allocation4 + $0xef0] ss:$8 sps:$4 sm:$0xff]  }
 0x5ac   :  { %5566 = vmatprep.subr.bf16.mxu0 %v8095_v35 }
 0x5ae   :  { %5859 = vmatpush1.bf16.msra.mxu1 %v8144_v0  ;;  %v8230_v0 = vld [vmem:[#allocation4 + $0xf04] ss:$8 sps:$4 sm:$0xff]  }
 0x5af   :  { %5567 = vmatpush1.bf16.msra.mxu0 %v8093_v36  ;;  %5860 = vmatprep.subr.bf16.mxu1 %v8149_v59  ;;  %v8228_v59 = vld [vmem:[#allocation4 + $0xf00] ss:$8 sps:$4 sm:$0xff]  }
 0x5b0   :  { %5568 = vmatprep.subr.bf16.mxu0 %v8098_v8 }
 0x5b2   :  { %5861 = vmatpush1.bf16.msra.mxu1 %v8147_v26  ;;  %v8233_v26 = vld [vmem:[#allocation4 + $0xf14] ss:$8 sps:$4 sm:$0xff]  }
 0x5b3   :  { %5569 = vmatpush1.bf16.msra.mxu0 %v8096_v42  ;;  %5862 = vmatprep.subr.bf16.mxu1 %v8152_v10  ;;  %v8174_v10 = vld [vmem:[#allocation4 + $0xce0] ss:$8 sps:$4 sm:$0xff]  }
 0x5b4   :  { %5570 = vmatprep.subr.bf16.mxu0 %v8101_v55 }
 0x5b6   :  { %5863 = vmatpush1.bf16.msra.mxu1 %v8150_v11  ;;  %v8179_v11 = vld [vmem:[#allocation4 + $0xcf4] ss:$8 sps:$4 sm:$0xff]  }
 0x5b7   :  { %5571 = vmatpush1.bf16.msra.mxu0 %v8099_v56  ;;  %5864 = vmatprep.subr.bf16.mxu1 %v8155_v45  ;;  %v8177_v45 = vld [vmem:[#allocation4 + $0xcf0] ss:$8 sps:$4 sm:$0xff]  }
 0x5b8   :  { %5572 = vmatprep.subr.bf16.mxu0 %v8104_v33 }
 0x5ba   :  { %5865 = vmatpush1.bf16.msra.mxu1 %v8153_v47  ;;  %v8183_v47 = vld [vmem:[#allocation4 + $0xd10] ss:$8 sps:$4 sm:$0xff]  }
 0x5bb   :  { %5573 = vmatpush1.bf16.msra.mxu0 %v8102_v27  ;;  %5866 = vmatprep.subr.bf16.mxu1 %v8158_v48  ;;  %v8188_v48 = vld [vmem:[#allocation4 + $0xd24] ss:$8 sps:$4 sm:$0xff]  }
 0x5bc   :  { %5574 = vmatprep.subr.bf16.mxu0 %v8107_v17 }
 0x5be   :  { %5867 = vmatpush1.bf16.msra.mxu1 %v8156_v52  ;;  %v8186_v52 = vld [vmem:[#allocation4 + $0xd20] ss:$8 sps:$4 sm:$0xff]  }
 0x5bf   :  { %5575 = vmatpush1.bf16.msra.mxu0 %v8105_v34  ;;  %5868 = vmatprep.subr.bf16.mxu1 %v8161_v50  ;;  %v8191_v50 = vld [vmem:[#allocation4 + $0xd34] ss:$8 sps:$4 sm:$0xff]  }
 0x5c0   :  { %5576 = vmatprep.subr.bf16.mxu0 %v8110_v9 }
 0x5c2   :  { %5869 = vmatpush1.bf16.msra.mxu1 %v8159_v4  ;;  %v8189_v4 = vld [vmem:[#allocation4 + $0xd30] ss:$8 sps:$4 sm:$0xff]  }
 0x5c3   :  { %5577 = vmatpush1.bf16.msra.mxu0 %v8108_v41  ;;  %6041 = vmatprep.subr.bf16.mxu1 %v8164_v21  ;;  %v8194_v21 = vld [vmem:[#allocation4 + $0xd44] ss:$8 sps:$4 sm:$0xff]  }
 0x5c4   :  { %5578 = vmatprep.subr.bf16.mxu0 %v8113_v5 }
 0x5c7   :  { %5579 = vmatpush1.bf16.msra.mxu0 %v8111_v1 }
 0x5c8   :  { %6312 = vmatprep.subr.bf16.mxu0 %v8212_v51  ;;  %v8197_v51 = vld [vmem:[#allocation4 + $0xd54] ss:$8 sps:$4 sm:$0xff]  }
 0x650   :  { %v4944_v7 = vpop.f32.mrb[56].mxu1 }
 0x651   :  { %v7107_v16 = vadd.f32 %v4944_v7, %v3744_v14  ;;  %v4946_v39 = vpop.f32.mrb[57].mxu1  ;;  %v8239_v14 = vld [vmem:[#allocation4 + $0xf34] ss:$8 sps:$4 sm:$0xff]   ;;  %v8242_v7 = vld [vmem:[#allocation4 + $0xf44] ss:$8 sps:$4 sm:$0xff]  }
 0x652   :  { %v7109_v38 = vadd.f32 %v4946_v39, %v3746_v15  ;;  %v4948_v37 = vpop.f32.mrb[58].mxu1  ;;  %v8237_v15 = vld [vmem:[#allocation4 + $0xf30] ss:$8 sps:$4 sm:$0xff]  }
 0x653   :  { %8386 = vtanh.f32 %v7107_v16  ;;  %v7111_v60 = vadd.f32 %v4948_v37, %v3748_v57  ;;  %v4950_v62 = vpop.f32.mrb[59].mxu1  ;;  %v5592_v57 = vld [vmem:[#allocation6 + $0x5] ss:$8 sm:$0x3]  ;;  %v8240_v16 = vld [vmem:[#allocation4 + $0xf40] ss:$8 sps:$4 sm:$0xff]  }
 0x654   :  { %8388 = vtanh.f32 %v7109_v38  ;;  %v7113_v28 = vadd.f32 %v4950_v62, %v3750_v40  ;;  %v5597_v39 = vrot.slane %v5592_v57, %v8940_v30  ;;  %v5601_v40 = vrot.slane %v5592_v57, %v8942_v32 }
 0x655   :  { %8390 = vtanh.f32 %v7111_v60 }
 0x656   :  { %8392 = vtanh.f32 %v7113_v28 }
 0x658   :  { %v5032_v29 = vpop.f32.mrb[60].mxu1 }
 0x659   :  { %v5033_v18 = vadd.f32 %v5032_v29, %v4973_v54  ;;  %v5034_v20 = vpop.f32.mrb[61].mxu1 }
 0x65a   :  { %v5035_v12 = vadd.f32 %v5034_v20, %v4977_v31  ;;  %v5036_v22 = vpop.f32.mrb[62].mxu1 }
 0x65b   :  { %8394 = vtanh.f32 %v5033_v18  ;;  %v5037_v25 = vadd.f32 %v5036_v22, %v4973_v54  ;;  %v5038_v35 = vpop.f32.mrb[63].mxu1 }
 0x65c   :  { %8396 = vtanh.f32 %v5035_v12  ;;  %v5039_v36 = vadd.f32 %v5038_v35, %v4977_v31  ;;  %v8162_v35 = vld [vmem:[#allocation4 + $0xca0] ss:$8 sps:$4 sm:$0xff]  }
 0x65d   :  { %v9228_v8 = vpop.eup %8386  ;;  %8398 = vtanh.f32 %v5037_v25 }
 0x65e   :  { %v9230_v42 = vpop.eup %8388  ;;  %8400 = vtanh.f32 %v5039_v36  ;;  %v8167_v36 = vld [vmem:[#allocation4 + $0xcb4] ss:$8 sps:$4 sm:$0xff]  }
 0x65f   :  { %v9232_v55 = vpop.eup %8390 }
 0x660   :  { %v9234_v56 = vpop.eup %8392  ;;  %v4961_v33 = vpack.c.bf16 %v9232_v55, %v9228_v8  ;;  %v6085_v8 = vld [vmem:[#allocation6 + $0x6] ss:$8 sm:$0x3] }
 0x661   :  { %v4962_v27 = vpack.c.bf16 %v9234_v56, %v9230_v42  ;;  %v8182_v42 = vld [vmem:[#allocation4 + $0xd04] ss:$8 sps:$4 sm:$0xff]   ;;  %v8180_v56 = vld [vmem:[#allocation4 + $0xd00] ss:$8 sps:$4 sm:$0xff]   ;;  %v6090_v55 = vrot.slane %v6085_v8, %v8940_v30 }
 0x665   :  { %v8395_v34 = vpop.eup %8394 }
 0x666   :  { %v8397_v17 = vpop.eup %8396 }
 0x667   :  { %v8399_v9 = vpop.eup %8398 }
 0x668   :  { %v8401_v41 = vpop.eup %8400  ;;  %v5045_v5 = vpack.c.bf16 %v8399_v9, %v8395_v34  ;;  %v8165_v34 = vld [vmem:[#allocation4 + $0xcb0] ss:$8 sps:$4 sm:$0xff]   ;;  %v8168_v9 = vld [vmem:[#allocation4 + $0xcc0] ss:$8 sps:$4 sm:$0xff]  }
 0x669   :  { %v5046_v1 = vpack.c.bf16 %v8401_v41, %v8397_v17  ;;  %v8170_v17 = vld [vmem:[#allocation4 + $0xcc4] ss:$8 sps:$4 sm:$0xff]   ;;  %v8173_v41 = vld [vmem:[#allocation4 + $0xcd4] ss:$8 sps:$4 sm:$0xff]  }
 0x66b   :  { %5580 = vmatprep.mubr.bf16.mxu0 %v5046_v1  ;;  %v8176_v1 = vld [vmem:[#allocation4 + $0xce4] ss:$8 sps:$4 sm:$0xff]  }
 0x66c   :  { %5581 = vmatmul.mubr.bf16.vlgmr.msra.gmra.mrb[44].mxu0 %v5045_v5  ;;  %v8171_v5 = vld [vmem:[#allocation4 + $0xcd0] ss:$8 sps:$4 sm:$0xff]  }
 0x66d   :  { %6313 = vmatpush1.bf16.msra.mxu0 %v8210_v49  ;;  %v8192_v49 = vld [vmem:[#allocation4 + $0xd40] ss:$8 sps:$4 sm:$0xff]  }
 0x66e   :  { %6314 = vmatprep.subr.bf16.mxu0 %v8215_v13  ;;  %v8195_v13 = vld [vmem:[#allocation4 + $0xd50] ss:$8 sps:$4 sm:$0xff]  }
 0x671   :  { %6315 = vmatpush1.bf16.msra.mxu0 %v8213_v63  ;;  %v8200_v63 = vld [vmem:[#allocation4 + $0xd64] ss:$8 sps:$4 sm:$0xff]  }
 0x672   :  { %6316 = vmatprep.subr.bf16.mxu0 %v8218_v2  ;;  %v8198_v2 = vld [vmem:[#allocation4 + $0xd60] ss:$8 sps:$4 sm:$0xff]  }
 0x675   :  { %6317 = vmatpush1.bf16.msra.mxu0 %v8216_v43  ;;  %v8203_v43 = vld [vmem:[#allocation4 + $0xd74] ss:$8 sps:$4 sm:$0xff]  }
 0x676   :  { %6318 = vmatprep.subr.bf16.mxu0 %v8221_v46  ;;  %v8201_v46 = vld [vmem:[#allocation4 + $0xd70] ss:$8 sps:$4 sm:$0xff]  }
 0x679   :  { %6319 = vmatpush1.bf16.msra.mxu0 %v8219_v61  ;;  %v8206_v61 = vld [vmem:[#allocation4 + $0xd84] ss:$8 sps:$4 sm:$0xff]  }
 0x67a   :  { %6320 = vmatprep.subr.bf16.mxu0 %v8224_v19  ;;  %v8204_v19 = vld [vmem:[#allocation4 + $0xd80] ss:$8 sps:$4 sm:$0xff]  }
 0x67d   :  { %6321 = vmatpush1.bf16.msra.mxu0 %v8222_v44  ;;  %v8209_v44 = vld [vmem:[#allocation4 + $0xd94] ss:$8 sps:$4 sm:$0xff]  }
 0x67e   :  { %6322 = vmatprep.subr.bf16.mxu0 %v8227_v58  ;;  %v8207_v58 = vld [vmem:[#allocation4 + $0xd90] ss:$8 sps:$4 sm:$0xff]  }
 0x681   :  { %6323 = vmatpush1.bf16.msra.mxu0 %v8225_v3  ;;  %v8245_v3 = vld [vmem:[#allocation4 + $0xf54] ss:$8 sps:$4 sm:$0xff]  }
 0x682   :  { %6324 = vmatprep.subr.bf16.mxu0 %v8230_v0  ;;  %v8243_v0 = vld [vmem:[#allocation4 + $0xf50] ss:$8 sps:$4 sm:$0xff]  }
 0x685   :  { %6325 = vmatpush1.bf16.msra.mxu0 %v8228_v59  ;;  %v8248_v59 = vld [vmem:[#allocation4 + $0xf64] ss:$8 sps:$4 sm:$0xff]  }
 0x686   :  { %6326 = vmatprep.subr.bf16.mxu0 %v8233_v26  ;;  %v8246_v26 = vld [vmem:[#allocation4 + $0xf60] ss:$8 sps:$4 sm:$0xff]  }
 0x689   :  { %6327 = vmatpush1.bf16.msra.mxu0 %v8231_v53  ;;  %v8249_v53 = vld [vmem:[#allocation4 + $0xf70] ss:$8 sps:$4 sm:$0xff]  }
 0x68a   :  { %6328 = vmatprep.subr.bf16.mxu0 %v8236_v23  ;;  %v8251_v23 = vld [vmem:[#allocation4 + $0xf74] ss:$8 sps:$4 sm:$0xff]  }
 0x68d   :  { %6329 = vmatpush1.bf16.msra.mxu0 %v8234_v6  ;;  %v8254_v6 = vld [vmem:[#allocation4 + $0xf84] ss:$8 sps:$4 sm:$0xff]  }
 0x68e   :  { %6330 = vmatprep.subr.bf16.mxu0 %v8239_v14  ;;  %v8252_v14 = vld [vmem:[#allocation4 + $0xf80] ss:$8 sps:$4 sm:$0xff]  }
 0x691   :  { %6331 = vmatpush1.bf16.msra.mxu0 %v8237_v15  ;;  %v8257_v15 = vld [vmem:[#allocation4 + $0xf94] ss:$8 sps:$4 sm:$0xff]  }
 0x692   :  { %6332 = vmatprep.subr.bf16.mxu0 %v8242_v7  ;;  %v8255_v7 = vld [vmem:[#allocation4 + $0xf90] ss:$8 sps:$4 sm:$0xff]  }
 0x695   :  { %6333 = vmatpush1.bf16.msra.mxu0 %v8240_v16 }
 0x696   :  { %6334 = vmatprep.subr.bf16.mxu0 %v8245_v3 }
 0x699   :  { %6335 = vmatpush1.bf16.msra.mxu0 %v8243_v0 }
 0x69a   :  { %6336 = vmatprep.subr.bf16.mxu0 %v8248_v59 }
 0x69d   :  { %6337 = vmatpush1.bf16.msra.mxu0 %v8246_v26 }
 0x69e   :  { %6338 = vmatprep.subr.bf16.mxu0 %v8251_v23 }
 0x6a1   :  { %6339 = vmatpush1.bf16.msra.mxu0 %v8249_v53 }
 0x6a2   :  { %6340 = vmatprep.subr.bf16.mxu0 %v8254_v6 }
 0x6a5   :  { %6341 = vmatpush1.bf16.msra.mxu0 %v8252_v14 }
 0x6a6   :  { %6342 = vmatprep.subr.bf16.mxu0 %v8257_v15 }
 0x6a9   :  { %6343 = vmatpush1.bf16.msra.mxu0 %v8255_v7 }
 0x73f   :  { %v5582_v38 = vpop.f32.mrb[44].mxu0 }
 0x740   :  { %v5604_v37 = vadd.f32 %v5597_v39, %v5582_v38  ;;  %v5584_v24 = vpop.f32.mrb[45].mxu0 }
 0x741   :  { %v5605_v60 = vadd.f32 %v5601_v40, %v5584_v24  ;;  %v5586_v62 = vpop.f32.mrb[46].mxu0 }
 0x742   :  { %8402 = vtanh.f32 %v5604_v37  ;;  %v5606_v28 = vadd.f32 %v5597_v39, %v5586_v62  ;;  %v5588_v54 = vpop.f32.mrb[47].mxu0 }
 0x743   :  { %8404 = vtanh.f32 %v5605_v60  ;;  %v5607_v31 = vadd.f32 %v5601_v40, %v5588_v54 }
 0x744   :  { %8406 = vtanh.f32 %v5606_v28 }
 0x745   :  { %8408 = vtanh.f32 %v5607_v31 }
 0x74c   :  { %v8403_v29 = vpop.eup %8402 }
 0x74d   :  { %v8405_v18 = vpop.eup %8404 }
 0x74e   :  { %v8407_v20 = vpop.eup %8406 }
 0x74f   :  { %v8409_v12 = vpop.eup %8408  ;;  %v5612_v22 = vpack.c.bf16 %v8407_v20, %v8403_v29  ;;  %v6140_v20 = vld [vmem:[#allocation6 + $0x7] ss:$8 sm:$0x3] }
 0x750   :  { %v5613_v25 = vpack.c.bf16 %v8409_v12, %v8405_v18  ;;  %v6145_v12 = vrot.slane %v6140_v20, %v8940_v30 }
 0x752   :  { %5870 = vmatprep.mubr.bf16.mxu1 %v5613_v25 }
 0x753   :  { %5871 = vmatmul.mubr.bf16.vlgmr.msra.gmra.mrb[64].mxu1 %v5612_v22  ;;  %v6149_v22 = vrot.slane %v6140_v20, %v8942_v32 }
 0x754   :  { %6042 = vmatpush1.bf16.msra.mxu1 %v8162_v35  ;;  %6073 = vmatprep.mubr.bf16.mxu1 %v4962_v27  ;;  %v8185_v27 = vld [vmem:[#allocation4 + $0xd14] ss:$8 sps:$4 sm:$0xff]  }
 0x755   :  { %6043 = vmatprep.subr.bf16.mxu1 %v8167_v36 }
 0x758   :  { %6044 = vmatpush1.bf16.msra.mxu1 %v8165_v34 }
 0x759   :  { %6045 = vmatprep.subr.bf16.mxu1 %v8170_v17 }
 0x75c   :  { %6046 = vmatpush1.bf16.msra.mxu1 %v8168_v9 }
 0x75d   :  { %6047 = vmatprep.subr.bf16.mxu1 %v8173_v41 }
 0x760   :  { %6048 = vmatpush1.bf16.msra.mxu1 %v8171_v5 }
 0x761   :  { %6049 = vmatprep.subr.bf16.mxu1 %v8176_v1 }
 0x764   :  { %6050 = vmatpush1.bf16.msra.mxu1 %v8174_v10 }
 0x765   :  { %6051 = vmatprep.subr.bf16.mxu1 %v8179_v11 }
 0x768   :  { %6052 = vmatpush1.bf16.msra.mxu1 %v8177_v45 }
 0x769   :  { %6053 = vmatprep.subr.bf16.mxu1 %v8182_v42 }
 0x76c   :  { %6054 = vmatpush1.bf16.msra.mxu1 %v8180_v56 }
 0x76d   :  { %6055 = vmatprep.subr.bf16.mxu1 %v8185_v27 }
 0x770   :  { %6056 = vmatpush1.bf16.msra.mxu1 %v8183_v47 }
 0x771   :  { %6057 = vmatprep.subr.bf16.mxu1 %v8188_v48 }
 0x774   :  { %6058 = vmatpush1.bf16.msra.mxu1 %v8186_v52 }
 0x775   :  { %6059 = vmatprep.subr.bf16.mxu1 %v8191_v50 }
 0x778   :  { %6060 = vmatpush1.bf16.msra.mxu1 %v8189_v4 }
 0x779   :  { %6061 = vmatprep.subr.bf16.mxu1 %v8194_v21 }
 0x77c   :  { %6062 = vmatpush1.bf16.msra.mxu1 %v8192_v49 }
 0x77d   :  { %6063 = vmatprep.subr.bf16.mxu1 %v8197_v51 }
 0x780   :  { %6064 = vmatpush1.bf16.msra.mxu1 %v8195_v13 }
 0x781   :  { %6065 = vmatprep.subr.bf16.mxu1 %v8200_v63 }
 0x784   :  { %6066 = vmatpush1.bf16.msra.mxu1 %v8198_v2 }
 0x785   :  { %6067 = vmatprep.subr.bf16.mxu1 %v8203_v43 }
 0x788   :  { %6068 = vmatpush1.bf16.msra.mxu1 %v8201_v46 }
 0x789   :  { %6069 = vmatprep.subr.bf16.mxu1 %v8206_v61 }
 0x78c   :  { %6070 = vmatpush1.bf16.msra.mxu1 %v8204_v19 }
 0x78d   :  { %6071 = vmatprep.subr.bf16.mxu1 %v8209_v44 }
 0x790   :  { %6072 = vmatpush1.bf16.msra.mxu1 %v8207_v58 }
 0x793   :  { %6074 = vmatmul.mubr.bf16.vlgmr.msra.gmra.mrb[64].mxu1 %v4961_v33  ;;  %v6094_v33 = vrot.slane %v6085_v8, %v8942_v32 }
 0x866   :  { %v6075_v57 = vpop.f32.mrb[64].mxu1 }
 0x867   :  { %v6097_v16 = vadd.f32 %v6090_v55, %v6075_v57  ;;  %v6077_v39 = vpop.f32.mrb[65].mxu1 }
 0x868   :  { %v6098_v40 = vadd.f32 %v6094_v33, %v6077_v39  ;;  %v6079_v38 = vpop.f32.mrb[66].mxu1 }
 0x869   :  { %8410 = vtanh.f32 %v6097_v16  ;;  %v6099_v37 = vadd.f32 %v6090_v55, %v6079_v38  ;;  %v6081_v24 = vpop.f32.mrb[67].mxu1 }
 0x86a   :  { %8412 = vtanh.f32 %v6098_v40  ;;  %v6100_v60 = vadd.f32 %v6094_v33, %v6081_v24 }
 0x86b   :  { %8414 = vtanh.f32 %v6099_v37 }
 0x86c   :  { %8416 = vtanh.f32 %v6100_v60 }
 0x873   :  { %v8411_v62 = vpop.eup %8410 }
 0x874   :  { %v8413_v28 = vpop.eup %8412 }
 0x875   :  { %v8415_v54 = vpop.eup %8414 }
 0x876   :  { %v8417_v31 = vpop.eup %8416  ;;  %v6105_v29 = vpack.c.bf16 %v8415_v54, %v8411_v62 }
 0x877   :  { %v6106_v18 = vpack.c.bf16 %v8417_v31, %v8413_v28 }
 0x879   :  { %6344 = vmatprep.mubr.bf16.mxu0 %v6106_v18 }
 0x87a   :  { %6345 = vmatmul.mubr.bf16.vlgmr.msra.gmra.mrb[48].mxu0 %v6105_v29 }
 0x94d   :  { %v6346_v25 = vpop.f32.mrb[48].mxu0 }
 0x94e   :  { %v6347_v35 = vadd.f32 %v6346_v25, %v6145_v12  ;;  %v6348_v36 = vpop.f32.mrb[49].mxu0 }
 0x94f   :  { %v6349_v34 = vadd.f32 %v6348_v36, %v6149_v22  ;;  %v6350_v17 = vpop.f32.mrb[50].mxu0 }
 0x950   :  { %6355 = vst [vmem:[%s9268_s4] sm:$0xff] %v6347_v35  ;;  %v6351_v9 = vadd.f32 %v6350_v17, %v6145_v12  ;;  %v6352_v41 = vpop.f32.mrb[51].mxu0 }
 0x951   :  { %6356 = vst [vmem:[%s9268_s4 + $0x8] sm:$0xff] %v6349_v34  ;;  %v6353_v5 = vadd.f32 %v6352_v41, %v6149_v22 }
 0x952   :  { %6357 = vst [vmem:[%s9268_s4 + $0x10] sm:$0xff] %v6351_v9 }
 0x953   :  { %6358 = vst [vmem:[%s9268_s4 + $0x18] sm:$0xff] %v6353_v5 }
 0x954   :  { %6363 = vsyncpa [#allocation5], 1 }
 0x955   :  { %6364 = vsyncpa [#allocation7], 1 }

</bundles_post_ra>
